<compile_context>
chip_gen: v7x
topology: tpu7x:2x2x1
jax: 0.10.0
libtpu: 0.0.40
codegen_flags: <defaults>
</compile_context>

<pallas_src>
import functools

import jax
import jax.numpy as jnp
from jax import lax
from jax.experimental import pallas as pl
from jax.experimental.pallas import tpu as pltpu

STATE_DIM = 256      # self.state_dim in the PyTorch module
N_STEPS = 24         # self.n_steps
UNROLL = 4           # partial unroll of the propagation loop (24 = 6 * 4)


def _device_kind():
    try:
        return jax.devices()[0].device_kind.lower()
    except Exception:  # pragma: no cover - just be permissive
        return ""


def _ggnn_kernel(adj_ref, x0_ref, invl_ref,
                 wrz_ref, brz_ref, wt_ref, bt_ref,
                 w1a_ref, w1b_ref, b1_ref, w2_ref, b2_ref,
                 out_ref, *, tb, n, nc, ch, act_bf16):
    M = tb * n
    D = x0_ref.shape[-1]

    def step(x):                                   # x: (M, D) f32
        # node_representation = bmm(adj, node_representation)
        # Adjacency is block-diagonal; apply it per 128-row chunk so the
        # zero-block FLOP/DMA waste does not grow with M.
        if nc == 1:
            xm = jnp.dot(adj_ref[0, 0], x.astype(jnp.bfloat16),
                         preferred_element_type=jnp.float32)
        else:
            xb = x.reshape(nc, ch, D).astype(jnp.bfloat16)
            xm = jnp.einsum("cij,cjd->cid", adj_ref[0], xb,
                            preferred_element_type=jnp.float32).reshape(M, D)
        xm_bf = xm.astype(jnp.bfloat16)

        # Fused reset/update gate matmul: (M, D) @ (D, 2D) -> (M, 2D).
        # Bias stays (1, 2D): sublane-broadcast add, no (M, 2D) materialization.
        rz_pre = (jnp.dot(xm_bf, wrz_ref[...],
                          preferred_element_type=jnp.float32) + brz_ref[...])
        if act_bf16:
            # sigmoid(x) = 0.5*(1 + tanh(0.5*x)) -> one bf16 EUP op.
            rz = 0.5 * (jnp.tanh(0.5 * rz_pre.astype(jnp.bfloat16)) + 1.0)
            r = rz[:, :D]                          # 256-lane slice: free
            z = rz[:, D:]
            rxm = r * xm_bf                        # keep bf16 for the MXU
        else:
            rz = jax.nn.sigmoid(rz_pre)
            r = rz[:, :D]
            z = rz[:, D:]
            rxm = (r * xm).astype(jnp.bfloat16)

        hh_pre = (jnp.dot(rxm, wt_ref[...],
                          preferred_element_type=jnp.float32) + bt_ref[...])
        if act_bf16:
            h_hat = jnp.tanh(hh_pre.astype(jnp.bfloat16))
        else:
            h_hat = jnp.tanh(hh_pre)

        # (1 - z) * xm + z * h_hat  ==  xm + z * (h_hat - xm)   (blend in f32)
        return xm + z.astype(jnp.float32) * (h_hat.astype(jnp.float32) - xm)

    def body(_, x):
        for _u in range(UNROLL):
            x = step(x)
        return x

    x = lax.fori_loop(0, N_STEPS // UNROLL, body, x0_ref[0])

    # out1(concat(x, x0)) == x @ W1[:D] + x0 @ W1[D:] + b1  (split avoids concat)
    x0_bf = x0_ref[0].astype(jnp.bfloat16)
    h = jnp.tanh(
        jnp.dot(x.astype(jnp.bfloat16), w1a_ref[...],
                preferred_element_type=jnp.float32)
        + jnp.dot(x0_bf, w1b_ref[...], preferred_element_type=jnp.float32)
        + b1_ref[...])
    g = jnp.dot(h.astype(jnp.bfloat16), w2_ref[...],
                preferred_element_type=jnp.float32) + b2_ref[...]

    # Per-graph node sum (layout-preserving reshape), then multiply by 1/length.
    s = jnp.sum(g.reshape(tb, n, D), axis=1)       # (TB, D)
    out_ref[0] = s * invl_ref[0]


def encoder_ggnn_pallas(adj, x0, lengths, params, *, tb=None):
    """adj: (B,N,N) f32, x0: (B,N,D) f32 embeddings, lengths: (B,) f32."""
    B, N, D = x0.shape
    assert D == STATE_DIM

    kind = _device_kind()
    act_bf16 = ("v6" in kind) or ("v7" in kind)    # bf16 EUP path exists
    target_m = 256 if act_bf16 else 128            # 256-wide MXU on v6e/v7x
    two_cores = "v7" in kind                       # 2 TensorCores per chip

    if tb is None:
        target_tb = max(1, target_m // N)
        groups = -(-B // target_tb)
        if two_cores:
            groups = max(groups, min(B, 2))        # give both TCs work
        tb = -(-B // groups)                       # don't pad small batches up
    G = -(-B // tb)                                # number of grid steps
    Bp = G * tb
    pad = Bp - B
    if pad:
        adj = jnp.concatenate([adj, jnp.zeros((pad, N, N), adj.dtype)], axis=0)
        x0 = jnp.concatenate([x0, jnp.zeros((pad, N, D), x0.dtype)], axis=0)
        lengths = jnp.concatenate(
            [lengths, jnp.ones((pad,), lengths.dtype)], axis=0)

    M = tb * N
    # Chunk the slab at 128 rows when possible so the block-diagonal adjacency
    # only needs to be dense within a chunk.
    if (M % 128 == 0) and (128 % N == 0) and M > 128:
        CH = 128
    else:
        CH = M
    NC = M // CH
    cpg = CH // N                                  # graphs per chunk

    adj_g = adj.reshape(G, NC, cpg, N, N).astype(jnp.float32)
    eye = jnp.eye(cpg, dtype=jnp.float32)
    adj_bd = jnp.einsum("gctij,ts->gctisj", adj_g, eye)
    adj_bd = adj_bd.reshape(G, NC, CH, CH).astype(jnp.bfloat16)

    x0_g = x0.reshape(G, M, D).astype(jnp.float32)
    inv_len = (1.0 / lengths.astype(jnp.float32)).reshape(G, tb, 1)

    bf = lambda w: w.astype(jnp.bfloat16)
    full = lambda shape: pl.BlockSpec(shape, lambda g: (0, 0))

    # Fused reset/update gate weights & biases.
    wrz = jnp.concatenate([params["wr"], params["wz"]], axis=1).astype(jnp.bfloat16)
    brz = jnp.concatenate([params["br"], params["bz"]], axis=1)

    in_specs = [
        pl.BlockSpec((1, NC, CH, CH), lambda g: (g, 0, 0, 0)),  # block-diag adj (bf16)
        pl.BlockSpec((1, M, D), lambda g: (g, 0, 0)),           # x0 (f32)
        pl.BlockSpec((1, tb, 1), lambda g: (g, 0, 0)),          # 1 / lengths
        full((D, 2 * D)), full((1, 2 * D)),                     # wrz, brz
        full((D, D)), full((1, D)),                             # wt, bt
        full((D, D)), full((D, D)), full((1, D)),               # w1a, w1b, b1
        full((D, D)), full((1, D)),                             # w2, b2
    ]
    out_spec = pl.BlockSpec((1, tb, D), lambda g: (g, 0, 0))

    kernel = functools.partial(_ggnn_kernel, tb=tb, n=N, nc=NC, ch=CH,
                               act_bf16=act_bf16)
    out = pl.pallas_call(
        kernel,
        out_shape=jax.ShapeDtypeStruct((G, tb, D), jnp.float32),
        grid=(G,),
        in_specs=in_specs,
        out_specs=out_spec,
        compiler_params=pltpu.CompilerParams(
            dimension_semantics=("parallel",)),
    )(adj_bd, x0_g, inv_len,
      wrz, brz, bf(params["wt"]), params["bt"],
      bf(params["w1"][:D]), bf(params["w1"][D:]), params["b1"],
      bf(params["w2"]), params["b2"])
    return out.reshape(Bp, D)[:B]


def encoder_ggnn_reference(adj, x0, lengths, params):
    """Pure-JAX f32 reference matching the PyTorch forward semantics."""
    hp = lax.Precision.HIGHEST
    mm = functools.partial(jnp.matmul, precision=hp)
    x = x0
    for _ in range(N_STEPS):
        x = jnp.einsum("bij,bjd->bid", adj, x, precision=hp)
        r = jax.nn.sigmoid(mm(x, params["wr"]) + params["br"])
        z = jax.nn.sigmoid(mm(x, params["wz"]) + params["bz"])
        h_hat = jnp.tanh(mm(r * x, params["wt"]) + params["bt"])
        x = (1.0 - z) * x + z * h_hat
    gi = jnp.concatenate([x, x0], axis=-1)
    h = jnp.tanh(mm(gi, params["w1"]) + params["b1"])
    g = mm(h, params["w2"]) + params["b2"]
    s = jnp.sum(g, axis=1)
    return s / lengths[:, None]


def init_params(key, vocab_size, embed_size):
    assert embed_size == STATE_DIM
    D = STATE_DIM
    ks = jax.random.split(key, 7)
    # nn.Embedding default init ~ N(0, 1); Linear weights ~ N(0, 0.02), bias 0.
    return {
        "embed": jax.random.normal(ks[0], (vocab_size, D), jnp.float32),
        "wr": 0.02 * jax.random.normal(ks[1], (D, D), jnp.float32),
        "br": jnp.zeros((1, D), jnp.float32),
        "wz": 0.02 * jax.random.normal(ks[2], (D, D), jnp.float32),
        "bz": jnp.zeros((1, D), jnp.float32),
        "wt": 0.02 * jax.random.normal(ks[3], (D, D), jnp.float32),
        "bt": jnp.zeros((1, D), jnp.float32),
        "w1": 0.02 * jax.random.normal(ks[4], (2 * D, D), jnp.float32),
        "b1": jnp.zeros((1, D), jnp.float32),
        "w2": 0.02 * jax.random.normal(ks[5], (D, D), jnp.float32),
        "b2": jnp.zeros((1, D), jnp.float32),
    }


if __name__ == "__main__":
    B, N, VOCAB, D = 2, 8, 50, STATE_DIM
    assert N_STEPS % UNROLL == 0

    key = jax.random.PRNGKey(0)
    k_par, k_img, k_adj = jax.random.split(key, 3)

    params = init_params(k_par, VOCAB, D)

    images = jax.random.randint(k_img, (B, N), 0, VOCAB)            # token ids
    raw = jax.random.uniform(k_adj, (B, N, N), jnp.float32) + 1e-3
    adjmatrixs = raw / jnp.sum(raw, axis=-1, keepdims=True)         # row-normalized adjacency
    lengths = jnp.array([8.0, 5.0], jnp.float32)                    # per-graph lengths

    # Glue: embedding gather (plain JAX).
    # TODO(synk): embedding lookup stays outside the kernel (data-dependent gather).
    embeddings = params["embed"][images]                            # (B, N, D)

    out = encoder_ggnn_pallas(adjmatrixs, embeddings, lengths, params)
    out = jax.block_until_ready(out)

    ref = encoder_ggnn_reference(adjmatrixs, embeddings, lengths, params)
    assert out.shape == (B, D)
    max_err = float(jnp.max(jnp.abs(out - ref)))
    assert jnp.allclose(out, ref, rtol=2e-2, atol=2e-2), max_err

    print("KERNEL_OK")
</pallas_src>

<mosaic_0001>
module attributes {stable_mosaic.version = 11 : i64} {
  func.func @_ggnn_kernel(%arg0: i32, %arg1: memref<1x1x16x16xbf16, #tpu.memory_space<vmem>>, %arg2: memref<1x16x256xf32, #tpu.memory_space<vmem>>, %arg3: memref<1x2x1xf32, #tpu.memory_space<vmem>>, %arg4: memref<256x512xbf16, #tpu.memory_space<vmem>>, %arg5: memref<1x512xf32, #tpu.memory_space<vmem>>, %arg6: memref<256x256xbf16, #tpu.memory_space<vmem>>, %arg7: memref<1x256xf32, #tpu.memory_space<vmem>>, %arg8: memref<256x256xbf16, #tpu.memory_space<vmem>>, %arg9: memref<256x256xbf16, #tpu.memory_space<vmem>>, %arg10: memref<1x256xf32, #tpu.memory_space<vmem>>, %arg11: memref<256x256xbf16, #tpu.memory_space<vmem>>, %arg12: memref<1x256xf32, #tpu.memory_space<vmem>>, %arg13: memref<1x2x256xf32, #tpu.memory_space<vmem>>) attributes {dimension_semantics = [#tpu.dimension_semantics<parallel>], iteration_bounds = array<i64: 1>, scalar_prefetch = 0 : i64, scratch_operands = 0 : i64, tpu.core_type = #tpu.core_type<tc>, window_params = [{transform_indices = @transform_0, window_bounds = array<i64: 1, 1, 16, 16>}, {transform_indices = @transform_1, window_bounds = array<i64: 1, 16, 256>}, {transform_indices = @transform_2, window_bounds = array<i64: 1, 2, 1>}, {pipeline_mode = #tpu.pipeline_mode<synchronous>, transform_indices = @transform_3, window_bounds = array<i64: 256, 512>}, {pipeline_mode = #tpu.pipeline_mode<synchronous>, transform_indices = @transform_4, window_bounds = array<i64: 1, 512>}, {pipeline_mode = #tpu.pipeline_mode<synchronous>, transform_indices = @transform_5, window_bounds = array<i64: 256, 256>}, {pipeline_mode = #tpu.pipeline_mode<synchronous>, transform_indices = @transform_6, window_bounds = array<i64: 1, 256>}, {pipeline_mode = #tpu.pipeline_mode<synchronous>, transform_indices = @transform_7, window_bounds = array<i64: 256, 256>}, {pipeline_mode = #tpu.pipeline_mode<synchronous>, transform_indices = @transform_8, window_bounds = array<i64: 256, 256>}, {pipeline_mode = #tpu.pipeline_mode<synchronous>, transform_indices = @transform_9, window_bounds = array<i64: 1, 256>}, {pipeline_mode = #tpu.pipeline_mode<synchronous>, transform_indices = @transform_10, window_bounds = array<i64: 256, 256>}, {pipeline_mode = #tpu.pipeline_mode<synchronous>, transform_indices = @transform_11, window_bounds = array<i64: 1, 256>}, {transform_indices = @transform_12, window_bounds = array<i64: 1, 2, 256>}]} {
    %c0 = arith.constant 0 : index
    %c0_0 = arith.constant 0 : index
    %c0_1 = arith.constant 0 : index
    %0 = vector.load %arg2[%c0, %c0_0, %c0_1] : memref<1x16x256xf32, #tpu.memory_space<vmem>>, vector<1x16x256xf32>
    %1 = vector.shape_cast %0 : vector<1x16x256xf32> to vector<16x256xf32>
    %c0_i32 = arith.constant 0 : i32
    %c6_i32 = arith.constant 6 : i32
    %2 = arith.addi %c0_i32, %c6_i32 : i32
    %c1_i32 = arith.constant 1 : i32
    %3 = scf.for %arg14 = %c0_i32 to %2 step %c1_i32 iter_args(%arg15 = %1) -> (vector<16x256xf32>)  : i32 {
      %c0_24 = arith.constant 0 : index
      %c0_25 = arith.constant 0 : index
      %c0_26 = arith.constant 0 : index
      %c0_27 = arith.constant 0 : index
      %32 = vector.load %arg1[%c0_24, %c0_25, %c0_26, %c0_27] : memref<1x1x16x16xbf16, #tpu.memory_space<vmem>>, vector<1x1x16x16xbf16>
      %33 = vector.shape_cast %32 : vector<1x1x16x16xbf16> to vector<16x16xbf16>
      %34 = arith.truncf %arg15 : vector<16x256xf32> to vector<16x256xbf16>
      %cst_28 = arith.constant dense<0.000000e+00> : vector<16x256xf32>
      %35 = tpu.matmul %33, %34, %cst_28 {dimension_numbers = #tpu.dot_dimension_numbers<[1], [0], [0], [1], [0, 0, 1, 1], [], []>} : vector<16x16xbf16>, vector<16x256xbf16>, vector<16x256xf32> -> vector<16x256xf32>
      %36 = arith.truncf %35 : vector<16x256xf32> to vector<16x256xbf16>
      %c0_29 = arith.constant 0 : index
      %c0_30 = arith.constant 0 : index
      %37 = vector.load %arg4[%c0_29, %c0_30] : memref<256x512xbf16, #tpu.memory_space<vmem>>, vector<256x512xbf16>
      %cst_31 = arith.constant dense<0.000000e+00> : vector<16x512xf32>
      %38 = tpu.matmul %36, %37, %cst_31 {dimension_numbers = #tpu.dot_dimension_numbers<[1], [0], [0], [1], [0, 0, 1, 1], [], []>} : vector<16x256xbf16>, vector<256x512xbf16>, vector<16x512xf32> -> vector<16x512xf32>
      %c0_32 = arith.constant 0 : index
      %c0_33 = arith.constant 0 : index
      %39 = vector.load %arg5[%c0_32, %c0_33] : memref<1x512xf32, #tpu.memory_space<vmem>>, vector<1x512xf32>
      %40 = vector.broadcast %39 : vector<1x512xf32> to vector<16x512xf32>
      %41 = arith.addf %38, %40 : vector<16x512xf32>
      %42 = arith.negf %41 : vector<16x512xf32>
      %43 = math.exp %42 : vector<16x512xf32>
      %cst_34 = arith.constant 1.000000e+00 : f32
      %44 = vector.broadcast %cst_34 : f32 to vector<16x512xf32>
      %45 = arith.addf %44, %43 : vector<16x512xf32>
      %46 = arith.divf %44, %45 : vector<16x512xf32>
      %47 = vector.extract_strided_slice %46 {offsets = [0, 0], sizes = [16, 256], strides = [1, 1]} : vector<16x512xf32> to vector<16x256xf32>
      %48 = vector.extract_strided_slice %46 {offsets = [0, 256], sizes = [16, 256], strides = [1, 1]} : vector<16x512xf32> to vector<16x256xf32>
      %49 = arith.mulf %47, %35 : vector<16x256xf32>
      %50 = arith.truncf %49 : vector<16x256xf32> to vector<16x256xbf16>
      %c0_35 = arith.constant 0 : index
      %c0_36 = arith.constant 0 : index
      %51 = vector.load %arg6[%c0_35, %c0_36] : memref<256x256xbf16, #tpu.memory_space<vmem>>, vector<256x256xbf16>
      %cst_37 = arith.constant dense<0.000000e+00> : vector<16x256xf32>
      %52 = tpu.matmul %50, %51, %cst_37 {dimension_numbers = #tpu.dot_dimension_numbers<[1], [0], [0], [1], [0, 0, 1, 1], [], []>} : vector<16x256xbf16>, vector<256x256xbf16>, vector<16x256xf32> -> vector<16x256xf32>
      %c0_38 = arith.constant 0 : index
      %c0_39 = arith.constant 0 : index
      %53 = vector.load %arg7[%c0_38, %c0_39] : memref<1x256xf32, #tpu.memory_space<vmem>>, vector<1x256xf32>
      %54 = vector.broadcast %53 : vector<1x256xf32> to vector<16x256xf32>
      %55 = arith.addf %52, %54 : vector<16x256xf32>
      %56 = math.tanh %55 : vector<16x256xf32>
      %57 = arith.subf %56, %35 : vector<16x256xf32>
      %58 = arith.mulf %48, %57 : vector<16x256xf32>
      %59 = arith.addf %35, %58 : vector<16x256xf32>
      %c0_40 = arith.constant 0 : index
      %c0_41 = arith.constant 0 : index
      %c0_42 = arith.constant 0 : index
      %c0_43 = arith.constant 0 : index
      %60 = vector.load %arg1[%c0_40, %c0_41, %c0_42, %c0_43] : memref<1x1x16x16xbf16, #tpu.memory_space<vmem>>, vector<1x1x16x16xbf16>
      %61 = vector.shape_cast %60 : vector<1x1x16x16xbf16> to vector<16x16xbf16>
      %62 = arith.truncf %59 : vector<16x256xf32> to vector<16x256xbf16>
      %cst_44 = arith.constant dense<0.000000e+00> : vector<16x256xf32>
      %63 = tpu.matmul %61, %62, %cst_44 {dimension_numbers = #tpu.dot_dimension_numbers<[1], [0], [0], [1], [0, 0, 1, 1], [], []>} : vector<16x16xbf16>, vector<16x256xbf16>, vector<16x256xf32> -> vector<16x256xf32>
      %64 = arith.truncf %63 : vector<16x256xf32> to vector<16x256xbf16>
      %c0_45 = arith.constant 0 : index
      %c0_46 = arith.constant 0 : index
      %65 = vector.load %arg4[%c0_45, %c0_46] : memref<256x512xbf16, #tpu.memory_space<vmem>>, vector<256x512xbf16>
      %cst_47 = arith.constant dense<0.000000e+00> : vector<16x512xf32>
      %66 = tpu.matmul %64, %65, %cst_47 {dimension_numbers = #tpu.dot_dimension_numbers<[1], [0], [0], [1], [0, 0, 1, 1], [], []>} : vector<16x256xbf16>, vector<256x512xbf16>, vector<16x512xf32> -> vector<16x512xf32>
      %c0_48 = arith.constant 0 : index
      %c0_49 = arith.constant 0 : index
      %67 = vector.load %arg5[%c0_48, %c0_49] : memref<1x512xf32, #tpu.memory_space<vmem>>, vector<1x512xf32>
      %68 = vector.broadcast %67 : vector<1x512xf32> to vector<16x512xf32>
      %69 = arith.addf %66, %68 : vector<16x512xf32>
      %70 = arith.negf %69 : vector<16x512xf32>
      %71 = math.exp %70 : vector<16x512xf32>
      %cst_50 = arith.constant 1.000000e+00 : f32
      %72 = vector.broadcast %cst_50 : f32 to vector<16x512xf32>
      %73 = arith.addf %72, %71 : vector<16x512xf32>
      %74 = arith.divf %72, %73 : vector<16x512xf32>
      %75 = vector.extract_strided_slice %74 {offsets = [0, 0], sizes = [16, 256], strides = [1, 1]} : vector<16x512xf32> to vector<16x256xf32>
      %76 = vector.extract_strided_slice %74 {offsets = [0, 256], sizes = [16, 256], strides = [1, 1]} : vector<16x512xf32> to vector<16x256xf32>
      %77 = arith.mulf %75, %63 : vector<16x256xf32>
      %78 = arith.truncf %77 : vector<16x256xf32> to vector<16x256xbf16>
      %c0_51 = arith.constant 0 : index
      %c0_52 = arith.constant 0 : index
      %79 = vector.load %arg6[%c0_51, %c0_52] : memref<256x256xbf16, #tpu.memory_space<vmem>>, vector<256x256xbf16>
      %cst_53 = arith.constant dense<0.000000e+00> : vector<16x256xf32>
      %80 = tpu.matmul %78, %79, %cst_53 {dimension_numbers = #tpu.dot_dimension_numbers<[1], [0], [0], [1], [0, 0, 1, 1], [], []>} : vector<16x256xbf16>, vector<256x256xbf16>, vector<16x256xf32> -> vector<16x256xf32>
      %c0_54 = arith.constant 0 : index
      %c0_55 = arith.constant 0 : index
      %81 = vector.load %arg7[%c0_54, %c0_55] : memref<1x256xf32, #tpu.memory_space<vmem>>, vector<1x256xf32>
      %82 = vector.broadcast %81 : vector<1x256xf32> to vector<16x256xf32>
      %83 = arith.addf %80, %82 : vector<16x256xf32>
      %84 = math.tanh %83 : vector<16x256xf32>
      %85 = arith.subf %84, %63 : vector<16x256xf32>
      %86 = arith.mulf %76, %85 : vector<16x256xf32>
      %87 = arith.addf %63, %86 : vector<16x256xf32>
      %c0_56 = arith.constant 0 : index
      %c0_57 = arith.constant 0 : index
      %c0_58 = arith.constant 0 : index
      %c0_59 = arith.constant 0 : index
      %88 = vector.load %arg1[%c0_56, %c0_57, %c0_58, %c0_59] : memref<1x1x16x16xbf16, #tpu.memory_space<vmem>>, vector<1x1x16x16xbf16>
      %89 = vector.shape_cast %88 : vector<1x1x16x16xbf16> to vector<16x16xbf16>
      %90 = arith.truncf %87 : vector<16x256xf32> to vector<16x256xbf16>
      %cst_60 = arith.constant dense<0.000000e+00> : vector<16x256xf32>
      %91 = tpu.matmul %89, %90, %cst_60 {dimension_numbers = #tpu.dot_dimension_numbers<[1], [0], [0], [1], [0, 0, 1, 1], [], []>} : vector<16x16xbf16>, vector<16x256xbf16>, vector<16x256xf32> -> vector<16x256xf32>
      %92 = arith.truncf %91 : vector<16x256xf32> to vector<16x256xbf16>
      %c0_61 = arith.constant 0 : index
      %c0_62 = arith.constant 0 : index
      %93 = vector.load %arg4[%c0_61, %c0_62] : memref<256x512xbf16, #tpu.memory_space<vmem>>, vector<256x512xbf16>
      %cst_63 = arith.constant dense<0.000000e+00> : vector<16x512xf32>
      %94 = tpu.matmul %92, %93, %cst_63 {dimension_numbers = #tpu.dot_dimension_numbers<[1], [0], [0], [1], [0, 0, 1, 1], [], []>} : vector<16x256xbf16>, vector<256x512xbf16>, vector<16x512xf32> -> vector<16x512xf32>
      %c0_64 = arith.constant 0 : index
      %c0_65 = arith.constant 0 : index
      %95 = vector.load %arg5[%c0_64, %c0_65] : memref<1x512xf32, #tpu.memory_space<vmem>>, vector<1x512xf32>
      %96 = vector.broadcast %95 : vector<1x512xf32> to vector<16x512xf32>
      %97 = arith.addf %94, %96 : vector<16x512xf32>
      %98 = arith.negf %97 : vector<16x512xf32>
      %99 = math.exp %98 : vector<16x512xf32>
      %cst_66 = arith.constant 1.000000e+00 : f32
      %100 = vector.broadcast %cst_66 : f32 to vector<16x512xf32>
      %101 = arith.addf %100, %99 : vector<16x512xf32>
      %102 = arith.divf %100, %101 : vector<16x512xf32>
      %103 = vector.extract_strided_slice %102 {offsets = [0, 0], sizes = [16, 256], strides = [1, 1]} : vector<16x512xf32> to vector<16x256xf32>
      %104 = vector.extract_strided_slice %102 {offsets = [0, 256], sizes = [16, 256], strides = [1, 1]} : vector<16x512xf32> to vector<16x256xf32>
      %105 = arith.mulf %103, %91 : vector<16x256xf32>
      %106 = arith.truncf %105 : vector<16x256xf32> to vector<16x256xbf16>
      %c0_67 = arith.constant 0 : index
      %c0_68 = arith.constant 0 : index
      %107 = vector.load %arg6[%c0_67, %c0_68] : memref<256x256xbf16, #tpu.memory_space<vmem>>, vector<256x256xbf16>
      %cst_69 = arith.constant dense<0.000000e+00> : vector<16x256xf32>
      %108 = tpu.matmul %106, %107, %cst_69 {dimension_numbers = #tpu.dot_dimension_numbers<[1], [0], [0], [1], [0, 0, 1, 1], [], []>} : vector<16x256xbf16>, vector<256x256xbf16>, vector<16x256xf32> -> vector<16x256xf32>
      %c0_70 = arith.constant 0 : index
      %c0_71 = arith.constant 0 : index
      %109 = vector.load %arg7[%c0_70, %c0_71] : memref<1x256xf32, #tpu.memory_space<vmem>>, vector<1x256xf32>
      %110 = vector.broadcast %109 : vector<1x256xf32> to vector<16x256xf32>
      %111 = arith.addf %108, %110 : vector<16x256xf32>
      %112 = math.tanh %111 : vector<16x256xf32>
      %113 = arith.subf %112, %91 : vector<16x256xf32>
      %114 = arith.mulf %104, %113 : vector<16x256xf32>
      %115 = arith.addf %91, %114 : vector<16x256xf32>
      %c0_72 = arith.constant 0 : index
      %c0_73 = arith.constant 0 : index
      %c0_74 = arith.constant 0 : index
      %c0_75 = arith.constant 0 : index
      %116 = vector.load %arg1[%c0_72, %c0_73, %c0_74, %c0_75] : memref<1x1x16x16xbf16, #tpu.memory_space<vmem>>, vector<1x1x16x16xbf16>
      %117 = vector.shape_cast %116 : vector<1x1x16x16xbf16> to vector<16x16xbf16>
      %118 = arith.truncf %115 : vector<16x256xf32> to vector<16x256xbf16>
      %cst_76 = arith.constant dense<0.000000e+00> : vector<16x256xf32>
      %119 = tpu.matmul %117, %118, %cst_76 {dimension_numbers = #tpu.dot_dimension_numbers<[1], [0], [0], [1], [0, 0, 1, 1], [], []>} : vector<16x16xbf16>, vector<16x256xbf16>, vector<16x256xf32> -> vector<16x256xf32>
      %120 = arith.truncf %119 : vector<16x256xf32> to vector<16x256xbf16>
      %c0_77 = arith.constant 0 : index
      %c0_78 = arith.constant 0 : index
      %121 = vector.load %arg4[%c0_77, %c0_78] : memref<256x512xbf16, #tpu.memory_space<vmem>>, vector<256x512xbf16>
      %cst_79 = arith.constant dense<0.000000e+00> : vector<16x512xf32>
      %122 = tpu.matmul %120, %121, %cst_79 {dimension_numbers = #tpu.dot_dimension_numbers<[1], [0], [0], [1], [0, 0, 1, 1], [], []>} : vector<16x256xbf16>, vector<256x512xbf16>, vector<16x512xf32> -> vector<16x512xf32>
      %c0_80 = arith.constant 0 : index
      %c0_81 = arith.constant 0 : index
      %123 = vector.load %arg5[%c0_80, %c0_81] : memref<1x512xf32, #tpu.memory_space<vmem>>, vector<1x512xf32>
      %124 = vector.broadcast %123 : vector<1x512xf32> to vector<16x512xf32>
      %125 = arith.addf %122, %124 : vector<16x512xf32>
      %126 = arith.negf %125 : vector<16x512xf32>
      %127 = math.exp %126 : vector<16x512xf32>
      %cst_82 = arith.constant 1.000000e+00 : f32
      %128 = vector.broadcast %cst_82 : f32 to vector<16x512xf32>
      %129 = arith.addf %128, %127 : vector<16x512xf32>
      %130 = arith.divf %128, %129 : vector<16x512xf32>
      %131 = vector.extract_strided_slice %130 {offsets = [0, 0], sizes = [16, 256], strides = [1, 1]} : vector<16x512xf32> to vector<16x256xf32>
      %132 = vector.extract_strided_slice %130 {offsets = [0, 256], sizes = [16, 256], strides = [1, 1]} : vector<16x512xf32> to vector<16x256xf32>
      %133 = arith.mulf %131, %119 : vector<16x256xf32>
      %134 = arith.truncf %133 : vector<16x256xf32> to vector<16x256xbf16>
      %c0_83 = arith.constant 0 : index
      %c0_84 = arith.constant 0 : index
      %135 = vector.load %arg6[%c0_83, %c0_84] : memref<256x256xbf16, #tpu.memory_space<vmem>>, vector<256x256xbf16>
      %cst_85 = arith.constant dense<0.000000e+00> : vector<16x256xf32>
      %136 = tpu.matmul %134, %135, %cst_85 {dimension_numbers = #tpu.dot_dimension_numbers<[1], [0], [0], [1], [0, 0, 1, 1], [], []>} : vector<16x256xbf16>, vector<256x256xbf16>, vector<16x256xf32> -> vector<16x256xf32>
      %c0_86 = arith.constant 0 : index
      %c0_87 = arith.constant 0 : index
      %137 = vector.load %arg7[%c0_86, %c0_87] : memref<1x256xf32, #tpu.memory_space<vmem>>, vector<1x256xf32>
      %138 = vector.broadcast %137 : vector<1x256xf32> to vector<16x256xf32>
      %139 = arith.addf %136, %138 : vector<16x256xf32>
      %140 = math.tanh %139 : vector<16x256xf32>
      %141 = arith.subf %140, %119 : vector<16x256xf32>
      %142 = arith.mulf %132, %141 : vector<16x256xf32>
      %143 = arith.addf %119, %142 : vector<16x256xf32>
      scf.yield %143 : vector<16x256xf32>
    }
    %c0_2 = arith.constant 0 : index
    %c0_3 = arith.constant 0 : index
    %c0_4 = arith.constant 0 : index
    %4 = vector.load %arg2[%c0_2, %c0_3, %c0_4] : memref<1x16x256xf32, #tpu.memory_space<vmem>>, vector<1x16x256xf32>
    %5 = vector.shape_cast %4 : vector<1x16x256xf32> to vector<16x256xf32>
    %6 = arith.truncf %5 : vector<16x256xf32> to vector<16x256xbf16>
    %7 = arith.truncf %3 : vector<16x256xf32> to vector<16x256xbf16>
    %c0_5 = arith.constant 0 : index
    %c0_6 = arith.constant 0 : index
    %8 = vector.load %arg8[%c0_5, %c0_6] : memref<256x256xbf16, #tpu.memory_space<vmem>>, vector<256x256xbf16>
    %cst = arith.constant dense<0.000000e+00> : vector<16x256xf32>
    %9 = tpu.matmul %7, %8, %cst {dimension_numbers = #tpu.dot_dimension_numbers<[1], [0], [0], [1], [0, 0, 1, 1], [], []>} : vector<16x256xbf16>, vector<256x256xbf16>, vector<16x256xf32> -> vector<16x256xf32>
    %c0_7 = arith.constant 0 : index
    %c0_8 = arith.constant 0 : index
    %10 = vector.load %arg9[%c0_7, %c0_8] : memref<256x256xbf16, #tpu.memory_space<vmem>>, vector<256x256xbf16>
    %cst_9 = arith.constant dense<0.000000e+00> : vector<16x256xf32>
    %11 = tpu.matmul %6, %10, %cst_9 {dimension_numbers = #tpu.dot_dimension_numbers<[1], [0], [0], [1], [0, 0, 1, 1], [], []>} : vector<16x256xbf16>, vector<256x256xbf16>, vector<16x256xf32> -> vector<16x256xf32>
    %12 = arith.addf %9, %11 : vector<16x256xf32>
    %c0_10 = arith.constant 0 : index
    %c0_11 = arith.constant 0 : index
    %13 = vector.load %arg10[%c0_10, %c0_11] : memref<1x256xf32, #tpu.memory_space<vmem>>, vector<1x256xf32>
    %14 = vector.broadcast %13 : vector<1x256xf32> to vector<16x256xf32>
    %15 = arith.addf %12, %14 : vector<16x256xf32>
    %16 = math.tanh %15 : vector<16x256xf32>
    %17 = arith.truncf %16 : vector<16x256xf32> to vector<16x256xbf16>
    %c0_12 = arith.constant 0 : index
    %c0_13 = arith.constant 0 : index
    %18 = vector.load %arg11[%c0_12, %c0_13] : memref<256x256xbf16, #tpu.memory_space<vmem>>, vector<256x256xbf16>
    %cst_14 = arith.constant dense<0.000000e+00> : vector<16x256xf32>
    %19 = tpu.matmul %17, %18, %cst_14 {dimension_numbers = #tpu.dot_dimension_numbers<[1], [0], [0], [1], [0, 0, 1, 1], [], []>} : vector<16x256xbf16>, vector<256x256xbf16>, vector<16x256xf32> -> vector<16x256xf32>
    %c0_15 = arith.constant 0 : index
    %c0_16 = arith.constant 0 : index
    %20 = vector.load %arg12[%c0_15, %c0_16] : memref<1x256xf32, #tpu.memory_space<vmem>>, vector<1x256xf32>
    %21 = vector.broadcast %20 : vector<1x256xf32> to vector<16x256xf32>
    %22 = arith.addf %19, %21 : vector<16x256xf32>
    %23 = vector.shape_cast %22 : vector<16x256xf32> to vector<2x8x256xf32>
    %cst_17 = arith.constant dense<0.000000e+00> : vector<2x256xf32>
    %24 = vector.multi_reduction <add>, %23, %cst_17 [1] : vector<2x8x256xf32> to vector<2x256xf32>
    %c0_18 = arith.constant 0 : index
    %c0_19 = arith.constant 0 : index
    %c0_20 = arith.constant 0 : index
    %25 = vector.load %arg3[%c0_18, %c0_19, %c0_20] : memref<1x2x1xf32, #tpu.memory_space<vmem>>, vector<1x2x1xf32>
    %26 = vector.shape_cast %25 : vector<1x2x1xf32> to vector<2x1xf32>
    %27 = vector.broadcast %26 : vector<2x1xf32> to vector<2x256xf32>
    %28 = arith.mulf %24, %27 : vector<2x256xf32>
    %c0_21 = arith.constant 0 : index
    %c0_22 = arith.constant 0 : index
    %c0_23 = arith.constant 0 : index
    %29 = vector.load %arg13[%c0_21, %c0_22, %c0_23] : memref<1x2x256xf32, #tpu.memory_space<vmem>>, vector<1x2x256xf32>
    %30 = vector.shape_cast %29 : vector<1x2x256xf32> to vector<2x256xf32>
    %31 = vector.shape_cast %28 : vector<2x256xf32> to vector<1x2x256xf32>
    tpu.vector_store %arg13[%c0_21, %c0_22, %c0_23], %31 {strides = array<i32>} : memref<1x2x256xf32, #tpu.memory_space<vmem>>, vector<1x2x256xf32>,
    return
  }
  func.func @transform_0(%arg0: i32) -> (i32, i32, i32, i32) {
    %c0_i32 = arith.constant 0 : i32
    %c0_i32_0 = arith.constant 0 : i32
    %c0_i32_1 = arith.constant 0 : i32
    %c0_i32_2 = arith.constant 0 : i32
    return %arg0, %c0_i32, %c0_i32_0, %c0_i32_1 : i32, i32, i32, i32
  }
  func.func @transform_1(%arg0: i32) -> (i32, i32, i32) {
    %c0_i32 = arith.constant 0 : i32
    %c0_i32_0 = arith.constant 0 : i32
    %c0_i32_1 = arith.constant 0 : i32
    return %arg0, %c0_i32, %c0_i32_0 : i32, i32, i32
  }
  func.func @transform_2(%arg0: i32) -> (i32, i32, i32) {
    %c0_i32 = arith.constant 0 : i32
    %c0_i32_0 = arith.constant 0 : i32
    %c0_i32_1 = arith.constant 0 : i32
    return %arg0, %c0_i32, %c0_i32_0 : i32, i32, i32
  }
  func.func @transform_3(%arg0: i32) -> (i32, i32) {
    %c0_i32 = arith.constant 0 : i32
    %c0_i32_0 = arith.constant 0 : i32
    %c0_i32_1 = arith.constant 0 : i32
    return %c0_i32, %c0_i32_0 : i32, i32
  }
  func.func @transform_4(%arg0: i32) -> (i32, i32) {
    %c0_i32 = arith.constant 0 : i32
    %c0_i32_0 = arith.constant 0 : i32
    %c0_i32_1 = arith.constant 0 : i32
    return %c0_i32, %c0_i32_0 : i32, i32
  }
  func.func @transform_5(%arg0: i32) -> (i32, i32) {
    %c0_i32 = arith.constant 0 : i32
    %c0_i32_0 = arith.constant 0 : i32
    %c0_i32_1 = arith.constant 0 : i32
    return %c0_i32, %c0_i32_0 : i32, i32
  }
  func.func @transform_6(%arg0: i32) -> (i32, i32) {
    %c0_i32 = arith.constant 0 : i32
    %c0_i32_0 = arith.constant 0 : i32
    %c0_i32_1 = arith.constant 0 : i32
    return %c0_i32, %c0_i32_0 : i32, i32
  }
  func.func @transform_7(%arg0: i32) -> (i32, i32) {
    %c0_i32 = arith.constant 0 : i32
    %c0_i32_0 = arith.constant 0 : i32
    %c0_i32_1 = arith.constant 0 : i32
    return %c0_i32, %c0_i32_0 : i32, i32
  }
  func.func @transform_8(%arg0: i32) -> (i32, i32) {
    %c0_i32 = arith.constant 0 : i32
    %c0_i32_0 = arith.constant 0 : i32
    %c0_i32_1 = arith.constant 0 : i32
    return %c0_i32, %c0_i32_0 : i32, i32
  }
  func.func @transform_9(%arg0: i32) -> (i32, i32) {
    %c0_i32 = arith.constant 0 : i32
    %c0_i32_0 = arith.constant 0 : i32
    %c0_i32_1 = arith.constant 0 : i32
    return %c0_i32, %c0_i32_0 : i32, i32
  }
  func.func @transform_10(%arg0: i32) -> (i32, i32) {
    %c0_i32 = arith.constant 0 : i32
    %c0_i32_0 = arith.constant 0 : i32
    %c0_i32_1 = arith.constant 0 : i32
    return %c0_i32, %c0_i32_0 : i32, i32
  }
  func.func @transform_11(%arg0: i32) -> (i32, i32) {
    %c0_i32 = arith.constant 0 : i32
    %c0_i32_0 = arith.constant 0 : i32
    %c0_i32_1 = arith.constant 0 : i32
    return %c0_i32, %c0_i32_0 : i32, i32
  }
  func.func @transform_12(%arg0: i32) -> (i32, i32, i32) {
    %c0_i32 = arith.constant 0 : i32
    %c0_i32_0 = arith.constant 0 : i32
    %c0_i32_1 = arith.constant 0 : i32
    return %arg0, %c0_i32, %c0_i32_0 : i32, i32, i32
  }
}

</mosaic_0001>

<bundles_post_ra>
// kernel: tpu_custom_call.1
= control target key start
LH: loop header
LB: loop body
LE: loop exit
PB: predicated region body
PF: predicated region fallthrough
CT: control target
= control target key end

     0   :  { %17 = vsyncpa [#allocation3], 0  ;;  %s4780_s0 = inlined_call_operand.hbm [shape: bf16[1,1,16,16], index: 0, kind: input, shape index: {}]   ;;  %s4781_s1 = inlined_call_operand.hbm [shape: f32[1,16,256], index: 1, kind: input, shape index: {}]   ;;  %s4782_s2 = inlined_call_operand.vmem [shape: f32[1,2,1], index: 2, kind: input, shape index: {}]   ;;  %s4783_s3 = inlined_call_operand.hbm [shape: bf16[256,512], index: 3, kind: input, shape index: {}]   ;;  %s4784_s4 = inlined_call_operand.vmem [shape: f32[1,512], index: 4, kind: input, shape index: {}]   ;;  %s4785_s5 = inlined_call_operand.hbm [shape: bf16[256,256], index: 5, kind: input, shape index: {}]   ;;  %s4786_s6 = inlined_call_operand.vmem [shape: f32[1,256], index: 6, kind: input, shape index: {}]   ;;  %s4787_s7 = inlined_call_operand.hbm [shape: bf16[256,256], index: 7, kind: input, shape index: {}]   ;;  %s4788_s8 = inlined_call_operand.hbm [shape: bf16[256,256], index: 8, kind: input, shape index: {}]   ;;  %s4789_s9 = inlined_call_operand.vmem [shape: f32[1,256], index: 9, kind: input, shape index: {}]   ;;  %s4790_s10 = inlined_call_operand.hbm [shape: bf16[256,256], index: 10, kind: input, shape index: {}]   ;;  %s4791_s11 = inlined_call_operand.vmem [shape: f32[1,256], index: 11, kind: input, shape index: {}]   ;;  %s4792_s12 = inlined_call_operand.hbm [shape: f32[1,2,256], index: 12, kind: output, shape index: {}]  }
   0x1   :  { %18 = vsyncpa [#allocation6], 0 }
   0x2   :  { %19 = vsyncpa [#allocation9], 0 }
   0x3   :  { %20 = vsyncpa [#allocation12], 0 }
   0x4   :  { %21 = vsyncpa [#allocation4], 0  ;;  %s3677_s21 = smov [#allocation5]   ;;  %s3451_s25 = scalar_lea.hbm %s4781_s1, 512 }
   0x5   :  { %s39_s22 = sshll.u32 %s3677_s21, 4  ;;  %p3452_p0 = scmp.ne.s32.totalorder %s4781_s1, %s3451_s25  ;;  %s40_s22 = int_to_ptr.vmem [resolvable:$true] %s39_s22 }
   0x6   :  { %p3455_p1 = scmp.lt.u32.totalorder %s3451_s25, %s4781_s1 }
   0x8   :  { %p3457_p2 = pnand %p3455_p1, %p3452_p0 }
   0xa   :  { %3460 = shalt.err (!%p3457_p2)
}
   0xb   :  { %s3461_s30 = scalar_lea.vmem %s40_s22, 512  ;;  %p3466_p4 = scmp.lt.s32.totalorder %s40_s22, %s40_s22 }
   0xc   :  { %p3462_p3 = scmp.ne.s32.totalorder %s40_s22, %s3461_s30  ;;  %p3467_p5 = scmp.lt.s32.totalorder %s3461_s30, %s3461_s30 }
   0xe   :  { %p3468_p6 = por %p3467_p5, %p3466_p4 }
  0x10   :  { %p3469_p7 = pnand %p3468_p6, %p3462_p3 }
  0x12   :  { %3472 = shalt.err (!%p3469_p7)
}
  0x13   :  { %s3678_s13 = smov 256   ;;  %s3679_s14 = smov 16  }
  0x14   :  { %45 = dma.hbm_to_vmem [thread:$0]  %s4781_s1, 512, %s40_s22, [#allocation6], %s3678_s13, %s3678_s13, %s3679_s14  }
  0x15   :  { %s3680_s17 = smov [#allocation8]   ;;  %s3473_s21 = scalar_lea.hbm %s4785_s5, 4096 }
  0x16   :  { %s67_s18 = sshll.u32 %s3680_s17, 4  ;;  %p3474_p8 = scmp.ne.s32.totalorder %s4785_s5, %s3473_s21  ;;  %s68_s18 = int_to_ptr.vmem [resolvable:$true] %s67_s18 }
  0x17   :  { %p3477_p9 = scmp.lt.u32.totalorder %s3473_s21, %s4785_s5 }
  0x19   :  { %p3479_p10 = pnand %p3477_p9, %p3474_p8 }
  0x1b   :  { %3482 = shalt.err (!%p3479_p10)
}
  0x1c   :  { %s3483_s27 = scalar_lea.vmem %s68_s18, 4096  ;;  %p3488_p12 = scmp.lt.s32.totalorder %s68_s18, %s68_s18 }
  0x1d   :  { %p3484_p11 = scmp.ne.s32.totalorder %s68_s18, %s3483_s27  ;;  %p3489_p13 = scmp.lt.s32.totalorder %s3483_s27, %s3483_s27 }
  0x1f   :  { %p3490_p0 = por %p3489_p13, %p3488_p12 }
  0x21   :  { %p3491_p1 = pnand %p3490_p0, %p3484_p11 }
  0x23   :  { %3494 = shalt.err (!%p3491_p1)
}
  0x24   :  { %s3681_s1 = smov 128   ;;  %s3682_s22 = smov 8  }
  0x25   :  { %73 = dma.hbm_to_vmem [thread:$0]  %s4785_s5, 4096, %s68_s18, [#allocation9], %s3681_s1, %s3681_s1, %s3682_s22  }
  0x26   :  { %s3683_s30 = smov [#allocation11]   ;;  %s3684_s16 = smov [#allocation2]  }
  0x27   :  { %s93_s15 = sshll.u32 %s3683_s30, 4  ;;  %s27_s17 = sshll.u32 %s3684_s16, 4  ;;  %s94_s15 = int_to_ptr.vmem [resolvable:$true] %s93_s15  ;;  %s3789_s17 = int_to_ptr.vmem [resolvable:$true] %s27_s17 }
  0x28   :  { %s3495_s21 = scalar_lea.hbm %s4788_s8, 4096 }
  0x29   :  { %p3496_p2 = scmp.ne.s32.totalorder %s4788_s8, %s3495_s21  ;;  %p3499_p3 = scmp.lt.u32.totalorder %s3495_s21, %s4788_s8 }
  0x2b   :  { %p3501_p4 = pnand %p3499_p3, %p3496_p2 }
  0x2d   :  { %3504 = shalt.err (!%p3501_p4)
}
  0x2e   :  { %s3505_s5 = scalar_lea.vmem %s94_s15, 4096  ;;  %p3510_p6 = scmp.lt.s32.totalorder %s94_s15, %s94_s15 }
  0x2f   :  { %p3506_p5 = scmp.ne.s32.totalorder %s94_s15, %s3505_s5  ;;  %p3511_p7 = scmp.lt.s32.totalorder %s3505_s5, %s3505_s5 }
  0x31   :  { %p3512_p8 = por %p3511_p7, %p3510_p6 }
  0x33   :  { %p3513_p9 = pnand %p3512_p8, %p3506_p5 }
  0x35   :  { %3516 = shalt.err (!%p3513_p9)
}
  0x36   :  { %99 = dma.hbm_to_vmem [thread:$0]  %s4788_s8, 4096, %s94_s15, [#allocation12], %s3681_s1, %s3681_s1, %s3682_s22  }
  0x37   :  { %s3517_s30 = scalar_lea.hbm %s4780_s0, 128 }
  0x38   :  { %p3518_p10 = scmp.ne.s32.totalorder %s4780_s0, %s3517_s30  ;;  %p3521_p11 = scmp.lt.u32.totalorder %s3517_s30, %s4780_s0 }
  0x3a   :  { %p3523_p12 = pnand %p3521_p11, %p3518_p10 }
  0x3c   :  { %3526 = shalt.err (!%p3523_p12)
}
  0x3d   :  { %s3527_s23 = scalar_lea.vmem %s3789_s17, 128  ;;  %p3532_p0 = scmp.lt.s32.totalorder %s3789_s17, %s3789_s17 }
  0x3e   :  { %p3528_p13 = scmp.ne.s32.totalorder %s3789_s17, %s3527_s23  ;;  %p3533_p1 = scmp.lt.s32.totalorder %s3527_s23, %s3527_s23 }
  0x40   :  { %p3534_p2 = por %p3533_p1, %p3532_p0 }
  0x42   :  { %p3535_p3 = pnand %p3534_p2, %p3528_p13 }
  0x44   :  { %3538 = shalt.err (!%p3535_p3)
}
  0x45   :  { %s3685_s8 = smov 64   ;;  %s3686_s15 = smov 4  }
  0x46   :  { %33 = dma.hbm_to_vmem [thread:$0]  %s4780_s0, 128, %s3789_s17, [#allocation3], %s3685_s8, %s3685_s8, %s3686_s15  }
  0x47   :  { %s3687_s26 = smov [#allocation7]   ;;  %s3688_s18 = smov [#allocation10]  }
  0x48   :  { %s53_s5 = sshll.u32 %s3687_s26, 4  ;;  %s81_s27 = sshll.u32 %s3688_s18, 4  ;;  %s54_s5 = int_to_ptr.vmem [resolvable:$true] %s53_s5  ;;  %s3823_s27 = int_to_ptr.vmem [resolvable:$true] %s81_s27 }
  0x49   :  { %s3539_s30 = scalar_lea.hbm %s4783_s3, 8192 }
  0x4a   :  { %p3540_p4 = scmp.ne.s32.totalorder %s4783_s3, %s3539_s30  ;;  %p3543_p5 = scmp.lt.u32.totalorder %s3539_s30, %s4783_s3 }
  0x4c   :  { %p3545_p6 = pnand %p3543_p5, %p3540_p4 }
  0x4e   :  { %3548 = shalt.err (!%p3545_p6)
}
  0x4f   :  { %s3549_s0 = scalar_lea.vmem %s54_s5, 8192  ;;  %p3554_p8 = scmp.lt.s32.totalorder %s54_s5, %s54_s5 }
  0x50   :  { %p3550_p7 = scmp.ne.s32.totalorder %s54_s5, %s3549_s0  ;;  %p3555_p9 = scmp.lt.s32.totalorder %s3549_s0, %s3549_s0 }
  0x52   :  { %p3556_p10 = por %p3555_p9, %p3554_p8 }
  0x54   :  { %p3557_p11 = pnand %p3556_p10, %p3550_p7 }
  0x56   :  { %3560 = shalt.err (!%p3557_p11)
}
  0x57   :  { %59 = dma.hbm_to_vmem [thread:$0]  %s4783_s3, 8192, %s54_s5, [#allocation6], %s3678_s13, %s3678_s13, %s3679_s14  }
  0x58   :  { %s3561_s24 = scalar_lea.hbm %s4787_s7, 4096 }
  0x59   :  { %p3562_p12 = scmp.ne.s32.totalorder %s4787_s7, %s3561_s24  ;;  %p3565_p13 = scmp.lt.u32.totalorder %s3561_s24, %s4787_s7 }
  0x5b   :  { %p3567_p0 = pnand %p3565_p13, %p3562_p12 }
  0x5d   :  { %3570 = shalt.err (!%p3567_p0)
}
  0x5e   :  { %s3571_s29 = scalar_lea.vmem %s3823_s27, 4096  ;;  %p3576_p2 = scmp.lt.s32.totalorder %s3823_s27, %s3823_s27 }
  0x5f   :  { %p3572_p1 = scmp.ne.s32.totalorder %s3823_s27, %s3571_s29  ;;  %p3577_p3 = scmp.lt.s32.totalorder %s3571_s29, %s3571_s29 }
  0x61   :  { %p3578_p4 = por %p3577_p3, %p3576_p2 }
  0x63   :  { %p3579_p5 = pnand %p3578_p4, %p3572_p1 }
  0x65   :  { %3582 = shalt.err (!%p3579_p5)
}
  0x66   :  { %87 = dma.hbm_to_vmem [thread:$0]  %s4787_s7, 4096, %s3823_s27, [#allocation9], %s3681_s1, %s3681_s1, %s3682_s22  }
  0x67   :  { %s3689_s14 = smov [#allocation13]   ;;  %s3583_s19 = scalar_lea.hbm %s4790_s10, 4096 }
  0x68   :  { %s107_s5 = sshll.u32 %s3689_s14, 4  ;;  %p3584_p6 = scmp.ne.s32.totalorder %s4790_s10, %s3583_s19  ;;  %s108_s5 = int_to_ptr.vmem [resolvable:$true] %s107_s5 }
  0x69   :  { %p3587_p7 = scmp.lt.u32.totalorder %s3583_s19, %s4790_s10 }
  0x6b   :  { %p3589_p8 = pnand %p3587_p7, %p3584_p6 }
  0x6d   :  { %3592 = shalt.err (!%p3589_p8)
}
  0x6e   :  { %s3593_s23 = scalar_lea.vmem %s108_s5, 4096  ;;  %p3598_p10 = scmp.lt.s32.totalorder %s108_s5, %s108_s5 }
  0x6f   :  { %p3594_p9 = scmp.ne.s32.totalorder %s108_s5, %s3593_s23  ;;  %p3599_p11 = scmp.lt.s32.totalorder %s3593_s23, %s3593_s23 }
  0x71   :  { %p3600_p12 = por %p3599_p11, %p3598_p10 }
  0x73   :  { %p3601_p13 = pnand %p3600_p12, %p3594_p9 }
  0x75   :  { %3604 = shalt.err (!%p3601_p13)
}
  0x76   :  { %113 = dma.hbm_to_vmem [thread:$0]  %s4790_s10, 4096, %s108_s5, [#allocation12], %s3681_s1, %s3681_s1, %s3682_s22  }
  0x77   :  { %3647 = dma.done.wait [#allocation3], 128  }
  0x78   :  { %3648 = vsyncadd [#allocation3], 4294967168 }
  0x79   :  { %3649 = dma.done.wait [#allocation6], 8704  }
  0x7a   :  { %3650 = vsyncadd [#allocation6], 4294958592 }
  0x7b   :  { %3651 = dma.done.wait [#allocation9], 8192  }
  0x7c   :  { %3652 = vsyncadd [#allocation9], 4294959104 }
  0x7d   :  { %3653 = dma.done.wait [#allocation12], 8192  }
  0x7e   :  { %3654 = vsyncadd [#allocation12], 4294959104  ;;  %v3875_v0 = vld [vmem:[#allocation5] sm:$0xff]   ;;  %v3877_v1 = vld [vmem:[#allocation5 + $0x8] sm:$0xff]   ;;  %s3895_s10 = smov 0  }
  0x7f   :  { %4910 = vst [vmem:[#allocation20_spill] sm:$0xff] %v3875_v0  ;;  %4911 = vst [vmem:[#allocation21_spill] sm:$0xff] %v3877_v1  ;;  %v3879_v2 = vld [vmem:[#allocation5 + $0x10] sm:$0xff]   ;;  %v3881_v3 = vld [vmem:[#allocation5 + $0x18] sm:$0xff]   ;;  %v4916_v6 = vmov %v3877_v1  ;;  %v4917_v7 = vmov %v3875_v0 }
  0x80   :  { %4912 = vst [vmem:[#allocation22_spill] sm:$0xff] %v3879_v2  ;;  %4913 = vst [vmem:[#allocation23_spill] sm:$0xff] %v3881_v3  ;;  %v4914_v4 = vmov %v3881_v3  ;;  %v4915_v5 = vmov %v3879_v2 }
  0x81 LB: > { %v3904_v8 = vld [vmem:[#allocation7 + $0x4] ss:$16 sps:$4 sm:$0xff]   ;;  %v155_v9 = vpack.c.bf16 %v3659_v4, %v3667_v6  ;;  %v154_v10 = vpack.c.bf16 %v3663_v5, %v3671_v7  ;;  %v3906_v11 = vld [vmem:[#allocation7 + $0xc] ss:$16 sps:$4 sm:$0xff]   ;;  %v4793_v12 = vmov 0   ;;  %vm161_vm0 = vcmask 130048   ;;  %s3675_s10 = sphi %s3895_s10, %s147_s10   ;;  %v3671_v7 = vphi %v4917_v7, %v5085_v7   ;;  %v3667_v6 = vphi %v4916_v6, %v5084_v6   ;;  %v3663_v5 = vphi %v4915_v5, %v5083_v5   ;;  %v3659_v4 = vphi %v4914_v4, %v5082_v4  }
  0x82   : > { %197 = vmatprep.mubr.bf16.mxu1 %v4793_v12  ;;  %v3909_v13 = vld [vmem:[#allocation2] sm:$0xff]   ;;  %659 = vmatprep.subr.bf16.mxu0 %v3906_v11  ;;  %v3914_v15 = vld [vmem:[#allocation7] ss:$16 sps:$4 sm:$0xff]   ;;  %v3917_v16 = vld [vmem:[#allocation7 + $0x24] ss:$16 sps:$4 sm:$0xff]   ;;  %s147_s10 = sadd.s32 1, %s3675_s10  }
  0x83   : > { %v3911_v14 = vld [vmem:[#allocation7 + $0x8] ss:$16 sps:$4 sm:$0xff]   ;;  %165 = vmatprep.subr.bf16.mxu1 %v155_v9  ;;  %v3919_v17 = vld [vmem:[#allocation7 + $0x2c] ss:$16 sps:$4 sm:$0xff]   ;;  %v3927_v19 = vld [vmem:[#allocation7 + $0x20] ss:$16 sps:$4 sm:$0xff]  }
  0x84   : > { %166 = vmatpush1.bf16.msra.mxu1 %v154_v10  ;;  %660 = vmatpush1.bf16.msra.mxu0 %v3911_v14  ;;  %v3922_v18 = vld [vmem:[#allocation7 + $0x28] ss:$16 sps:$4 sm:$0xff]   ;;  %4918 = vst [vmem:[#allocation24_spill] sm:$0xff] %v3927_v19  ;;  %v3929_v20 = vld [vmem:[#allocation7 + $0x44] ss:$16 sps:$4 sm:$0xff]   ;;  %p144_p0 = scmp.ge.s32.totalorder %s147_s10, 6  }
  0x85   : > { %616 = vmatprep.subr.bf16.mxu1 %v3904_v8  ;;  %661 = vmatprep.subr.bf16.mxu0 %v3919_v17  ;;  %4919 = vst [vmem:[#allocation25_spill] sm:$0xff] %v3929_v20  ;;  %v3931_v21 = vld [vmem:[#allocation7 + $0x4c] ss:$16 sps:$4 sm:$0xff]   ;;  %v3935_v22 = vld [vmem:[#allocation7 + $0x48] ss:$16 sps:$4 sm:$0xff]   ;;  %vm2561_vm1 = vcmask (%p144_p0), 1041409  }
  0x86   : > { %v3939_v23 = vld [vmem:[#allocation7 + $0x6c] ss:$16 sps:$4 sm:$0xff]   ;;  %v3941_v24 = vld [vmem:[#allocation7 + $0x40] ss:$16 sps:$4 sm:$0xff]   ;;  %v3945_v25 = vld [vmem:[#allocation7 + $0x64] ss:$16 sps:$4 sm:$0xff]  }
  0x87   : > { %2607 = vmatmul.mubr.msk.bf16.vlgmr.msra.gmra.mrb[0].mxu1 %vm161_vm0, %v3909_v13  ;;  %4920 = vst [vmem:[#allocation26_spill] sm:$0xff] %v3941_v24  ;;  %4921 = vst [vmem:[#allocation27_spill] sm:$0xff] %v3945_v25  ;;  %v3947_v26 = vld [vmem:[#allocation7 + $0x68] ss:$16 sps:$4 sm:$0xff]   ;;  %v3951_v27 = vld [vmem:[#allocation7 + $0x8c] ss:$16 sps:$4 sm:$0xff]  }
  0x88   : > { %617 = vmatpush1.bf16.msra.mxu1 %v3914_v15  ;;  %662 = vmatpush1.bf16.msra.mxu0 %v3922_v18  ;;  %v3953_v28 = vld [vmem:[#allocation7 + $0x60] ss:$16 sps:$4 sm:$0xff]   ;;  %v3955_v29 = vld [vmem:[#allocation7 + $0x84] ss:$16 sps:$4 sm:$0xff]   ;;  %v3959_v30 = vld [vmem:[#allocation7 + $0x88] ss:$16 sps:$4 sm:$0xff]  }
  0x89   : > { %618 = vmatprep.subr.bf16.mxu1 %v3917_v16  ;;  %663 = vmatprep.subr.bf16.mxu0 %v3931_v21  ;;  %4922 = vst [vmem:[#allocation28_spill] sm:$0xff] %v3953_v28  ;;  %4923 = vst [vmem:[#allocation29_spill] sm:$0xff] %v3955_v29  ;;  %v3963_v31 = vld [vmem:[#allocation7 + $0xac] ss:$16 sps:$4 sm:$0xff]   ;;  %v3965_v32 = vld [vmem:[#allocation7 + $0x80] ss:$16 sps:$4 sm:$0xff]  }
  0x8a   : > { %4924 = vst [vmem:[#allocation30_spill] sm:$0xff] %v3965_v32  ;;  %v3969_v33 = vld [vmem:[#allocation7 + $0xa4] ss:$16 sps:$4 sm:$0xff]   ;;  %v3971_v34 = vld [vmem:[#allocation7 + $0xa8] ss:$16 sps:$4 sm:$0xff]   ;;  %vm2563_vm2 = vcmask (%p144_p0), 1043459  }
  0x8b   : > { %4925 = vst [vmem:[#allocation31_spill] sm:$0xff] %v3969_v33  ;;  %v3975_v35 = vld [vmem:[#allocation7 + $0xcc] ss:$16 sps:$4 sm:$0xff]   ;;  %v3977_v36 = vld [vmem:[#allocation7 + $0xa0] ss:$16 sps:$4 sm:$0xff]   ;;  %vm2565_vm3 = vcmask (%p144_p0), 1045509  }
  0x8c   : > { %619 = vmatpush1.bf16.msra.mxu1 %v3927_v19  ;;  %664 = vmatpush1.bf16.msra.mxu0 %v3935_v22  ;;  %4926 = vst [vmem:[#allocation32_spill] sm:$0xff] %v3977_v36  ;;  %v3979_v37 = vld [vmem:[#allocation7 + $0xc4] ss:$16 sps:$4 sm:$0xff]   ;;  %v3983_v38 = vld [vmem:[#allocation7 + $0xc8] ss:$16 sps:$4 sm:$0xff]   ;;  %vm2567_vm4 = vcmask (%p144_p0), 1047559  }
  0x8d   : > { %620 = vmatprep.subr.bf16.mxu1 %v3929_v20  ;;  %665 = vmatprep.subr.bf16.mxu0 %v3939_v23  ;;  %4927 = vst [vmem:[#allocation33_spill] sm:$0xff] %v3979_v37  ;;  %v3987_v39 = vld [vmem:[#allocation7 + $0xec] ss:$16 sps:$4 sm:$0xff]   ;;  %v3989_v40 = vld [vmem:[#allocation7 + $0xc0] ss:$16 sps:$4 sm:$0xff]  }
  0x8e   : > { %4928 = vst [vmem:[#allocation34_spill] sm:$0xff] %v3989_v40  ;;  %v3993_v41 = vld [vmem:[#allocation7 + $0xe4] ss:$16 sps:$4 sm:$0xff]   ;;  %v3995_v42 = vld [vmem:[#allocation7 + $0xe8] ss:$16 sps:$4 sm:$0xff]  }
  0x8f   : > { %4929 = vst [vmem:[#allocation35_spill] sm:$0xff] %v3993_v41  ;;  %v3999_v43 = vld [vmem:[#allocation7 + $0x10c] ss:$16 sps:$4 sm:$0xff]   ;;  %v4001_v44 = vld [vmem:[#allocation7 + $0xe0] ss:$16 sps:$4 sm:$0xff]  }
  0x90   : > { %621 = vmatpush1.bf16.msra.mxu1 %v3941_v24  ;;  %666 = vmatpush1.bf16.msra.mxu0 %v3947_v26  ;;  %4930 = vst [vmem:[#allocation36_spill] sm:$0xff] %v4001_v44  ;;  %v4003_v45 = vld [vmem:[#allocation7 + $0x104] ss:$16 sps:$4 sm:$0xff]   ;;  %v4007_v46 = vld [vmem:[#allocation7 + $0x108] ss:$16 sps:$4 sm:$0xff]  }
  0x91   : > { %622 = vmatprep.subr.bf16.mxu1 %v3945_v25  ;;  %667 = vmatprep.subr.bf16.mxu0 %v3951_v27  ;;  %4931 = vst [vmem:[#allocation37_spill] sm:$0xff] %v4003_v45  ;;  %v4011_v47 = vld [vmem:[#allocation7 + $0x12c] ss:$16 sps:$4 sm:$0xff]   ;;  %v4013_v48 = vld [vmem:[#allocation7 + $0x100] ss:$16 sps:$4 sm:$0xff]  }
  0x92   : > { %4932 = vst [vmem:[#allocation38_spill] sm:$0xff] %v4013_v48  ;;  %v4017_v49 = vld [vmem:[#allocation7 + $0x124] ss:$16 sps:$4 sm:$0xff]   ;;  %v4019_v50 = vld [vmem:[#allocation7 + $0x128] ss:$16 sps:$4 sm:$0xff]  }
  0x93   : > { %4933 = vst [vmem:[#allocation39_spill] sm:$0xff] %v4017_v49  ;;  %v4023_v51 = vld [vmem:[#allocation7 + $0x14c] ss:$16 sps:$4 sm:$0xff]   ;;  %v4025_v52 = vld [vmem:[#allocation7 + $0x120] ss:$16 sps:$4 sm:$0xff]  }
  0x94   : > { %623 = vmatpush1.bf16.msra.mxu1 %v3953_v28  ;;  %668 = vmatpush1.bf16.msra.mxu0 %v3959_v30  ;;  %4934 = vst [vmem:[#allocation40_spill] sm:$0xff] %v4025_v52  ;;  %v4027_v53 = vld [vmem:[#allocation7 + $0x148] ss:$16 sps:$4 sm:$0xff]   ;;  %v4029_v54 = vld [vmem:[#allocation7 + $0x144] ss:$16 sps:$4 sm:$0xff]  }
  0x95   : > { %624 = vmatprep.subr.bf16.mxu1 %v3955_v29  ;;  %669 = vmatprep.subr.bf16.mxu0 %v3963_v31  ;;  %4935 = vst [vmem:[#allocation41_spill] sm:$0xff] %v4029_v54  ;;  %v4031_v55 = vld [vmem:[#allocation7 + $0x16c] ss:$16 sps:$4 sm:$0xff]   ;;  %v4037_v56 = vld [vmem:[#allocation7 + $0x140] ss:$16 sps:$4 sm:$0xff]  }
  0x96   : > { %4936 = vst [vmem:[#allocation42_spill] sm:$0xff] %v4037_v56  ;;  %v4039_v57 = vld [vmem:[#allocation7 + $0x168] ss:$16 sps:$4 sm:$0xff]   ;;  %v4041_v58 = vld [vmem:[#allocation7 + $0x164] ss:$16 sps:$4 sm:$0xff]  }
  0x97   : > { %4937 = vst [vmem:[#allocation43_spill] sm:$0xff] %v4041_v58  ;;  %v4043_v59 = vld [vmem:[#allocation7 + $0x18c] ss:$16 sps:$4 sm:$0xff]   ;;  %v4049_v60 = vld [vmem:[#allocation7 + $0x160] ss:$16 sps:$4 sm:$0xff]  }
  0x98   : > { %625 = vmatpush1.bf16.msra.mxu1 %v3965_v32  ;;  %670 = vmatpush1.bf16.msra.mxu0 %v3971_v34  ;;  %4938 = vst [vmem:[#allocation44_spill] sm:$0xff] %v4049_v60  ;;  %v4051_v61 = vld [vmem:[#allocation7 + $0x188] ss:$16 sps:$4 sm:$0xff]   ;;  %v4053_v62 = vld [vmem:[#allocation7 + $0x184] ss:$16 sps:$4 sm:$0xff]  }
  0x99   : > { %626 = vmatprep.subr.bf16.mxu1 %v3969_v33  ;;  %671 = vmatprep.subr.bf16.mxu0 %v3975_v35  ;;  %4939 = vst [vmem:[#allocation45_spill] sm:$0xff] %v4053_v62  ;;  %v4055_v63 = vld [vmem:[#allocation7 + $0x1ac] ss:$16 sps:$4 sm:$0xff]   ;;  %v4062_v4 = vld [vmem:[#allocation7 + $0x180] ss:$16 sps:$4 sm:$0xff]  }
  0x9a   : > { %4940 = vst [vmem:[#allocation46_spill] sm:$0xff] %v4062_v4  ;;  %v4065_v5 = vld [vmem:[#allocation7 + $0x1a8] ss:$16 sps:$4 sm:$0xff]   ;;  %v4068_v6 = vld [vmem:[#allocation7 + $0x1a4] ss:$16 sps:$4 sm:$0xff]  }
  0x9b   : > { %4941 = vst [vmem:[#allocation47_spill] sm:$0xff] %v4068_v6  ;;  %v4071_v7 = vld [vmem:[#allocation7 + $0x1cc] ss:$16 sps:$4 sm:$0xff]   ;;  %v4074_v9 = vld [vmem:[#allocation7 + $0x1a0] ss:$16 sps:$4 sm:$0xff]  }
  0x9c   : > { %627 = vmatpush1.bf16.msra.mxu1 %v3977_v36  ;;  %672 = vmatpush1.bf16.msra.mxu0 %v3983_v38  ;;  %4942 = vst [vmem:[#allocation48_spill] sm:$0xff] %v4074_v9  ;;  %v4078_v10 = vld [vmem:[#allocation7 + $0x1c4] ss:$16 sps:$4 sm:$0xff]   ;;  %v4083_v12 = vld [vmem:[#allocation7 + $0x1c0] ss:$16 sps:$4 sm:$0xff]  }
  0x9d   : > { %628 = vmatprep.subr.bf16.mxu1 %v3979_v37  ;;  %673 = vmatprep.subr.bf16.mxu0 %v3987_v39  ;;  %4943 = vst [vmem:[#allocation49_spill] sm:$0xff] %v4078_v10  ;;  %4944 = vst [vmem:[#allocation50_spill] sm:$0xff] %v4083_v12  ;;  %v4085_v2 = vld [vmem:[#allocation7 + $0x1c8] ss:$16 sps:$4 sm:$0xff]   ;;  %v4089_v0 = vld [vmem:[#allocation7 + $0x1e4] ss:$16 sps:$4 sm:$0xff]  }
  0x9e   : > { %4945 = vst [vmem:[#allocation51_spill] sm:$0xff] %v4089_v0  ;;  %v4091_v3 = vld [vmem:[#allocation7 + $0x1ec] ss:$16 sps:$4 sm:$0xff]   ;;  %v4093_v1 = vld [vmem:[#allocation7 + $0x1e0] ss:$16 sps:$4 sm:$0xff]  }
  0x9f   : > { %4946 = vst [vmem:[#allocation52_spill] sm:$0xff] %v4093_v1 }
  0xa0   : > { %629 = vmatpush1.bf16.msra.mxu1 %v3989_v40  ;;  %674 = vmatpush1.bf16.msra.mxu0 %v3995_v42 }
  0xa1   : > { %630 = vmatprep.subr.bf16.mxu1 %v3993_v41  ;;  %675 = vmatprep.subr.bf16.mxu0 %v3999_v43 }
  0xa4   : > { %631 = vmatpush1.bf16.msra.mxu1 %v4001_v44  ;;  %676 = vmatpush1.bf16.msra.mxu0 %v4007_v46 }
  0xa5   : > { %632 = vmatprep.subr.bf16.mxu1 %v4003_v45  ;;  %677 = vmatprep.subr.bf16.mxu0 %v4011_v47 }
  0xa8   : > { %633 = vmatpush1.bf16.msra.mxu1 %v4013_v48  ;;  %678 = vmatpush1.bf16.msra.mxu0 %v4019_v50 }
  0xa9   : > { %634 = vmatprep.subr.bf16.mxu1 %v4017_v49  ;;  %679 = vmatprep.subr.bf16.mxu0 %v4023_v51  ;;  %v4131_v49 = vld [vmem:[#allocation8 + $0x34] ss:$8 sps:$4 sm:$0xff]  }
  0xaa   : > { %4954 = vst [vmem:[#allocation59_spill] sm:$0xff] %v4131_v49 }
  0xac   : > { %635 = vmatpush1.bf16.msra.mxu1 %v4025_v52  ;;  %680 = vmatpush1.bf16.msra.mxu0 %v4027_v53  ;;  %v4128_v52 = vld [vmem:[#allocation8 + $0x20] ss:$8 sps:$4 sm:$0xff]  }
  0xad   : > { %636 = vmatprep.subr.bf16.mxu1 %v4029_v54  ;;  %681 = vmatprep.subr.bf16.mxu0 %v4031_v55  ;;  %v4125_v54 = vld [vmem:[#allocation8 + $0x24] ss:$8 sps:$4 sm:$0xff]   ;;  %4953 = vst [vmem:[#allocation58_spill] sm:$0xff] %v4128_v52 }
  0xae   : > { %4952 = vst [vmem:[#allocation57_spill] sm:$0xff] %v4125_v54 }
  0xb0   : > { %637 = vmatpush1.bf16.msra.mxu1 %v4037_v56  ;;  %682 = vmatpush1.bf16.msra.mxu0 %v4039_v57  ;;  %v4951_v56 = vmov 0  }
  0xb1   : > { %638 = vmatprep.subr.bf16.mxu1 %v4041_v58  ;;  %683 = vmatprep.subr.bf16.mxu0 %v4043_v59  ;;  %v4118_v58 = vld [vmem:[#allocation8 + $0x14] ss:$8 sps:$4 sm:$0xff]  }
  0xb2   : > { %4949 = vst [vmem:[#allocation55_spill] sm:$0xff] %v4118_v58 }
  0xb4   : > { %639 = vmatpush1.bf16.msra.mxu1 %v4049_v60  ;;  %684 = vmatpush1.bf16.msra.mxu0 %v4051_v61  ;;  %v4116_v60 = vld [vmem:[#allocation8] ss:$8 sps:$4 sm:$0xff]  }
  0xb5   : > { %640 = vmatprep.subr.bf16.mxu1 %v4053_v62  ;;  %685 = vmatprep.subr.bf16.mxu0 %v4055_v63  ;;  %4948 = vst [vmem:[#allocation54_spill] sm:$0xff] %v4116_v60 }
  0xb8   : > { %641 = vmatpush1.bf16.msra.mxu1 %v4062_v4  ;;  %686 = vmatpush1.bf16.msra.mxu0 %v4065_v5 }
  0xb9   : > { %642 = vmatprep.subr.bf16.mxu1 %v4068_v6  ;;  %687 = vmatprep.subr.bf16.mxu0 %v4071_v7  ;;  %v4095_v6 = vld [vmem:[#allocation7 + $0x1e8] ss:$16 sps:$4 sm:$0xff]  }
  0xbc   : > { %643 = vmatpush1.bf16.msra.mxu1 %v4074_v9  ;;  %688 = vmatpush1.bf16.msra.mxu0 %v4085_v2 }
  0xbd   : > { %644 = vmatprep.subr.bf16.mxu1 %v4078_v10  ;;  %689 = vmatprep.subr.bf16.mxu0 %v4091_v3  ;;  %v4101_v10 = vld [vmem:[#allocation8 + $0x4] ss:$8 sps:$4 sm:$0xff]  }
  0xbe   : > { %4947 = vst [vmem:[#allocation53_spill] sm:$0xff] %v4101_v10 }
  0xc0   : > { %645 = vmatpush1.bf16.msra.mxu1 %v4083_v12  ;;  %690 = vmatpush1.bf16.msra.mxu0 %v4095_v6 }
  0xc1   : > { %646 = vmatprep.subr.bf16.mxu1 %v4089_v0 }
  0xc4   : > { %647 = vmatpush1.bf16.msra.mxu1 %v4093_v1 }
  0xc5   : > { %960 = vmatprep.subr.bf16.mxu1 %v4101_v10  ;;  %v4121_v10 = vld [vmem:[#allocation8 + $0x10] ss:$8 sps:$4 sm:$0xff]  }
  0xc6   : > { %4950 = vst [vmem:[#allocation56_spill] sm:$0xff] %v4121_v10 }
 0x15a   : > { %v4104_v12 = vpop.f32.mrb[0].mxu1 }
 0x15b   : > { %v4106_v9 = vpop.f32.mrb[1].mxu1 }
 0x15c   : > { %v4108_v4 = vpop.f32.mrb[2].mxu1 }
 0x15d   : > { %v208_v62 = vpack.c.bf16 %v4108_v4, %v4104_v12  ;;  %v4112_v0 = vpop.f32.mrb[3].mxu1 }
 0x15e   : > { %v209_v1 = vpack.c.bf16 %v4112_v0, %v4106_v9 }
 0x160   : > { %648 = vmatprep.mubr.bf16.mxu1 %v209_v1  ;;  %691 = vmatprep.mubr.bf16.mxu0 %v209_v1  ;;  %v4134_v1 = vld [vmem:[#allocation8 + $0x30] ss:$8 sps:$4 sm:$0xff]  }
 0x161   : > { %649 = vmatmul.mubr.bf16.vlgmr.msra.gmra.mrb[4].mxu1 %v208_v62  ;;  %692 = vmatmul.mubr.bf16.vlgmr.msra.gmra.mrb[0].mxu0 %v208_v62  ;;  %4955 = vst [vmem:[#allocation60_spill] sm:$0xff] %v4134_v1  ;;  %v4137_v62 = vld [vmem:[#allocation8 + $0x44] ss:$8 sps:$4 sm:$0xff]  }
 0x162   : > { %961 = vmatpush1.bf16.msra.mxu1 %v4116_v60  ;;  %1053 = vmatprep.mubr.bf16.mxu0 %v4951_v56  ;;  %4956 = vst [vmem:[#allocation61_spill] sm:$0xff] %v4137_v62 }
 0x163   : > { %962 = vmatprep.subr.bf16.mxu1 %v4118_v58  ;;  %v4140_v58 = vld [vmem:[#allocation8 + $0x40] ss:$8 sps:$4 sm:$0xff]  }
 0x164   : > { %4957 = vst [vmem:[#allocation62_spill] sm:$0xff] %v4140_v58 }
 0x166   : > { %963 = vmatpush1.bf16.msra.mxu1 %v4121_v10  ;;  %v4143_v10 = vld [vmem:[#allocation8 + $0x54] ss:$8 sps:$4 sm:$0xff]  }
 0x167   : > { %964 = vmatprep.subr.bf16.mxu1 %v4125_v54  ;;  %4958 = vst [vmem:[#allocation63_spill] sm:$0xff] %v4143_v10  ;;  %v4146_v54 = vld [vmem:[#allocation8 + $0x50] ss:$8 sps:$4 sm:$0xff]  }
 0x168   : > { %4959 = vst [vmem:[#allocation64_spill] sm:$0xff] %v4146_v54 }
 0x16a   : > { %965 = vmatpush1.bf16.msra.mxu1 %v4128_v52  ;;  %v4149_v52 = vld [vmem:[#allocation8 + $0x64] ss:$8 sps:$4 sm:$0xff]  }
 0x16b   : > { %966 = vmatprep.subr.bf16.mxu1 %v4131_v49  ;;  %4960 = vst [vmem:[#allocation65_spill] sm:$0xff] %v4149_v52  ;;  %v4152_v49 = vld [vmem:[#allocation8 + $0x60] ss:$8 sps:$4 sm:$0xff]  }
 0x16c   : > { %4961 = vst [vmem:[#allocation66_spill] sm:$0xff] %v4152_v49 }
 0x16e   : > { %967 = vmatpush1.bf16.msra.mxu1 %v4134_v1  ;;  %v4156_v1 = vld [vmem:[#allocation8 + $0x74] ss:$8 sps:$4 sm:$0xff]  }
 0x16f   : > { %968 = vmatprep.subr.bf16.mxu1 %v4137_v62  ;;  %4962 = vst [vmem:[#allocation67_spill] sm:$0xff] %v4156_v1  ;;  %v4159_v62 = vld [vmem:[#allocation8 + $0x70] ss:$8 sps:$4 sm:$0xff]  }
 0x170   : > { %4963 = vst [vmem:[#allocation68_spill] sm:$0xff] %v4159_v62 }
 0x172   : > { %969 = vmatpush1.bf16.msra.mxu1 %v4140_v58  ;;  %v4162_v58 = vld [vmem:[#allocation8 + $0x84] ss:$8 sps:$4 sm:$0xff]  }
 0x173   : > { %970 = vmatprep.subr.bf16.mxu1 %v4143_v10  ;;  %4964 = vst [vmem:[#allocation69_spill] sm:$0xff] %v4162_v58  ;;  %v4164_v10 = vld [vmem:[#allocation8 + $0x80] ss:$8 sps:$4 sm:$0xff]  }
 0x174   : > { %4965 = vst [vmem:[#allocation70_spill] sm:$0xff] %v4164_v10 }
 0x176   : > { %971 = vmatpush1.bf16.msra.mxu1 %v4146_v54  ;;  %v4168_v54 = vld [vmem:[#allocation8 + $0x94] ss:$8 sps:$4 sm:$0xff]  }
 0x177   : > { %972 = vmatprep.subr.bf16.mxu1 %v4149_v52  ;;  %4966 = vst [vmem:[#allocation71_spill] sm:$0xff] %v4168_v54  ;;  %v4170_v52 = vld [vmem:[#allocation8 + $0x90] ss:$8 sps:$4 sm:$0xff]  }
 0x178   : > { %4967 = vst [vmem:[#allocation72_spill] sm:$0xff] %v4170_v52 }
 0x17a   : > { %973 = vmatpush1.bf16.msra.mxu1 %v4152_v49  ;;  %v4176_v49 = vld [vmem:[#allocation8 + $0xa0] ss:$8 sps:$4 sm:$0xff]  }
 0x17b   : > { %974 = vmatprep.subr.bf16.mxu1 %v4156_v1  ;;  %v4174_v1 = vld [vmem:[#allocation8 + $0xa4] ss:$8 sps:$4 sm:$0xff]   ;;  %4969 = vst [vmem:[#allocation74_spill] sm:$0xff] %v4176_v49 }
 0x17c   : > { %4968 = vst [vmem:[#allocation73_spill] sm:$0xff] %v4174_v1 }
 0x17e   : > { %975 = vmatpush1.bf16.msra.mxu1 %v4159_v62  ;;  %v4180_v62 = vld [vmem:[#allocation8 + $0xb4] ss:$8 sps:$4 sm:$0xff]  }
 0x17f   : > { %976 = vmatprep.subr.bf16.mxu1 %v4162_v58  ;;  %4970 = vst [vmem:[#allocation75_spill] sm:$0xff] %v4180_v62  ;;  %v4182_v58 = vld [vmem:[#allocation8 + $0xb0] ss:$8 sps:$4 sm:$0xff]  }
 0x180   : > { %4971 = vst [vmem:[#allocation76_spill] sm:$0xff] %v4182_v58 }
 0x182   : > { %977 = vmatpush1.bf16.msra.mxu1 %v4164_v10  ;;  %v4186_v10 = vld [vmem:[#allocation8 + $0xc4] ss:$8 sps:$4 sm:$0xff]  }
 0x183   : > { %978 = vmatprep.subr.bf16.mxu1 %v4168_v54  ;;  %4972 = vst [vmem:[#allocation77_spill] sm:$0xff] %v4186_v10  ;;  %v4188_v54 = vld [vmem:[#allocation8 + $0xc0] ss:$8 sps:$4 sm:$0xff]  }
 0x184   : > { %4973 = vst [vmem:[#allocation78_spill] sm:$0xff] %v4188_v54 }
 0x186   : > { %979 = vmatpush1.bf16.msra.mxu1 %v4170_v52  ;;  %v4191_v52 = vld [vmem:[#allocation8 + $0xd4] ss:$8 sps:$4 sm:$0xff]  }
 0x187   : > { %980 = vmatprep.subr.bf16.mxu1 %v4174_v1  ;;  %4974 = vst [vmem:[#allocation79_spill] sm:$0xff] %v4191_v52  ;;  %v4194_v1 = vld [vmem:[#allocation8 + $0xd0] ss:$8 sps:$4 sm:$0xff]  }
 0x188   : > { %4975 = vst [vmem:[#allocation80_spill] sm:$0xff] %v4194_v1 }
 0x18a   : > { %981 = vmatpush1.bf16.msra.mxu1 %v4176_v49  ;;  %v4197_v49 = vld [vmem:[#allocation8 + $0xe4] ss:$8 sps:$4 sm:$0xff]  }
 0x18b   : > { %982 = vmatprep.subr.bf16.mxu1 %v4180_v62  ;;  %4976 = vst [vmem:[#allocation81_spill] sm:$0xff] %v4197_v49  ;;  %v4200_v62 = vld [vmem:[#allocation8 + $0xe0] ss:$8 sps:$4 sm:$0xff]  }
 0x18c   : > { %4977 = vst [vmem:[#allocation82_spill] sm:$0xff] %v4200_v62 }
 0x18e   : > { %983 = vmatpush1.bf16.msra.mxu1 %v4182_v58  ;;  %v4203_v58 = vld [vmem:[#allocation8 + $0xf4] ss:$8 sps:$4 sm:$0xff]  }
 0x18f   : > { %984 = vmatprep.subr.bf16.mxu1 %v4186_v10  ;;  %4978 = vst [vmem:[#allocation83_spill] sm:$0xff] %v4203_v58  ;;  %v4206_v10 = vld [vmem:[#allocation8 + $0xf0] ss:$8 sps:$4 sm:$0xff]  }
 0x190   : > { %4979 = vst [vmem:[#allocation84_spill] sm:$0xff] %v4206_v10 }
 0x192   : > { %985 = vmatpush1.bf16.msra.mxu1 %v4188_v54 }
 0x193   : > { %986 = vmatprep.subr.bf16.mxu1 %v4191_v52  ;;  %v276_v52 = vlaneseq }
 0x195   : > { %v4211_v54 = vshrl.u32 %v276_v52, 7 }
 0x196   : > { %987 = vmatpush1.bf16.msra.mxu1 %v4194_v1 }
 0x197   : > { %988 = vmatprep.subr.bf16.mxu1 %v4197_v49  ;;  %4980 = vst [vmem:[#allocation85_spill] sm:$0xff] %v4211_v54  ;;  %v4214_v1 = vsub.s32 0, %v4211_v54  ;;  %v4219_v49 = vld [vmem:[%s4784_s4] sm:$0xf] }
 0x199   : > { %4981 = vst [vmem:[#allocation86_spill] sm:$0xff] %v4214_v1 }
 0x19a   : > { %989 = vmatpush1.bf16.msra.mxu1 %v4200_v62  ;;  %v4222_v62 = vsub.s32 1, %v4211_v54 }
 0x19b   : > { %990 = vmatprep.subr.bf16.mxu1 %v4203_v58  ;;  %v4226_v58 = vrot.slane %v4219_v49, %v4214_v1 }
 0x19c   : > { %4982 = vst [vmem:[#allocation87_spill] sm:$0xff] %v4222_v62 }
 0x19d   : > { %4983 = vst [vmem:[#allocation88_spill] sm:$0xff] %v4226_v58 }
 0x19e   : > { %991 = vmatpush1.bf16.msra.mxu1 %v4206_v10 }
 0x19f   : > { %1109 = vmatprep.subr.bf16.mxu1 %v3906_v11  ;;  %v4230_v11 = vrot.slane %v4219_v49, %v4222_v62 }
 0x234   : > { %v650_v52 = vpop.f32.mrb[4].mxu1  ;;  %v4232_v10 = vpop.f32.mrb[0].mxu0 }
 0x235   : > { %v651_v56 = vadd.f32 %v650_v52, %v4226_v58  ;;  %v652_v60 = vpop.f32.mrb[5].mxu1  ;;  %v4235_v48 = vpop.f32.mrb[1].mxu0 }
 0x236   : > { %v653_v45 = vadd.f32 %v652_v60, %v4230_v11  ;;  %v654_v44 = vpop.f32.mrb[6].mxu1  ;;  %v4238_v41 = vpop.f32.mrb[2].mxu0 }
 0x237   : > { %v2672_v40 = vmul.f32 -1.442695, %v651_v56  ;;  %v655_v37 = vadd.f32 %v654_v44, %v4226_v58  ;;  %v656_v36 = vpop.f32.mrb[7].mxu1  ;;  %v4241_v33 = vpop.f32.mrb[3].mxu0 }
 0x238   : > { %v2673_v32 = vmul.f32 -1.442695, %v653_v45  ;;  %v657_v29 = vadd.f32 %v656_v36, %v4230_v11 }
 0x239   : > { %3041 = vpow2.f32 %v2672_v40  ;;  %v2676_v28 = vmul.f32 -1.442695, %v655_v37 }
 0x23a   : > { %3043 = vpow2.f32 %v2673_v32  ;;  %v2677_v52 = vmul.f32 -1.442695, %v657_v29 }
 0x23b   : > { %3045 = vpow2.f32 %v2676_v28 }
 0x23c   : > { %3047 = vpow2.f32 %v2677_v52 }
 0x243   : > { %v3042_v25 = vpop.eup %3041 }
 0x244   : > { %v726_v60 = vadd.f32 1.0, %v3042_v25  ;;  %v3044_v24 = vpop.eup %3043 }
 0x245   : > { %v727_v20 = vadd.f32 1.0, %v3044_v24  ;;  %v3046_v56 = vpop.eup %3045 }
 0x246   : > { %3049 = vrcp.f32 %v726_v60  ;;  %v730_v44 = vadd.f32 1.0, %v3046_v56  ;;  %v3048_v58 = vpop.eup %3047 }
 0x247   : > { %3051 = vrcp.f32 %v727_v20  ;;  %v731_v19 = vadd.f32 1.0, %v3048_v58  ;;  %v788_v58 = vld [vmem:[%s4786_s6] sm:$0x3] }
 0x248   : > { %3053 = vrcp.f32 %v730_v44  ;;  %v4299_v60 = vrot.slane %v788_v58, %v4214_v1  ;;  %v4302_v56 = vrot.slane %v788_v58, %v4222_v62  ;;  %v5037_v62 = vld [vmem:[#allocation76_spill] sm:$0xff]  ;;  %v5038_v1 = vld [vmem:[#allocation77_spill] sm:$0xff] }
 0x249   : > { %3055 = vrcp.f32 %v731_v19 }
 0x250   : > { %v3050_v45 = vpop.eup %3049 }
 0x251   : > { %v750_v36 = vmul.f32 %v3050_v45, %v4104_v12  ;;  %v3052_v37 = vpop.eup %3051 }
 0x252   : > { %v751_v29 = vmul.f32 %v3052_v37, %v4106_v9  ;;  %v3054_v28 = vpop.eup %3053 }
 0x253   : > { %v752_v32 = vmul.f32 %v3054_v28, %v4108_v4  ;;  %v3056_v25 = vpop.eup %3055 }
 0x254   : > { %v753_v40 = vmul.f32 %v3056_v25, %v4112_v0 }
 0x255   : > { %v754_v24 = vpack.c.bf16 %v752_v32, %v750_v36 }
 0x256   : > { %v755_v52 = vpack.c.bf16 %v753_v40, %v751_v29 }
 0x258   : > { %992 = vmatprep.mubr.bf16.mxu1 %v755_v52 }
 0x259   : > { %993 = vmatmul.mubr.bf16.vlgmr.msra.gmra.mrb[8].mxu1 %v754_v24 }
 0x25a   : > { %1110 = vmatpush1.bf16.msra.mxu1 %v3911_v14  ;;  %v286_v14 = vsub.s32 2, %v4211_v54 }
 0x25b   : > { %1111 = vmatprep.subr.bf16.mxu1 %v3919_v17  ;;  %v290_v17 = vsub.s32 3, %v4211_v54  ;;  %v5036_v54 = vld [vmem:[#allocation75_spill] sm:$0xff] }
 0x25d   : > { %v4285_v19 = vrot.slane %v4219_v49, %v290_v17 }
 0x25e   : > { %1112 = vmatpush1.bf16.msra.mxu1 %v3922_v18  ;;  %v4282_v18 = vrot.slane %v4219_v49, %v286_v14 }
 0x25f   : > { %1113 = vmatprep.subr.bf16.mxu1 %v3931_v21  ;;  %v696_v21 = vadd.f32 %v4235_v48, %v4285_v19 }
 0x260   : > { %v694_v20 = vadd.f32 %v4232_v10, %v4282_v18 }
 0x262   : > { %1114 = vmatpush1.bf16.msra.mxu1 %v3935_v22  ;;  %v2674_v22 = vmul.f32 -1.442695, %v694_v20 }
 0x263   : > { %1115 = vmatprep.subr.bf16.mxu1 %v3939_v23  ;;  %v2675_v23 = vmul.f32 -1.442695, %v696_v21 }
 0x264   : > { %3057 = vpow2.f32 %v2674_v22 }
 0x265   : > { %3059 = vpow2.f32 %v2675_v23 }
 0x266   : > { %1116 = vmatpush1.bf16.msra.mxu1 %v3947_v26  ;;  %v698_v26 = vadd.f32 %v4238_v41, %v4282_v18 }
 0x267   : > { %1117 = vmatprep.subr.bf16.mxu1 %v3951_v27  ;;  %v700_v27 = vadd.f32 %v4241_v33, %v4285_v19 }
 0x26a   : > { %1118 = vmatpush1.bf16.msra.mxu1 %v3959_v30  ;;  %v2678_v30 = vmul.f32 -1.442695, %v698_v26 }
 0x26b   : > { %1119 = vmatprep.subr.bf16.mxu1 %v3963_v31  ;;  %v2679_v31 = vmul.f32 -1.442695, %v700_v27 }
 0x26c   : > { %3061 = vpow2.f32 %v2678_v30 }
 0x26d   : > { %3063 = vpow2.f32 %v2679_v31 }
 0x26e   : > { %1120 = vmatpush1.bf16.msra.mxu1 %v3971_v34  ;;  %v3058_v49 = vpop.eup %3057 }
 0x26f   : > { %1121 = vmatprep.subr.bf16.mxu1 %v3975_v35  ;;  %v3060_v48 = vpop.eup %3059  ;;  %v728_v10 = vadd.f32 1.0, %v3058_v49 }
 0x270   : > { %v729_v41 = vadd.f32 1.0, %v3060_v48 }
 0x271   : > { %3065 = vrcp.f32 %v728_v10 }
 0x272   : > { %1122 = vmatpush1.bf16.msra.mxu1 %v3983_v38  ;;  %3067 = vrcp.f32 %v729_v41 }
 0x273   : > { %1123 = vmatprep.subr.bf16.mxu1 %v3987_v39 }
 0x276   : > { %1124 = vmatpush1.bf16.msra.mxu1 %v3995_v42  ;;  %v3062_v33 = vpop.eup %3061 }
 0x277   : > { %1125 = vmatprep.subr.bf16.mxu1 %v3999_v43  ;;  %v3064_v45 = vpop.eup %3063  ;;  %v732_v32 = vadd.f32 1.0, %v3062_v33 }
 0x278   : > { %v733_v24 = vadd.f32 1.0, %v3064_v45 }
 0x27a   : > { %1126 = vmatpush1.bf16.msra.mxu1 %v4007_v46 }
 0x27b   : > { %1127 = vmatprep.subr.bf16.mxu1 %v4011_v47  ;;  %v3066_v14 = vpop.eup %3065 }
 0x27c   : > { %v3068_v17 = vpop.eup %3067 }
 0x27e   : > { %1128 = vmatpush1.bf16.msra.mxu1 %v4019_v50 }
 0x27f   : > { %1129 = vmatprep.subr.bf16.mxu1 %v4023_v51 }
 0x282   : > { %1130 = vmatpush1.bf16.msra.mxu1 %v4027_v53 }
 0x283   : > { %1131 = vmatprep.subr.bf16.mxu1 %v4031_v55 }
 0x286   : > { %1132 = vmatpush1.bf16.msra.mxu1 %v4039_v57 }
 0x287   : > { %1133 = vmatprep.subr.bf16.mxu1 %v4043_v59 }
 0x28a   : > { %1134 = vmatpush1.bf16.msra.mxu1 %v4051_v61 }
 0x28b   : > { %1135 = vmatprep.subr.bf16.mxu1 %v4055_v63 }
 0x28e   : > { %1136 = vmatpush1.bf16.msra.mxu1 %v4065_v5 }
 0x28f   : > { %1137 = vmatprep.subr.bf16.mxu1 %v4071_v7 }
 0x292   : > { %1138 = vmatpush1.bf16.msra.mxu1 %v4085_v2 }
 0x293   : > { %1139 = vmatprep.subr.bf16.mxu1 %v4091_v3 }
 0x296   : > { %1140 = vmatpush1.bf16.msra.mxu1 %v4095_v6 }
 0x32c   : > { %v994_v44 = vpop.f32.mrb[8].mxu1 }
 0x32d   : > { %v995_v36 = vadd.f32 %v994_v44, %v4299_v60  ;;  %v996_v37 = vpop.f32.mrb[9].mxu1 }
 0x32e   : > { %v997_v29 = vadd.f32 %v996_v37, %v4302_v56  ;;  %v998_v28 = vpop.f32.mrb[10].mxu1 }
 0x32f   : > { %3069 = vtanh.f32 %v995_v36  ;;  %v999_v25 = vadd.f32 %v998_v28, %v4299_v60  ;;  %v1000_v40 = vpop.f32.mrb[11].mxu1 }
 0x330   : > { %3071 = vtanh.f32 %v997_v29  ;;  %v1001_v52 = vadd.f32 %v1000_v40, %v4302_v56  ;;  %v4991_v40 = vld [vmem:[#allocation31_spill] sm:$0xff] }
 0x331   : > { %3073 = vtanh.f32 %v999_v25  ;;  %v4989_v25 = vld [vmem:[#allocation29_spill] sm:$0xff] }
 0x332   : > { %3075 = vtanh.f32 %v1001_v52  ;;  %v4996_v52 = vld [vmem:[#allocation36_spill] sm:$0xff] }
 0x333   : > { %3077 = vrcp.f32 %v732_v32  ;;  %v4988_v32 = vld [vmem:[#allocation28_spill] sm:$0xff] }
 0x334   : > { %3079 = vrcp.f32 %v733_v24  ;;  %v4995_v24 = vld [vmem:[#allocation35_spill] sm:$0xff] }
 0x339   : > { %v3070_v20 = vpop.eup %3069 }
 0x33a   : > { %v3072_v21 = vpop.eup %3071  ;;  %v1007_v22 = vsub.f32 %v3070_v20, %v4104_v12  ;;  %v4999_v20 = vld [vmem:[#allocation39_spill] sm:$0xff] }
 0x33b   : > { %v3074_v23 = vpop.eup %3073  ;;  %v1008_v26 = vsub.f32 %v3072_v21, %v4106_v9  ;;  %v5000_v21 = vld [vmem:[#allocation40_spill] sm:$0xff] }
 0x33c   : > { %v3076_v27 = vpop.eup %3075  ;;  %v1009_v30 = vsub.f32 %v3074_v23, %v4108_v4  ;;  %v1011_v31 = vmul.f32 %v3066_v14, %v1007_v22  ;;  %v4997_v14 = vld [vmem:[#allocation37_spill] sm:$0xff]  ;;  %v5002_v23 = vld [vmem:[#allocation42_spill] sm:$0xff] }
 0x33d   : > { %v3078_v49 = vpop.eup %3077  ;;  %v1010_v58 = vsub.f32 %v3076_v27, %v4112_v0  ;;  %v1012_v48 = vmul.f32 %v3068_v17, %v1008_v26  ;;  %v4998_v17 = vld [vmem:[#allocation38_spill] sm:$0xff]  ;;  %v5001_v22 = vld [vmem:[#allocation41_spill] sm:$0xff]  ;;  %v5003_v26 = vld [vmem:[#allocation43_spill] sm:$0xff] }
 0x33e   : > { %v3080_v10 = vpop.eup %3079  ;;  %v1013_v41 = vmul.f32 %v3078_v49, %v1009_v30  ;;  %v1015_v33 = vadd.f32 %v1011_v31, %v4104_v12  ;;  %v4984_v12 = vld [vmem:[#allocation24_spill] sm:$0xff]  ;;  %v5005_v30 = vld [vmem:[#allocation45_spill] sm:$0xff]  ;;  %v5006_v31 = vld [vmem:[#allocation46_spill] sm:$0xff] }
 0x33f   : > { %v1014_v44 = vmul.f32 %v3080_v10, %v1010_v58  ;;  %v1016_v45 = vadd.f32 %v1012_v48, %v4106_v9  ;;  %v4985_v9 = vld [vmem:[#allocation25_spill] sm:$0xff]  ;;  %v5004_v27 = vld [vmem:[#allocation44_spill] sm:$0xff]  ;;  %v5007_v49 = vld [vmem:[#allocation47_spill] sm:$0xff] }
 0x340   : > { %v1017_v36 = vadd.f32 %v1013_v41, %v4108_v4  ;;  %v4986_v4 = vld [vmem:[#allocation26_spill] sm:$0xff]  ;;  %v5008_v58 = vld [vmem:[#allocation48_spill] sm:$0xff]  ;;  %v5009_v48 = vld [vmem:[#allocation49_spill] sm:$0xff] }
 0x341   : > { %v1018_v37 = vadd.f32 %v1014_v44, %v4112_v0  ;;  %v4987_v0 = vld [vmem:[#allocation27_spill] sm:$0xff]  ;;  %v5010_v10 = vld [vmem:[#allocation50_spill] sm:$0xff]  ;;  %v5013_v44 = vld [vmem:[#allocation53_spill] sm:$0xff] }
 0x342   : > { %v1019_v29 = vpack.c.bf16 %v1017_v36, %v1015_v33  ;;  %v5011_v41 = vld [vmem:[#allocation51_spill] sm:$0xff]  ;;  %v5012_v33 = vld [vmem:[#allocation52_spill] sm:$0xff] }
 0x343   : > { %v1020_v28 = vpack.c.bf16 %v1018_v37, %v1016_v45 }
 0x345   : > { %1021 = vmatprep.subr.bf16.mxu0 %v1020_v28 }
 0x346   : > { %1022 = vmatpush1.bf16.msra.mxu0 %v1019_v29 }
 0x347   : > { %1066 = vmatprep.subr.bf16.mxu0 %v3904_v8  ;;  %v4990_v8 = vld [vmem:[#allocation30_spill] sm:$0xff] }
 0x349   : > { %2712 = vmatmul.mubr.msk.bf16.vlgmr.msra.gmra.mrb[4].mxu0 %vm161_vm0, %v3909_v13  ;;  %v4992_v13 = vld [vmem:[#allocation32_spill] sm:$0xff] }
 0x34a   : > { %1067 = vmatpush1.bf16.msra.mxu0 %v3914_v15  ;;  %v4993_v15 = vld [vmem:[#allocation33_spill] sm:$0xff] }
 0x34b   : > { %1068 = vmatprep.subr.bf16.mxu0 %v3917_v16  ;;  %v4994_v16 = vld [vmem:[#allocation34_spill] sm:$0xff] }
 0x34e   : > { %1069 = vmatpush1.bf16.msra.mxu0 %v4984_v12 }
 0x34f   : > { %1070 = vmatprep.subr.bf16.mxu0 %v4985_v9  ;;  %v5014_v9 = vld [vmem:[#allocation54_spill] sm:$0xff] }
 0x352   : > { %1071 = vmatpush1.bf16.msra.mxu0 %v4986_v4  ;;  %v5015_v4 = vmov 0  }
 0x353   : > { %1072 = vmatprep.subr.bf16.mxu0 %v4987_v0  ;;  %v5016_v0 = vld [vmem:[#allocation55_spill] sm:$0xff] }
 0x356   : > { %1073 = vmatpush1.bf16.msra.mxu0 %v4988_v32  ;;  %v5017_v32 = vld [vmem:[#allocation56_spill] sm:$0xff] }
 0x357   : > { %1074 = vmatprep.subr.bf16.mxu0 %v4989_v25  ;;  %v5018_v25 = vld [vmem:[#allocation57_spill] sm:$0xff] }
 0x35a   : > { %1075 = vmatpush1.bf16.msra.mxu0 %v4990_v8  ;;  %v5019_v8 = vld [vmem:[#allocation58_spill] sm:$0xff] }
 0x35b   : > { %1076 = vmatprep.subr.bf16.mxu0 %v4991_v40  ;;  %v5020_v40 = vld [vmem:[#allocation59_spill] sm:$0xff] }
 0x35e   : > { %1077 = vmatpush1.bf16.msra.mxu0 %v4992_v13  ;;  %v5021_v13 = vld [vmem:[#allocation60_spill] sm:$0xff] }
 0x35f   : > { %1078 = vmatprep.subr.bf16.mxu0 %v4993_v15  ;;  %v5022_v15 = vld [vmem:[#allocation61_spill] sm:$0xff] }
 0x362   : > { %1079 = vmatpush1.bf16.msra.mxu0 %v4994_v16  ;;  %v5023_v16 = vld [vmem:[#allocation62_spill] sm:$0xff] }
 0x363   : > { %1080 = vmatprep.subr.bf16.mxu0 %v4995_v24  ;;  %v5024_v24 = vld [vmem:[#allocation63_spill] sm:$0xff] }
 0x366   : > { %1081 = vmatpush1.bf16.msra.mxu0 %v4996_v52  ;;  %v5025_v52 = vld [vmem:[#allocation64_spill] sm:$0xff] }
 0x367   : > { %1082 = vmatprep.subr.bf16.mxu0 %v4997_v14  ;;  %v5026_v14 = vld [vmem:[#allocation65_spill] sm:$0xff] }
 0x36a   : > { %1083 = vmatpush1.bf16.msra.mxu0 %v4998_v17  ;;  %v5027_v17 = vld [vmem:[#allocation66_spill] sm:$0xff] }
 0x36b   : > { %1084 = vmatprep.subr.bf16.mxu0 %v4999_v20  ;;  %v5028_v20 = vld [vmem:[#allocation67_spill] sm:$0xff] }
 0x36e   : > { %1085 = vmatpush1.bf16.msra.mxu0 %v5000_v21  ;;  %v5029_v21 = vld [vmem:[#allocation68_spill] sm:$0xff] }
 0x36f   : > { %1086 = vmatprep.subr.bf16.mxu0 %v5001_v22  ;;  %v5030_v22 = vld [vmem:[#allocation69_spill] sm:$0xff] }
 0x372   : > { %1087 = vmatpush1.bf16.msra.mxu0 %v5002_v23  ;;  %v5031_v23 = vld [vmem:[#allocation70_spill] sm:$0xff] }
 0x373   : > { %1088 = vmatprep.subr.bf16.mxu0 %v5003_v26  ;;  %v5032_v26 = vld [vmem:[#allocation71_spill] sm:$0xff] }
 0x376   : > { %1089 = vmatpush1.bf16.msra.mxu0 %v5004_v27  ;;  %v5033_v27 = vld [vmem:[#allocation72_spill] sm:$0xff] }
 0x377   : > { %1090 = vmatprep.subr.bf16.mxu0 %v5005_v30 }
 0x37a   : > { %1091 = vmatpush1.bf16.msra.mxu0 %v5006_v31 }
 0x37b   : > { %1092 = vmatprep.subr.bf16.mxu0 %v5007_v49 }
 0x37e   : > { %1093 = vmatpush1.bf16.msra.mxu0 %v5008_v58 }
 0x37f   : > { %1094 = vmatprep.subr.bf16.mxu0 %v5009_v48 }
 0x382   : > { %1095 = vmatpush1.bf16.msra.mxu0 %v5010_v10 }
 0x383   : > { %1096 = vmatprep.subr.bf16.mxu0 %v5011_v41 }
 0x386   : > { %1097 = vmatpush1.bf16.msra.mxu0 %v5012_v33 }
 0x387   : > { %1206 = vmatprep.subr.bf16.mxu0 %v5013_v44 }
 0x41c   : > { %v4351_v45 = vpop.f32.mrb[4].mxu0 }
 0x41d   : > { %v4353_v36 = vpop.f32.mrb[5].mxu0 }
 0x41e   : > { %v4355_v37 = vpop.f32.mrb[6].mxu0 }
 0x41f   : > { %v1064_v29 = vpack.c.bf16 %v4355_v37, %v4351_v45  ;;  %v4359_v28 = vpop.f32.mrb[7].mxu0 }
 0x420   : > { %v1065_v12 = vpack.c.bf16 %v4359_v28, %v4353_v36 }
 0x422   : > { %1098 = vmatprep.mubr.bf16.mxu0 %v1065_v12  ;;  %1141 = vmatprep.mubr.bf16.mxu1 %v1065_v12  ;;  %v5035_v12 = vld [vmem:[#allocation74_spill] sm:$0xff] }
 0x423   : > { %1099 = vmatmul.mubr.bf16.vlgmr.msra.gmra.mrb[8].mxu0 %v1064_v29  ;;  %1142 = vmatmul.mubr.bf16.vlgmr.msra.gmra.mrb[12].mxu1 %v1064_v29  ;;  %v5034_v29 = vld [vmem:[#allocation73_spill] sm:$0xff] }
 0x424   : > { %1207 = vmatpush1.bf16.msra.mxu0 %v5014_v9  ;;  %1299 = vmatprep.mubr.bf16.mxu1 %v5015_v4 }
 0x425   : > { %1208 = vmatprep.subr.bf16.mxu0 %v5016_v0 }
 0x428   : > { %1209 = vmatpush1.bf16.msra.mxu0 %v5017_v32 }
 0x429   : > { %1210 = vmatprep.subr.bf16.mxu0 %v5018_v25 }
 0x42c   : > { %1211 = vmatpush1.bf16.msra.mxu0 %v5019_v8 }
 0x42d   : > { %1212 = vmatprep.subr.bf16.mxu0 %v5020_v40 }
 0x430   : > { %1213 = vmatpush1.bf16.msra.mxu0 %v5021_v13 }
 0x431   : > { %1214 = vmatprep.subr.bf16.mxu0 %v5022_v15 }
 0x434   : > { %1215 = vmatpush1.bf16.msra.mxu0 %v5023_v16 }
 0x435   : > { %1216 = vmatprep.subr.bf16.mxu0 %v5024_v24 }
 0x438   : > { %1217 = vmatpush1.bf16.msra.mxu0 %v5025_v52 }
 0x439   : > { %1218 = vmatprep.subr.bf16.mxu0 %v5026_v14 }
 0x43c   : > { %1219 = vmatpush1.bf16.msra.mxu0 %v5027_v17 }
 0x43d   : > { %1220 = vmatprep.subr.bf16.mxu0 %v5028_v20  ;;  %v5039_v20 = vld [vmem:[#allocation78_spill] sm:$0xff] }
 0x440   : > { %1221 = vmatpush1.bf16.msra.mxu0 %v5029_v21  ;;  %v5040_v21 = vld [vmem:[#allocation79_spill] sm:$0xff] }
 0x441   : > { %1222 = vmatprep.subr.bf16.mxu0 %v5030_v22  ;;  %v5041_v22 = vld [vmem:[#allocation80_spill] sm:$0xff] }
 0x444   : > { %1223 = vmatpush1.bf16.msra.mxu0 %v5031_v23  ;;  %v5042_v23 = vld [vmem:[#allocation81_spill] sm:$0xff] }
 0x445   : > { %1224 = vmatprep.subr.bf16.mxu0 %v5032_v26  ;;  %v5043_v26 = vld [vmem:[#allocation82_spill] sm:$0xff] }
 0x448   : > { %1225 = vmatpush1.bf16.msra.mxu0 %v5033_v27  ;;  %v5044_v27 = vld [vmem:[#allocation83_spill] sm:$0xff] }
 0x449   : > { %1226 = vmatprep.subr.bf16.mxu0 %v5034_v29  ;;  %v5045_v29 = vld [vmem:[#allocation84_spill] sm:$0xff] }
 0x44c   : > { %1227 = vmatpush1.bf16.msra.mxu0 %v5035_v12  ;;  %v4395_v12 = vld [vmem:[#allocation7 + $0xc] ss:$16 sps:$4 sm:$0xff]  }
 0x44d   : > { %1228 = vmatprep.subr.bf16.mxu0 %v5036_v54  ;;  %5046 = vst [vmem:[#allocation24_spill] sm:$0xff] %v4395_v12 }
 0x450   : > { %1229 = vmatpush1.bf16.msra.mxu0 %v5037_v62 }
 0x451   : > { %1230 = vmatprep.subr.bf16.mxu0 %v5038_v1 }
 0x454   : > { %1231 = vmatpush1.bf16.msra.mxu0 %v5039_v20  ;;  %v5047_v20 = vld [vmem:[#allocation88_spill] sm:$0xff] }
 0x455   : > { %1232 = vmatprep.subr.bf16.mxu0 %v5040_v21 }
 0x458   : > { %1233 = vmatpush1.bf16.msra.mxu0 %v5041_v22 }
 0x459   : > { %1234 = vmatprep.subr.bf16.mxu0 %v5042_v23 }
 0x45c   : > { %1235 = vmatpush1.bf16.msra.mxu0 %v5043_v26 }
 0x45d   : > { %1236 = vmatprep.subr.bf16.mxu0 %v5044_v27 }
 0x460   : > { %1237 = vmatpush1.bf16.msra.mxu0 %v5045_v29 }
 0x461   : > { %1355 = vmatprep.subr.bf16.mxu0 %v4395_v12 }
 0x4f6   : > { %v1100_v62 = vpop.f32.mrb[8].mxu0  ;;  %v4398_v1 = vpop.f32.mrb[12].mxu1 }
 0x4f7   : > { %v1101_v54 = vadd.f32 %v1100_v62, %v5047_v20  ;;  %v1102_v21 = vpop.f32.mrb[9].mxu0  ;;  %v4401_v17 = vpop.f32.mrb[13].mxu1 }
 0x4f8   : > { %v1103_v23 = vadd.f32 %v1102_v21, %v4230_v11  ;;  %v1104_v22 = vpop.f32.mrb[10].mxu0  ;;  %v4404_v26 = vpop.f32.mrb[14].mxu1 }
 0x4f9   : > { %v2713_v27 = vmul.f32 -1.442695, %v1101_v54  ;;  %v1105_v29 = vadd.f32 %v1104_v22, %v5047_v20  ;;  %v1106_v14 = vpop.f32.mrb[11].mxu0  ;;  %v4407_v52 = vpop.f32.mrb[15].mxu1 }
 0x4fa   : > { %v2714_v12 = vmul.f32 -1.442695, %v1103_v23  ;;  %v1107_v24 = vadd.f32 %v1106_v14, %v4230_v11 }
 0x4fb   : > { %3081 = vpow2.f32 %v2713_v27  ;;  %v2717_v16 = vmul.f32 -1.442695, %v1105_v29 }
 0x4fc   : > { %3083 = vpow2.f32 %v2714_v12  ;;  %v2718_v62 = vmul.f32 -1.442695, %v1107_v24 }
 0x4fd   : > { %3085 = vpow2.f32 %v2717_v16 }
 0x4fe   : > { %3087 = vpow2.f32 %v2718_v62 }
 0x505   : > { %v3082_v15 = vpop.eup %3081 }
 0x506   : > { %v1176_v21 = vadd.f32 1.0, %v3082_v15  ;;  %v3084_v13 = vpop.eup %3083 }
 0x507   : > { %v1177_v40 = vadd.f32 1.0, %v3084_v13  ;;  %v3086_v54 = vpop.eup %3085 }
 0x508   : > { %3089 = vrcp.f32 %v1176_v21  ;;  %v1180_v22 = vadd.f32 1.0, %v3086_v54  ;;  %v3088_v20 = vpop.eup %3087  ;;  %v4423_v21 = vld [vmem:[#allocation7 + $0x4c] ss:$16 sps:$4 sm:$0xff]   ;;  %v4426_v54 = vld [vmem:[#allocation7 + $0x48] ss:$16 sps:$4 sm:$0xff]  }
 0x509   : > { %3091 = vrcp.f32 %v1177_v40  ;;  %v1181_v8 = vadd.f32 1.0, %v3088_v20  ;;  %v4414_v40 = vld [vmem:[#allocation7 + $0x8] ss:$16 sps:$4 sm:$0xff]  }
 0x50a   : > { %3093 = vrcp.f32 %v1180_v22  ;;  %v4420_v20 = vld [vmem:[#allocation7 + $0x28] ss:$16 sps:$4 sm:$0xff]   ;;  %v4429_v22 = vld [vmem:[#allocation7 + $0x6c] ss:$16 sps:$4 sm:$0xff]  }
 0x50b   : > { %3095 = vrcp.f32 %v1181_v8  ;;  %v4417_v8 = vld [vmem:[#allocation7 + $0x2c] ss:$16 sps:$4 sm:$0xff]  }
 0x512   : > { %v3090_v23 = vpop.eup %3089 }
 0x513   : > { %v1200_v14 = vmul.f32 %v3090_v23, %v4351_v45  ;;  %v3092_v27 = vpop.eup %3091  ;;  %v4432_v23 = vld [vmem:[#allocation7 + $0x68] ss:$16 sps:$4 sm:$0xff]  }
 0x514   : > { %v1201_v24 = vmul.f32 %v3092_v27, %v4353_v36  ;;  %v3094_v16 = vpop.eup %3093  ;;  %v4438_v27 = vld [vmem:[#allocation7 + $0x88] ss:$16 sps:$4 sm:$0xff]  }
 0x515   : > { %v1202_v29 = vmul.f32 %v3094_v16, %v4355_v37  ;;  %v3096_v15 = vpop.eup %3095 }
 0x516   : > { %v1203_v12 = vmul.f32 %v3096_v15, %v4359_v28 }
 0x517   : > { %v1204_v13 = vpack.c.bf16 %v1202_v29, %v1200_v14  ;;  %v4435_v14 = vld [vmem:[#allocation7 + $0x8c] ss:$16 sps:$4 sm:$0xff]  }
 0x518   : > { %v1205_v62 = vpack.c.bf16 %v1203_v12, %v1201_v24  ;;  %v4441_v24 = vld [vmem:[#allocation7 + $0xac] ss:$16 sps:$4 sm:$0xff]  }
 0x51a   : > { %1238 = vmatprep.mubr.bf16.mxu0 %v1205_v62 }
 0x51b   : > { %1239 = vmatmul.mubr.bf16.vlgmr.msra.gmra.mrb[12].mxu0 %v1204_v13 }
 0x51c   : > { %1356 = vmatpush1.bf16.msra.mxu0 %v4414_v40 }
 0x51d   : > { %1357 = vmatprep.subr.bf16.mxu0 %v4417_v8 }
 0x520   : > { %1358 = vmatpush1.bf16.msra.mxu0 %v4420_v20 }
 0x521   : > { %1359 = vmatprep.subr.bf16.mxu0 %v4423_v21 }
 0x524   : > { %1360 = vmatpush1.bf16.msra.mxu0 %v4426_v54 }
 0x525   : > { %1361 = vmatprep.subr.bf16.mxu0 %v4429_v22 }
 0x528   : > { %1362 = vmatpush1.bf16.msra.mxu0 %v4432_v23 }
 0x529   : > { %1363 = vmatprep.subr.bf16.mxu0 %v4435_v14 }
 0x52c   : > { %1364 = vmatpush1.bf16.msra.mxu0 %v4438_v27 }
 0x52d   : > { %1365 = vmatprep.subr.bf16.mxu0 %v4441_v24 }
 0x530   : > { %1366 = vmatpush1.bf16.msra.mxu0 %v3971_v34  ;;  %v1144_v34 = vadd.f32 %v4398_v1, %v4282_v18 }
 0x531   : > { %1367 = vmatprep.subr.bf16.mxu0 %v3975_v35  ;;  %v1146_v35 = vadd.f32 %v4401_v17, %v4285_v19 }
 0x534   : > { %1368 = vmatpush1.bf16.msra.mxu0 %v3983_v38  ;;  %v2715_v38 = vmul.f32 -1.442695, %v1144_v34 }
 0x535   : > { %1369 = vmatprep.subr.bf16.mxu0 %v3987_v39  ;;  %v2716_v39 = vmul.f32 -1.442695, %v1146_v35 }
 0x536   : > { %3097 = vpow2.f32 %v2715_v38 }
 0x537   : > { %3099 = vpow2.f32 %v2716_v39 }
 0x538   : > { %1370 = vmatpush1.bf16.msra.mxu0 %v3995_v42  ;;  %v1148_v42 = vadd.f32 %v4404_v26, %v4282_v18 }
 0x539   : > { %1371 = vmatprep.subr.bf16.mxu0 %v3999_v43  ;;  %v1150_v43 = vadd.f32 %v4407_v52, %v4285_v19 }
 0x53c   : > { %1372 = vmatpush1.bf16.msra.mxu0 %v4007_v46 }
 0x53d   : > { %1373 = vmatprep.subr.bf16.mxu0 %v4011_v47 }
 0x540   : > { %1374 = vmatpush1.bf16.msra.mxu0 %v4019_v50  ;;  %v3098_v46 = vpop.eup %3097 }
 0x541   : > { %1375 = vmatprep.subr.bf16.mxu0 %v4023_v51  ;;  %v3100_v47 = vpop.eup %3099  ;;  %v1178_v50 = vadd.f32 1.0, %v3098_v46 }
 0x542   : > { %v1179_v51 = vadd.f32 1.0, %v3100_v47 }
 0x544   : > { %1376 = vmatpush1.bf16.msra.mxu0 %v4027_v53 }
 0x545   : > { %1377 = vmatprep.subr.bf16.mxu0 %v4031_v55 }
 0x548   : > { %1378 = vmatpush1.bf16.msra.mxu0 %v4039_v57 }
 0x549   : > { %1379 = vmatprep.subr.bf16.mxu0 %v4043_v59 }
 0x54c   : > { %1380 = vmatpush1.bf16.msra.mxu0 %v4051_v61 }
 0x54d   : > { %1381 = vmatprep.subr.bf16.mxu0 %v4055_v63 }
 0x550   : > { %1382 = vmatpush1.bf16.msra.mxu0 %v4065_v5 }
 0x551   : > { %1383 = vmatprep.subr.bf16.mxu0 %v4071_v7 }
 0x554   : > { %1384 = vmatpush1.bf16.msra.mxu0 %v4085_v2  ;;  %v2719_v2 = vmul.f32 -1.442695, %v1148_v42 }
 0x555   : > { %1385 = vmatprep.subr.bf16.mxu0 %v4091_v3  ;;  %v2720_v3 = vmul.f32 -1.442695, %v1150_v43 }
 0x556   : > { %3101 = vpow2.f32 %v2719_v2 }
 0x557   : > { %3103 = vpow2.f32 %v2720_v3 }
 0x558   : > { %1386 = vmatpush1.bf16.msra.mxu0 %v4095_v6  ;;  %3105 = vrcp.f32 %v1178_v50 }
 0x559   : > { %3107 = vrcp.f32 %v1179_v51 }
 0x560   : > { %v3102_v53 = vpop.eup %3101 }
 0x561   : > { %v3104_v57 = vpop.eup %3103  ;;  %v1182_v6 = vadd.f32 1.0, %v3102_v53 }
 0x562   : > { %v1183_v52 = vadd.f32 1.0, %v3104_v57  ;;  %v3106_v26 = vpop.eup %3105 }
 0x563   : > { %v3108_v16 = vpop.eup %3107 }
 0x5ee   : > { %v1240_v55 = vpop.f32.mrb[12].mxu0 }
 0x5ef   : > { %v1241_v59 = vadd.f32 %v1240_v55, %v4299_v60  ;;  %v1242_v61 = vpop.f32.mrb[13].mxu0 }
 0x5f0   : > { %v1243_v63 = vadd.f32 %v1242_v61, %v4302_v56  ;;  %v1244_v5 = vpop.f32.mrb[14].mxu0  ;;  %v4488_v61 = vld [vmem:[#allocation2] sm:$0xff]  }
 0x5f1   : > { %3109 = vtanh.f32 %v1241_v59  ;;  %v1245_v7 = vadd.f32 %v1244_v5, %v4299_v60  ;;  %v1246_v1 = vpop.f32.mrb[15].mxu0  ;;  %v4485_v59 = vld [vmem:[#allocation7 + $0x4] ss:$16 sps:$4 sm:$0xff]  }
 0x5f2   : > { %3111 = vtanh.f32 %v1243_v63  ;;  %v1247_v17 = vadd.f32 %v1246_v1, %v4302_v56  ;;  %v4504_v63 = vld [vmem:[#allocation7 + $0x40] ss:$16 sps:$4 sm:$0xff]   ;;  %v4507_v5 = vld [vmem:[#allocation7 + $0x64] ss:$16 sps:$4 sm:$0xff]  }
 0x5f3   : > { %3113 = vtanh.f32 %v1245_v7  ;;  %v4513_v7 = vld [vmem:[#allocation7 + $0x84] ss:$16 sps:$4 sm:$0xff]   ;;  %v4516_v1 = vld [vmem:[#allocation7 + $0x80] ss:$16 sps:$4 sm:$0xff]  }
 0x5f4   : > { %3115 = vtanh.f32 %v1247_v17  ;;  %v4522_v17 = vld [vmem:[#allocation7 + $0xa0] ss:$16 sps:$4 sm:$0xff]  }
 0x5f5   : > { %3117 = vrcp.f32 %v1182_v6  ;;  %v4510_v6 = vld [vmem:[#allocation7 + $0x60] ss:$16 sps:$4 sm:$0xff]  }
 0x5f6   : > { %3119 = vrcp.f32 %v1183_v52  ;;  %v4519_v52 = vld [vmem:[#allocation7 + $0xa4] ss:$16 sps:$4 sm:$0xff]  }
 0x5fb   : > { %v3110_v29 = vpop.eup %3109 }
 0x5fc   : > { %v3112_v15 = vpop.eup %3111  ;;  %v1253_v12 = vsub.f32 %v3110_v29, %v4351_v45  ;;  %v4531_v29 = vld [vmem:[#allocation7 + $0xe4] ss:$16 sps:$4 sm:$0xff]  }
 0x5fd   : > { %v3114_v13 = vpop.eup %3113  ;;  %v1254_v62 = vsub.f32 %v3112_v15, %v4353_v36  ;;  %v4534_v15 = vld [vmem:[#allocation7 + $0xe0] ss:$16 sps:$4 sm:$0xff]  }
 0x5fe   : > { %v3116_v34 = vpop.eup %3115  ;;  %v1255_v35 = vsub.f32 %v3114_v13, %v4355_v37  ;;  %v1257_v38 = vmul.f32 %v3106_v26, %v1253_v12  ;;  %v4525_v26 = vld [vmem:[#allocation7 + $0xc4] ss:$16 sps:$4 sm:$0xff]   ;;  %v4540_v13 = vld [vmem:[#allocation7 + $0x100] ss:$16 sps:$4 sm:$0xff]  }
 0x5ff   : > { %v3118_v39 = vpop.eup %3117  ;;  %v1256_v42 = vsub.f32 %v3116_v34, %v4359_v28  ;;  %v1258_v43 = vmul.f32 %v3108_v16, %v1254_v62  ;;  %v4528_v16 = vld [vmem:[#allocation7 + $0xc0] ss:$16 sps:$4 sm:$0xff]   ;;  %v4537_v12 = vld [vmem:[#allocation7 + $0x104] ss:$16 sps:$4 sm:$0xff]  }
 0x600   : > { %v3120_v2 = vpop.eup %3119  ;;  %v1259_v3 = vmul.f32 %v3118_v39, %v1255_v35  ;;  %v1261_v46 = vadd.f32 %v1257_v38, %v4351_v45  ;;  %v4492_v45 = vld [vmem:[#allocation7] ss:$16 sps:$4 sm:$0xff]   ;;  %v4543_v62 = vld [vmem:[#allocation7 + $0x124] ss:$16 sps:$4 sm:$0xff]  }
 0x601   : > { %v1260_v47 = vmul.f32 %v3120_v2, %v1256_v42  ;;  %v1262_v50 = vadd.f32 %v1258_v43, %v4353_v36  ;;  %v4495_v36 = vld [vmem:[#allocation7 + $0x24] ss:$16 sps:$4 sm:$0xff]   ;;  %v4546_v34 = vld [vmem:[#allocation7 + $0x120] ss:$16 sps:$4 sm:$0xff]  }
 0x602   : > { %v1263_v51 = vadd.f32 %v1259_v3, %v4355_v37  ;;  %v4498_v37 = vld [vmem:[#allocation7 + $0x20] ss:$16 sps:$4 sm:$0xff]   ;;  %v4549_v35 = vld [vmem:[#allocation7 + $0x144] ss:$16 sps:$4 sm:$0xff]  }
 0x603   : > { %v1264_v53 = vadd.f32 %v1260_v47, %v4359_v28  ;;  %v4501_v28 = vld [vmem:[#allocation7 + $0x44] ss:$16 sps:$4 sm:$0xff]   ;;  %v4552_v38 = vld [vmem:[#allocation7 + $0x140] ss:$16 sps:$4 sm:$0xff]  }
 0x604   : > { %v1265_v55 = vpack.c.bf16 %v1263_v51, %v1261_v46  ;;  %v4555_v39 = vld [vmem:[#allocation7 + $0x164] ss:$16 sps:$4 sm:$0xff]   ;;  %v4558_v42 = vld [vmem:[#allocation7 + $0x160] ss:$16 sps:$4 sm:$0xff]  }
 0x605   : > { %v1266_v57 = vpack.c.bf16 %v1264_v53, %v1262_v50  ;;  %v5053_v3 = vld [vmem:[#allocation63_spill] sm:$0xff]  ;;  %v5059_v46 = vld [vmem:[#allocation69_spill] sm:$0xff]  ;;  %v5060_v47 = vld [vmem:[#allocation70_spill] sm:$0xff] }
 0x606   : > { %v5061_v50 = vld [vmem:[#allocation71_spill] sm:$0xff]  ;;  %v5062_v51 = vld [vmem:[#allocation72_spill] sm:$0xff]  ;;  %v5063_v53 = vld [vmem:[#allocation73_spill] sm:$0xff] }
 0x607   : > { %1267 = vmatprep.subr.bf16.mxu1 %v1266_v57  ;;  %v5065_v57 = vld [vmem:[#allocation75_spill] sm:$0xff] }
 0x608   : > { %1268 = vmatpush1.bf16.msra.mxu1 %v1265_v55  ;;  %v5064_v55 = vld [vmem:[#allocation74_spill] sm:$0xff] }
 0x609   : > { %1312 = vmatprep.subr.bf16.mxu1 %v4485_v59 }
 0x60b   : > { %2721 = vmatmul.mubr.msk.bf16.vlgmr.msra.gmra.mrb[16].mxu1 %vm161_vm0, %v4488_v61 }
 0x60c   : > { %1313 = vmatpush1.bf16.msra.mxu1 %v4492_v45 }
 0x60d   : > { %1314 = vmatprep.subr.bf16.mxu1 %v4495_v36 }
 0x610   : > { %1315 = vmatpush1.bf16.msra.mxu1 %v4498_v37 }
 0x611   : > { %1316 = vmatprep.subr.bf16.mxu1 %v4501_v28 }
 0x614   : > { %1317 = vmatpush1.bf16.msra.mxu1 %v4504_v63 }
 0x615   : > { %1318 = vmatprep.subr.bf16.mxu1 %v4507_v5 }
 0x618   : > { %1319 = vmatpush1.bf16.msra.mxu1 %v4510_v6 }
 0x619   : > { %1320 = vmatprep.subr.bf16.mxu1 %v4513_v7 }
 0x61c   : > { %1321 = vmatpush1.bf16.msra.mxu1 %v4516_v1 }
 0x61d   : > { %1322 = vmatprep.subr.bf16.mxu1 %v4519_v52 }
 0x620   : > { %1323 = vmatpush1.bf16.msra.mxu1 %v4522_v17 }
 0x621   : > { %1324 = vmatprep.subr.bf16.mxu1 %v4525_v26 }
 0x624   : > { %1325 = vmatpush1.bf16.msra.mxu1 %v4528_v16 }
 0x625   : > { %1326 = vmatprep.subr.bf16.mxu1 %v4531_v29 }
 0x628   : > { %1327 = vmatpush1.bf16.msra.mxu1 %v4534_v15 }
 0x629   : > { %1328 = vmatprep.subr.bf16.mxu1 %v4537_v12 }
 0x62c   : > { %1329 = vmatpush1.bf16.msra.mxu1 %v4540_v13 }
 0x62d   : > { %1330 = vmatprep.subr.bf16.mxu1 %v4543_v62 }
 0x630   : > { %1331 = vmatpush1.bf16.msra.mxu1 %v4546_v34 }
 0x631   : > { %1332 = vmatprep.subr.bf16.mxu1 %v4549_v35 }
 0x634   : > { %1333 = vmatpush1.bf16.msra.mxu1 %v4552_v38 }
 0x635   : > { %1334 = vmatprep.subr.bf16.mxu1 %v4555_v39 }
 0x638   : > { %1335 = vmatpush1.bf16.msra.mxu1 %v4558_v42 }
 0x639   : > { %1336 = vmatprep.subr.bf16.mxu1 %v5005_v30 }
 0x63c   : > { %1337 = vmatpush1.bf16.msra.mxu1 %v5006_v31 }
 0x63d   : > { %1338 = vmatprep.subr.bf16.mxu1 %v5007_v49 }
 0x640   : > { %1339 = vmatpush1.bf16.msra.mxu1 %v5008_v58 }
 0x641   : > { %1340 = vmatprep.subr.bf16.mxu1 %v5009_v48  ;;  %v5048_v48 = vld [vmem:[#allocation58_spill] sm:$0xff] }
 0x644   : > { %1341 = vmatpush1.bf16.msra.mxu1 %v5010_v10  ;;  %v5049_v10 = vld [vmem:[#allocation59_spill] sm:$0xff] }
 0x645   : > { %1342 = vmatprep.subr.bf16.mxu1 %v5011_v41  ;;  %v5050_v41 = vld [vmem:[#allocation60_spill] sm:$0xff] }
 0x648   : > { %1343 = vmatpush1.bf16.msra.mxu1 %v5012_v33  ;;  %v5051_v33 = vld [vmem:[#allocation61_spill] sm:$0xff] }
 0x649   : > { %1452 = vmatprep.subr.bf16.mxu1 %v5013_v44  ;;  %v5052_v44 = vld [vmem:[#allocation62_spill] sm:$0xff] }
 0x6de   : > { %v4570_v43 = vpop.f32.mrb[16].mxu1 }
 0x6df   : > { %v4572_v2 = vpop.f32.mrb[17].mxu1 }
 0x6e0   : > { %v4574_v30 = vpop.f32.mrb[18].mxu1 }
 0x6e1   : > { %v1310_v31 = vpack.c.bf16 %v4574_v30, %v4570_v43  ;;  %v4578_v49 = vpop.f32.mrb[19].mxu1 }
 0x6e2   : > { %v1311_v58 = vpack.c.bf16 %v4578_v49, %v4572_v2 }
 0x6e4   : > { %1344 = vmatprep.mubr.bf16.mxu1 %v1311_v58  ;;  %1387 = vmatprep.mubr.bf16.mxu0 %v1311_v58  ;;  %v5067_v58 = vld [vmem:[#allocation77_spill] sm:$0xff] }
 0x6e5   : > { %1345 = vmatmul.mubr.bf16.vlgmr.msra.gmra.mrb[20].mxu1 %v1310_v31  ;;  %1388 = vmatmul.mubr.bf16.vlgmr.msra.gmra.mrb[16].mxu0 %v1310_v31  ;;  %v5066_v31 = vld [vmem:[#allocation76_spill] sm:$0xff] }
 0x6e6   : > { %1453 = vmatpush1.bf16.msra.mxu1 %v5014_v9  ;;  %1545 = vmatprep.mubr.bf16.mxu0 %v5015_v4  ;;  %v5054_v9 = vld [vmem:[#allocation64_spill] sm:$0xff]  ;;  %v5055_v4 = vld [vmem:[#allocation65_spill] sm:$0xff] }
 0x6e7   : > { %1454 = vmatprep.subr.bf16.mxu1 %v5016_v0  ;;  %v5056_v0 = vld [vmem:[#allocation66_spill] sm:$0xff] }
 0x6ea   : > { %1455 = vmatpush1.bf16.msra.mxu1 %v5017_v32  ;;  %v5057_v32 = vld [vmem:[#allocation67_spill] sm:$0xff] }
 0x6eb   : > { %1456 = vmatprep.subr.bf16.mxu1 %v5018_v25  ;;  %v5058_v25 = vld [vmem:[#allocation68_spill] sm:$0xff] }
 0x6ee   : > { %1457 = vmatpush1.bf16.msra.mxu1 %v5048_v48  ;;  %v5068_v48 = vld [vmem:[#allocation78_spill] sm:$0xff] }
 0x6ef   : > { %1458 = vmatprep.subr.bf16.mxu1 %v5049_v10  ;;  %v5069_v10 = vld [vmem:[#allocation79_spill] sm:$0xff] }
 0x6f2   : > { %1459 = vmatpush1.bf16.msra.mxu1 %v5050_v41  ;;  %v5070_v41 = vld [vmem:[#allocation80_spill] sm:$0xff] }
 0x6f3   : > { %1460 = vmatprep.subr.bf16.mxu1 %v5051_v33  ;;  %v5071_v33 = vld [vmem:[#allocation81_spill] sm:$0xff] }
 0x6f6   : > { %1461 = vmatpush1.bf16.msra.mxu1 %v5052_v44  ;;  %v5072_v44 = vld [vmem:[#allocation82_spill] sm:$0xff] }
 0x6f7   : > { %1462 = vmatprep.subr.bf16.mxu1 %v5053_v3  ;;  %v5073_v3 = vld [vmem:[#allocation83_spill] sm:$0xff] }
 0x6fa   : > { %1463 = vmatpush1.bf16.msra.mxu1 %v5054_v9  ;;  %v5074_v9 = vld [vmem:[#allocation84_spill] sm:$0xff] }
 0x6fb   : > { %1464 = vmatprep.subr.bf16.mxu1 %v5055_v4  ;;  %v5075_v4 = vld [vmem:[#allocation24_spill] sm:$0xff] }
 0x6fe   : > { %1465 = vmatpush1.bf16.msra.mxu1 %v5056_v0 }
 0x6ff   : > { %1466 = vmatprep.subr.bf16.mxu1 %v5057_v32 }
 0x702   : > { %1467 = vmatpush1.bf16.msra.mxu1 %v5058_v25  ;;  %v5076_v25 = vld [vmem:[#allocation88_spill] sm:$0xff] }
 0x703   : > { %1468 = vmatprep.subr.bf16.mxu1 %v5059_v46 }
 0x706   : > { %1469 = vmatpush1.bf16.msra.mxu1 %v5060_v47 }
 0x707   : > { %1470 = vmatprep.subr.bf16.mxu1 %v5061_v50 }
 0x70a   : > { %1471 = vmatpush1.bf16.msra.mxu1 %v5062_v51 }
 0x70b   : > { %1472 = vmatprep.subr.bf16.mxu1 %v5063_v53 }
 0x70e   : > { %1473 = vmatpush1.bf16.msra.mxu1 %v5064_v55 }
 0x70f   : > { %1474 = vmatprep.subr.bf16.mxu1 %v5065_v57 }
 0x712   : > { %1475 = vmatpush1.bf16.msra.mxu1 %v5066_v31 }
 0x713   : > { %1476 = vmatprep.subr.bf16.mxu1 %v5067_v58 }
 0x716   : > { %1477 = vmatpush1.bf16.msra.mxu1 %v5068_v48 }
 0x717   : > { %1478 = vmatprep.subr.bf16.mxu1 %v5069_v10 }
 0x71a   : > { %1479 = vmatpush1.bf16.msra.mxu1 %v5070_v41 }
 0x71b   : > { %1480 = vmatprep.subr.bf16.mxu1 %v5071_v33 }
 0x71e   : > { %1481 = vmatpush1.bf16.msra.mxu1 %v5072_v44 }
 0x71f   : > { %1482 = vmatprep.subr.bf16.mxu1 %v5073_v3 }
 0x722   : > { %1483 = vmatpush1.bf16.msra.mxu1 %v5074_v9 }
 0x723   : > { %1601 = vmatprep.subr.bf16.mxu1 %v5075_v4 }
 0x7b8   : > { %v1346_v0 = vpop.f32.mrb[20].mxu1  ;;  %v4615_v32 = vpop.f32.mrb[16].mxu0 }
 0x7b9   : > { %v1347_v46 = vadd.f32 %v1346_v0, %v5076_v25  ;;  %v1348_v47 = vpop.f32.mrb[21].mxu1  ;;  %v4618_v50 = vpop.f32.mrb[17].mxu0 }
 0x7ba   : > { %v1349_v51 = vadd.f32 %v1348_v47, %v4230_v11  ;;  %v1350_v53 = vpop.f32.mrb[22].mxu1  ;;  %v4621_v55 = vpop.f32.mrb[18].mxu0 }
 0x7bb   : > { %v2722_v57 = vmul.f32 -1.442695, %v1347_v46  ;;  %v1351_v31 = vadd.f32 %v1350_v53, %v5076_v25  ;;  %v1352_v58 = vpop.f32.mrb[23].mxu1  ;;  %v4624_v48 = vpop.f32.mrb[19].mxu0 }
 0x7bc   : > { %v2723_v10 = vmul.f32 -1.442695, %v1349_v51  ;;  %v1353_v41 = vadd.f32 %v1352_v58, %v4230_v11 }
 0x7bd   : > { %3121 = vpow2.f32 %v2722_v57  ;;  %v2726_v33 = vmul.f32 -1.442695, %v1351_v31 }
 0x7be   : > { %3123 = vpow2.f32 %v2723_v10  ;;  %v2727_v44 = vmul.f32 -1.442695, %v1353_v41 }
 0x7bf   : > { %3125 = vpow2.f32 %v2726_v33 }
 0x7c0   : > { %3127 = vpow2.f32 %v2727_v44 }
 0x7c7   : > { %v3122_v3 = vpop.eup %3121 }
 0x7c8   : > { %v1422_v9 = vadd.f32 1.0, %v3122_v3  ;;  %v3124_v4 = vpop.eup %3123 }
 0x7c9   : > { %v1423_v0 = vadd.f32 1.0, %v3124_v4  ;;  %v3126_v46 = vpop.eup %3125  ;;  %v3248_v4 = vld [vmem:[#allocation7 + $0x16c] ss:$16 sps:$4 sm:$0xff]  }
 0x7ca   : > { %3129 = vrcp.f32 %v1422_v9  ;;  %v1426_v47 = vadd.f32 1.0, %v3126_v46  ;;  %v3128_v53 = vpop.eup %3127  ;;  %v3250_v46 = vld [vmem:[#allocation7 + $0x18c] ss:$16 sps:$4 sm:$0xff]  }
 0x7cb   : > { %3131 = vrcp.f32 %v1423_v0  ;;  %v1427_v25 = vadd.f32 1.0, %v3128_v53  ;;  %v3249_v0 = vld [vmem:[#allocation7 + $0x168] ss:$16 sps:$4 sm:$0xff]   ;;  %v3252_v53 = vld [vmem:[#allocation7 + $0x1ac] ss:$16 sps:$4 sm:$0xff]  }
 0x7cc   : > { %3133 = vrcp.f32 %v1426_v47  ;;  %v3251_v47 = vld [vmem:[#allocation7 + $0x188] ss:$16 sps:$4 sm:$0xff]  }
 0x7cd   : > { %3135 = vrcp.f32 %v1427_v25  ;;  %v3237_v25 = vld [vmem:[#allocation7 + $0xa8] ss:$16 sps:$4 sm:$0xff]  }
 0x7d4   : > { %v3130_v51 = vpop.eup %3129 }
 0x7d5   : > { %v1446_v57 = vmul.f32 %v3130_v51, %v4570_v43  ;;  %v3132_v31 = vpop.eup %3131  ;;  %v3253_v51 = vld [vmem:[#allocation7 + $0x1a8] ss:$16 sps:$4 sm:$0xff]  }
 0x7d6   : > { %v1447_v58 = vmul.f32 %v3132_v31, %v4572_v2  ;;  %v3134_v10 = vpop.eup %3133  ;;  %v3255_v31 = vld [vmem:[#allocation7 + $0x1c8] ss:$16 sps:$4 sm:$0xff]  }
 0x7d7   : > { %v1448_v41 = vmul.f32 %v3134_v10, %v4574_v30  ;;  %v3136_v33 = vpop.eup %3135  ;;  %v3257_v10 = vld [vmem:[#allocation7 + $0x1e8] ss:$16 sps:$4 sm:$0xff]  }
 0x7d8   : > { %v1449_v44 = vmul.f32 %v3136_v33, %v4578_v49  ;;  %v1392_v33 = vadd.f32 %v4618_v50, %v4285_v19 }
 0x7d9   : > { %v1450_v3 = vpack.c.bf16 %v1448_v41, %v1446_v57  ;;  %v3254_v57 = vld [vmem:[#allocation7 + $0x1cc] ss:$16 sps:$4 sm:$0xff]   ;;  %v1390_v41 = vadd.f32 %v4615_v32, %v4282_v18 }
 0x7da   : > { %v1451_v9 = vpack.c.bf16 %v1449_v44, %v1447_v58  ;;  %v3256_v58 = vld [vmem:[#allocation7 + $0x1ec] ss:$16 sps:$4 sm:$0xff]  }
 0x7db   : > { %v2724_v44 = vmul.f32 -1.442695, %v1390_v41 }
 0x7dc   : > { %1484 = vmatprep.mubr.bf16.mxu1 %v1451_v9  ;;  %v1394_v9 = vadd.f32 %v4621_v55, %v4282_v18 }
 0x7dd   : > { %1485 = vmatmul.mubr.bf16.vlgmr.msra.gmra.mrb[24].mxu1 %v1450_v3  ;;  %v2725_v3 = vmul.f32 -1.442695, %v1392_v33  ;;  %3137 = vpow2.f32 %v2724_v44 }
 0x7de   : > { %1602 = vmatpush1.bf16.msra.mxu1 %v4414_v40  ;;  %v3238_v40 = vld [vmem:[#allocation7 + $0xcc] ss:$16 sps:$4 sm:$0xff]  }
 0x7df   : > { %1603 = vmatprep.subr.bf16.mxu1 %v4417_v8  ;;  %v3239_v8 = vld [vmem:[#allocation7 + $0xc8] ss:$16 sps:$4 sm:$0xff]   ;;  %3139 = vpow2.f32 %v2725_v3 }
 0x7e2   : > { %1604 = vmatpush1.bf16.msra.mxu1 %v4420_v20  ;;  %v3240_v20 = vld [vmem:[#allocation7 + $0xec] ss:$16 sps:$4 sm:$0xff]  }
 0x7e3   : > { %1605 = vmatprep.subr.bf16.mxu1 %v4423_v21  ;;  %v3241_v21 = vld [vmem:[#allocation7 + $0xe8] ss:$16 sps:$4 sm:$0xff]  }
 0x7e6   : > { %1606 = vmatpush1.bf16.msra.mxu1 %v4426_v54  ;;  %v3242_v54 = vld [vmem:[#allocation7 + $0x10c] ss:$16 sps:$4 sm:$0xff]  }
 0x7e7   : > { %1607 = vmatprep.subr.bf16.mxu1 %v4429_v22  ;;  %v3243_v22 = vld [vmem:[#allocation7 + $0x108] ss:$16 sps:$4 sm:$0xff]  }
 0x7ea   : > { %1608 = vmatpush1.bf16.msra.mxu1 %v4432_v23  ;;  %v3244_v23 = vld [vmem:[#allocation7 + $0x12c] ss:$16 sps:$4 sm:$0xff]  }
 0x7eb   : > { %1609 = vmatprep.subr.bf16.mxu1 %v4435_v14  ;;  %v3245_v14 = vld [vmem:[#allocation7 + $0x128] ss:$16 sps:$4 sm:$0xff]  }
 0x7ee   : > { %1610 = vmatpush1.bf16.msra.mxu1 %v4438_v27  ;;  %v3246_v27 = vld [vmem:[#allocation7 + $0x14c] ss:$16 sps:$4 sm:$0xff]  }
 0x7ef   : > { %1611 = vmatprep.subr.bf16.mxu1 %v4441_v24  ;;  %v3247_v24 = vld [vmem:[#allocation7 + $0x148] ss:$16 sps:$4 sm:$0xff]  }
 0x7f2   : > { %1612 = vmatpush1.bf16.msra.mxu1 %v3237_v25  ;;  %v1396_v25 = vadd.f32 %v4624_v48, %v4285_v19 }
 0x7f3   : > { %1613 = vmatprep.subr.bf16.mxu1 %v3238_v40  ;;  %v2728_v40 = vmul.f32 -1.442695, %v1394_v9 }
 0x7f5   : > { %3141 = vpow2.f32 %v2728_v40 }
 0x7f6   : > { %1614 = vmatpush1.bf16.msra.mxu1 %v3239_v8  ;;  %v2729_v8 = vmul.f32 -1.442695, %v1396_v25 }
 0x7f7   : > { %1615 = vmatprep.subr.bf16.mxu1 %v3240_v20  ;;  %v3138_v20 = vpop.eup %3137 }
 0x7f8   : > { %3143 = vpow2.f32 %v2729_v8  ;;  %v1424_v32 = vadd.f32 1.0, %v3138_v20 }
 0x7fa   : > { %1616 = vmatpush1.bf16.msra.mxu1 %v3241_v21  ;;  %v3140_v21 = vpop.eup %3139  ;;  %3145 = vrcp.f32 %v1424_v32 }
 0x7fb   : > { %1617 = vmatprep.subr.bf16.mxu1 %v3242_v54  ;;  %v1425_v54 = vadd.f32 1.0, %v3140_v21 }
 0x7fd   : > { %3147 = vrcp.f32 %v1425_v54 }
 0x7fe   : > { %1618 = vmatpush1.bf16.msra.mxu1 %v3243_v22 }
 0x7ff   : > { %1619 = vmatprep.subr.bf16.mxu1 %v3244_v23  ;;  %v3142_v22 = vpop.eup %3141 }
 0x802   : > { %1620 = vmatpush1.bf16.msra.mxu1 %v3245_v14  ;;  %v3144_v23 = vpop.eup %3143 }
 0x803   : > { %1621 = vmatprep.subr.bf16.mxu1 %v3246_v27 }
 0x806   : > { %1622 = vmatpush1.bf16.msra.mxu1 %v3247_v24  ;;  %v1428_v24 = vadd.f32 1.0, %v3142_v22 }
 0x807   : > { %1623 = vmatprep.subr.bf16.mxu1 %v3248_v4 }
 0x80a   : > { %1624 = vmatpush1.bf16.msra.mxu1 %v3249_v0 }
 0x80b   : > { %1625 = vmatprep.subr.bf16.mxu1 %v3250_v46  ;;  %v1429_v46 = vadd.f32 1.0, %v3144_v23 }
 0x80e   : > { %1626 = vmatpush1.bf16.msra.mxu1 %v3251_v47 }
 0x80f   : > { %1627 = vmatprep.subr.bf16.mxu1 %v3252_v53  ;;  %v3146_v53 = vpop.eup %3145 }
 0x812   : > { %1628 = vmatpush1.bf16.msra.mxu1 %v3253_v51  ;;  %v3148_v51 = vpop.eup %3147 }
 0x813   : > { %1629 = vmatprep.subr.bf16.mxu1 %v3254_v57 }
 0x816   : > { %1630 = vmatpush1.bf16.msra.mxu1 %v3255_v31 }
 0x817   : > { %1631 = vmatprep.subr.bf16.mxu1 %v3256_v58 }
 0x81a   : > { %1632 = vmatpush1.bf16.msra.mxu1 %v3257_v10 }
 0x8b0   : > { %v1486_v50 = vpop.f32.mrb[24].mxu1 }
 0x8b1   : > { %v1487_v14 = vadd.f32 %v1486_v50, %v4299_v60  ;;  %v1488_v55 = vpop.f32.mrb[25].mxu1 }
 0x8b2   : > { %v1489_v48 = vadd.f32 %v1488_v55, %v4302_v56  ;;  %v1490_v27 = vpop.f32.mrb[26].mxu1  ;;  %v3281_v55 = vld [vmem:[#allocation8 + $0x70] ss:$8 sps:$4 sm:$0xff]  }
 0x8b3   : > { %3149 = vtanh.f32 %v1487_v14  ;;  %v1491_v4 = vadd.f32 %v1490_v27, %v4299_v60  ;;  %v1492_v0 = vpop.f32.mrb[27].mxu1  ;;  %v3283_v27 = vld [vmem:[#allocation8 + $0x80] ss:$8 sps:$4 sm:$0xff]  }
 0x8b4   : > { %3151 = vtanh.f32 %v1489_v48  ;;  %v1493_v47 = vadd.f32 %v1492_v0, %v4302_v56  ;;  %v3282_v48 = vld [vmem:[#allocation8 + $0x84] ss:$8 sps:$4 sm:$0xff]  }
 0x8b5   : > { %3153 = vtanh.f32 %v1491_v4  ;;  %v3285_v4 = vld [vmem:[#allocation8 + $0x90] ss:$8 sps:$4 sm:$0xff]   ;;  %v3286_v0 = vld [vmem:[#allocation8 + $0xa4] ss:$8 sps:$4 sm:$0xff]  }
 0x8b6   : > { %3155 = vtanh.f32 %v1493_v47  ;;  %v3288_v47 = vld [vmem:[#allocation8 + $0xb4] ss:$8 sps:$4 sm:$0xff]  }
 0x8b7   : > { %3157 = vrcp.f32 %v1428_v24  ;;  %v3284_v24 = vld [vmem:[#allocation8 + $0x94] ss:$8 sps:$4 sm:$0xff]  }
 0x8b8   : > { %3159 = vrcp.f32 %v1429_v46  ;;  %v3287_v46 = vld [vmem:[#allocation8 + $0xa0] ss:$8 sps:$4 sm:$0xff]  }
 0x8bd   : > { %v3150_v57 = vpop.eup %3149 }
 0x8be   : > { %v3152_v31 = vpop.eup %3151  ;;  %v1499_v58 = vsub.f32 %v3150_v57, %v4570_v43  ;;  %v3291_v57 = vld [vmem:[#allocation8 + $0xc0] ss:$8 sps:$4 sm:$0xff]  }
 0x8bf   : > { %v3154_v10 = vpop.eup %3153  ;;  %v1500_v41 = vsub.f32 %v3152_v31, %v4572_v2  ;;  %v3292_v31 = vld [vmem:[#allocation8 + $0xd4] ss:$8 sps:$4 sm:$0xff]  }
 0x8c0   : > { %v3156_v33 = vpop.eup %3155  ;;  %v1501_v44 = vsub.f32 %v3154_v10, %v4574_v30  ;;  %v1503_v3 = vmul.f32 %v3146_v53, %v1499_v58  ;;  %v3289_v53 = vld [vmem:[#allocation8 + $0xb0] ss:$8 sps:$4 sm:$0xff]   ;;  %v3294_v10 = vld [vmem:[#allocation8 + $0xe4] ss:$8 sps:$4 sm:$0xff]  }
 0x8c1   : > { %v3158_v9 = vpop.eup %3157  ;;  %v1502_v25 = vsub.f32 %v3156_v33, %v4578_v49  ;;  %v1504_v40 = vmul.f32 %v3148_v51, %v1500_v41  ;;  %v3290_v51 = vld [vmem:[#allocation8 + $0xc4] ss:$8 sps:$4 sm:$0xff]   ;;  %v3293_v58 = vld [vmem:[#allocation8 + $0xd0] ss:$8 sps:$4 sm:$0xff]   ;;  %v3295_v41 = vld [vmem:[#allocation8 + $0xe0] ss:$8 sps:$4 sm:$0xff]  }
 0x8c2   : > { %v3160_v8 = vpop.eup %3159  ;;  %v1505_v20 = vmul.f32 %v3158_v9, %v1501_v44  ;;  %v1507_v21 = vadd.f32 %v1503_v3, %v4570_v43  ;;  %v3277_v43 = vld [vmem:[#allocation8 + $0x50] ss:$8 sps:$4 sm:$0xff]   ;;  %v3296_v33 = vld [vmem:[#allocation8 + $0xf4] ss:$8 sps:$4 sm:$0xff]  }
 0x8c3   : > { %v1506_v32 = vmul.f32 %v3160_v8, %v1502_v25  ;;  %v1508_v54 = vadd.f32 %v1504_v40, %v4572_v2  ;;  %v3278_v2 = vld [vmem:[#allocation8 + $0x64] ss:$8 sps:$4 sm:$0xff]   ;;  %v3297_v44 = vld [vmem:[#allocation8 + $0xf0] ss:$8 sps:$4 sm:$0xff]  }
 0x8c4   : > { %v1509_v22 = vadd.f32 %v1505_v20, %v4574_v30  ;;  %v3279_v30 = vld [vmem:[#allocation8 + $0x60] ss:$8 sps:$4 sm:$0xff]  }
 0x8c5   : > { %v1510_v50 = vadd.f32 %v1506_v32, %v4578_v49  ;;  %v3280_v49 = vld [vmem:[#allocation8 + $0x74] ss:$8 sps:$4 sm:$0xff]   ;;  %v5077_v25 = vld [vmem:[#allocation88_spill] sm:$0xff] }
 0x8c6   : > { %v1511_v23 = vpack.c.bf16 %v1509_v22, %v1507_v21 }
 0x8c7   : > { %v1512_v14 = vpack.c.bf16 %v1510_v50, %v1508_v54 }
 0x8c9   : > { %1513 = vmatprep.subr.bf16.mxu0 %v1512_v14 }
 0x8ca   : > { %1514 = vmatpush1.bf16.msra.mxu0 %v1511_v23 }
 0x8cb   : > { %1558 = vmatprep.subr.bf16.mxu0 %v4485_v59  ;;  %v3258_v59 = vld [vmem:[#allocation7 + $0x184] ss:$16 sps:$4 sm:$0xff]  }
 0x8cd   : > { %2730 = vmatmul.mubr.msk.bf16.vlgmr.msra.gmra.mrb[20].mxu0 %vm161_vm0, %v4488_v61  ;;  %v3259_v61 = vld [vmem:[#allocation7 + $0x180] ss:$16 sps:$4 sm:$0xff]  }
 0x8ce   : > { %1559 = vmatpush1.bf16.msra.mxu0 %v4492_v45  ;;  %v3260_v45 = vld [vmem:[#allocation7 + $0x1a4] ss:$16 sps:$4 sm:$0xff]  }
 0x8cf   : > { %1560 = vmatprep.subr.bf16.mxu0 %v4495_v36  ;;  %v3261_v36 = vld [vmem:[#allocation7 + $0x1a0] ss:$16 sps:$4 sm:$0xff]  }
 0x8d2   : > { %1561 = vmatpush1.bf16.msra.mxu0 %v4498_v37  ;;  %v3262_v37 = vld [vmem:[#allocation7 + $0x1c4] ss:$16 sps:$4 sm:$0xff]  }
 0x8d3   : > { %1562 = vmatprep.subr.bf16.mxu0 %v4501_v28  ;;  %v3263_v28 = vld [vmem:[#allocation7 + $0x1c0] ss:$16 sps:$4 sm:$0xff]  }
 0x8d6   : > { %1563 = vmatpush1.bf16.msra.mxu0 %v4504_v63  ;;  %v3264_v63 = vld [vmem:[#allocation7 + $0x1e4] ss:$16 sps:$4 sm:$0xff]  }
 0x8d7   : > { %1564 = vmatprep.subr.bf16.mxu0 %v4507_v5  ;;  %v3265_v5 = vld [vmem:[#allocation7 + $0x1e0] ss:$16 sps:$4 sm:$0xff]  }
 0x8da   : > { %1565 = vmatpush1.bf16.msra.mxu0 %v4510_v6  ;;  %v3266_v6 = vld [vmem:[#allocation8 + $0x4] ss:$8 sps:$4 sm:$0xff]  }
 0x8db   : > { %1566 = vmatprep.subr.bf16.mxu0 %v4513_v7 }
 0x8de   : > { %1567 = vmatpush1.bf16.msra.mxu0 %v4516_v1 }
 0x8df   : > { %1568 = vmatprep.subr.bf16.mxu0 %v4519_v52 }
 0x8e2   : > { %1569 = vmatpush1.bf16.msra.mxu0 %v4522_v17 }
 0x8e3   : > { %1570 = vmatprep.subr.bf16.mxu0 %v4525_v26 }
 0x8e6   : > { %1571 = vmatpush1.bf16.msra.mxu0 %v4528_v16 }
 0x8e7   : > { %1572 = vmatprep.subr.bf16.mxu0 %v4531_v29  ;;  %v3267_v29 = vld [vmem:[#allocation8] ss:$8 sps:$4 sm:$0xff]  }
 0x8ea   : > { %1573 = vmatpush1.bf16.msra.mxu0 %v4534_v15  ;;  %v3268_v15 = vld [vmem:[#allocation8 + $0x14] ss:$8 sps:$4 sm:$0xff]  }
 0x8eb   : > { %1574 = vmatprep.subr.bf16.mxu0 %v4537_v12  ;;  %v3269_v12 = vld [vmem:[#allocation8 + $0x10] ss:$8 sps:$4 sm:$0xff]  }
 0x8ee   : > { %1575 = vmatpush1.bf16.msra.mxu0 %v4540_v13  ;;  %v3270_v13 = vld [vmem:[#allocation8 + $0x24] ss:$8 sps:$4 sm:$0xff]  }
 0x8ef   : > { %1576 = vmatprep.subr.bf16.mxu0 %v4543_v62  ;;  %v3271_v62 = vld [vmem:[#allocation8 + $0x20] ss:$8 sps:$4 sm:$0xff]  }
 0x8f2   : > { %1577 = vmatpush1.bf16.msra.mxu0 %v4546_v34  ;;  %v3272_v34 = vld [vmem:[#allocation8 + $0x34] ss:$8 sps:$4 sm:$0xff]  }
 0x8f3   : > { %1578 = vmatprep.subr.bf16.mxu0 %v4549_v35  ;;  %v3273_v35 = vld [vmem:[#allocation8 + $0x30] ss:$8 sps:$4 sm:$0xff]  }
 0x8f6   : > { %1579 = vmatpush1.bf16.msra.mxu0 %v4552_v38  ;;  %v3274_v38 = vld [vmem:[#allocation8 + $0x44] ss:$8 sps:$4 sm:$0xff]  }
 0x8f7   : > { %1580 = vmatprep.subr.bf16.mxu0 %v4555_v39  ;;  %v3275_v39 = vld [vmem:[#allocation8 + $0x40] ss:$8 sps:$4 sm:$0xff]  }
 0x8fa   : > { %1581 = vmatpush1.bf16.msra.mxu0 %v4558_v42  ;;  %v3276_v42 = vld [vmem:[#allocation8 + $0x54] ss:$8 sps:$4 sm:$0xff]  }
 0x8fb   : > { %1582 = vmatprep.subr.bf16.mxu0 %v3258_v59 }
 0x8fe   : > { %1583 = vmatpush1.bf16.msra.mxu0 %v3259_v61 }
 0x8ff   : > { %1584 = vmatprep.subr.bf16.mxu0 %v3260_v45 }
 0x902   : > { %1585 = vmatpush1.bf16.msra.mxu0 %v3261_v36 }
 0x903   : > { %1586 = vmatprep.subr.bf16.mxu0 %v3262_v37 }
 0x906   : > { %1587 = vmatpush1.bf16.msra.mxu0 %v3263_v28 }
 0x907   : > { %1588 = vmatprep.subr.bf16.mxu0 %v3264_v63 }
 0x90a   : > { %1589 = vmatpush1.bf16.msra.mxu0 %v3265_v5 }
 0x90b   : > { %1698 = vmatprep.subr.bf16.mxu0 %v3266_v6 }
 0x9a0   : > { %v4687_v7 = vpop.f32.mrb[20].mxu0 }
 0x9a1   : > { %v4689_v1 = vpop.f32.mrb[21].mxu0 }
 0x9a2   : > { %v4691_v52 = vpop.f32.mrb[22].mxu0 }
 0x9a3   : > { %v1556_v17 = vpack.c.bf16 %v4691_v52, %v4687_v7  ;;  %v4695_v26 = vpop.f32.mrb[23].mxu0 }
 0x9a4   : > { %v1557_v16 = vpack.c.bf16 %v4695_v26, %v4689_v1 }
 0x9a6   : > { %1590 = vmatprep.mubr.bf16.mxu0 %v1557_v16  ;;  %1633 = vmatprep.mubr.bf16.mxu1 %v1557_v16 }
 0x9a7   : > { %1591 = vmatmul.mubr.bf16.vlgmr.msra.gmra.mrb[24].mxu0 %v1556_v17  ;;  %1634 = vmatmul.mubr.bf16.vlgmr.msra.gmra.mrb[28].mxu1 %v1556_v17 }
 0x9a8   : > { %1699 = vmatpush1.bf16.msra.mxu0 %v3267_v29 }
 0x9a9   : > { %1700 = vmatprep.subr.bf16.mxu0 %v3268_v15 }
 0x9ac   : > { %1701 = vmatpush1.bf16.msra.mxu0 %v3269_v12 }
 0x9ad   : > { %1702 = vmatprep.subr.bf16.mxu0 %v3270_v13 }
 0x9b0   : > { %1703 = vmatpush1.bf16.msra.mxu0 %v3271_v62 }
 0x9b1   : > { %1704 = vmatprep.subr.bf16.mxu0 %v3272_v34 }
 0x9b4   : > { %1705 = vmatpush1.bf16.msra.mxu0 %v3273_v35 }
 0x9b5   : > { %1706 = vmatprep.subr.bf16.mxu0 %v3274_v38 }
 0x9b8   : > { %1707 = vmatpush1.bf16.msra.mxu0 %v3275_v39 }
 0x9b9   : > { %1708 = vmatprep.subr.bf16.mxu0 %v3276_v42 }
 0x9bc   : > { %1709 = vmatpush1.bf16.msra.mxu0 %v3277_v43 }
 0x9bd   : > { %1710 = vmatprep.subr.bf16.mxu0 %v3278_v2 }
 0x9c0   : > { %1711 = vmatpush1.bf16.msra.mxu0 %v3279_v30 }
 0x9c1   : > { %1712 = vmatprep.subr.bf16.mxu0 %v3280_v49 }
 0x9c4   : > { %1713 = vmatpush1.bf16.msra.mxu0 %v3281_v55 }
 0x9c5   : > { %1714 = vmatprep.subr.bf16.mxu0 %v3282_v48 }
 0x9c8   : > { %1715 = vmatpush1.bf16.msra.mxu0 %v3283_v27 }
 0x9c9   : > { %1716 = vmatprep.subr.bf16.mxu0 %v3284_v24 }
 0x9cc   : > { %1717 = vmatpush1.bf16.msra.mxu0 %v3285_v4 }
 0x9cd   : > { %1718 = vmatprep.subr.bf16.mxu0 %v3286_v0 }
 0x9d0   : > { %1719 = vmatpush1.bf16.msra.mxu0 %v3287_v46 }
 0x9d1   : > { %1720 = vmatprep.subr.bf16.mxu0 %v3288_v47 }
 0x9d4   : > { %1721 = vmatpush1.bf16.msra.mxu0 %v3289_v53 }
 0x9d5   : > { %1722 = vmatprep.subr.bf16.mxu0 %v3290_v51 }
 0x9d8   : > { %1723 = vmatpush1.bf16.msra.mxu0 %v3291_v57 }
 0x9d9   : > { %1724 = vmatprep.subr.bf16.mxu0 %v3292_v31 }
 0x9dc   : > { %1725 = vmatpush1.bf16.msra.mxu0 %v3293_v58 }
 0x9dd   : > { %1726 = vmatprep.subr.bf16.mxu0 %v3294_v10 }
 0x9e0   : > { %1727 = vmatpush1.bf16.msra.mxu0 %v3295_v41 }
 0x9e1   : > { %1728 = vmatprep.subr.bf16.mxu0 %v3296_v33 }
 0x9e4   : > { %1729 = vmatpush1.bf16.msra.mxu0 %v3297_v44 }
 0xa7a   : > { %v1592_v3 = vpop.f32.mrb[24].mxu0  ;;  %v1635_v9 = vpop.f32.mrb[28].mxu1 }
 0xa7b   : > { %v1593_v40 = vadd.f32 %v1592_v3, %v5077_v25  ;;  %v1594_v8 = vpop.f32.mrb[25].mxu0  ;;  %v1637_v20 = vpop.f32.mrb[29].mxu1  ;;  %v1636_v43 = vadd.f32 %v1635_v9, %v4282_v18 }
 0xa7c   : > { %v1595_v21 = vadd.f32 %v1594_v8, %v4230_v11  ;;  %v1596_v32 = vpop.f32.mrb[26].mxu0  ;;  %v1639_v54 = vpop.f32.mrb[30].mxu1  ;;  %v1638_v2 = vadd.f32 %v1637_v20, %v4285_v19 }
 0xa7d   : > { %v2731_v22 = vmul.f32 -1.442695, %v1593_v40  ;;  %v1597_v50 = vadd.f32 %v1596_v32, %v5077_v25  ;;  %v1598_v23 = vpop.f32.mrb[27].mxu0  ;;  %v1641_v14 = vpop.f32.mrb[31].mxu1  ;;  %v2733_v30 = vmul.f32 -1.442695, %v1636_v43  ;;  %v1640_v55 = vadd.f32 %v1639_v54, %v4282_v18 }
 0xa7e   : > { %v2732_v59 = vmul.f32 -1.442695, %v1595_v21  ;;  %v1599_v61 = vadd.f32 %v1598_v23, %v4230_v11  ;;  %v2734_v49 = vmul.f32 -1.442695, %v1638_v2  ;;  %v1642_v48 = vadd.f32 %v1641_v14, %v4285_v19  ;;  %v3325_v43 = vld [vmem:[#allocation11 + $0x80] ss:$8 sps:$4 sm:$0xff] (%p144_p0)  }
 0xa7f   : > { %3161 = vpow2.f32 %v2731_v22  ;;  %v2735_v45 = vmul.f32 -1.442695, %v1597_v50  ;;  %v2737_v27 = vmul.f32 -1.442695, %v1640_v55  ;;  %v3326_v2 = vld [vmem:[#allocation11 + $0x94] ss:$8 sps:$4 sm:$0xff] (%p144_p0)  }
 0xa80   : > { %3163 = vpow2.f32 %v2732_v59  ;;  %v2736_v36 = vmul.f32 -1.442695, %v1599_v61  ;;  %v2738_v24 = vmul.f32 -1.442695, %v1642_v48  ;;  %v3331_v55 = vld [vmem:[#allocation11 + $0xa0] ss:$8 sps:$4 sm:$0xff] (%p144_p0)  }
 0xa81   : > { %3165 = vpow2.f32 %v2735_v45  ;;  %v3332_v48 = vld [vmem:[#allocation11 + $0xb4] ss:$8 sps:$4 sm:$0xff] (%p144_p0)  }
 0xa82   : > { %3167 = vpow2.f32 %v2736_v36 }
 0xa89   : > { %v3162_v37 = vpop.eup %3161 }
 0xa8a   : > { %v1668_v28 = vadd.f32 1.0, %v3162_v37  ;;  %v3164_v63 = vpop.eup %3163 }
 0xa8b   : > { %v1669_v5 = vadd.f32 1.0, %v3164_v63  ;;  %v3166_v6 = vpop.eup %3165  ;;  %v3301_v63 = vld [vmem:[#allocation11] ss:$8 sps:$4 sm:$0xff] (%p144_p0)  }
 0xa8c   : > { %3169 = vrcp.f32 %v1668_v28  ;;  %v1672_v17 = vadd.f32 1.0, %v3166_v6  ;;  %v3168_v16 = vpop.eup %3167 }
 0xa8d   : > { %3171 = vrcp.f32 %v1669_v5  ;;  %v1673_v29 = vadd.f32 1.0, %v3168_v16  ;;  %v3304_v16 = vld [vmem:[#allocation11 + $0x10] ss:$8 sps:$4 sm:$0xff] (%p144_p0)  }
 0xa8e   : > { %3173 = vrcp.f32 %v1672_v17  ;;  %v3302_v17 = vld [vmem:[#allocation11 + $0x14] ss:$8 sps:$4 sm:$0xff] (%p144_p0)  }
 0xa8f   : > { %3175 = vrcp.f32 %v1673_v29  ;;  %v3305_v29 = vld [vmem:[#allocation11 + $0x24] ss:$8 sps:$4 sm:$0xff] (%p144_p0)  }
 0xa90   : > { %3177 = vpow2.f32 %v2733_v30  ;;  %v3328_v30 = vld [vmem:[#allocation11 + $0x90] ss:$8 sps:$4 sm:$0xff] (%p144_p0)  }
 0xa91   : > { %3179 = vpow2.f32 %v2734_v49  ;;  %v3329_v49 = vld [vmem:[#allocation11 + $0xa4] ss:$8 sps:$4 sm:$0xff] (%p144_p0)  }
 0xa92   : > { %3181 = vpow2.f32 %v2737_v27  ;;  %v3334_v27 = vld [vmem:[#allocation11 + $0xb0] ss:$8 sps:$4 sm:$0xff] (%p144_p0)  }
 0xa93   : > { %3183 = vpow2.f32 %v2738_v24  ;;  %v3335_v24 = vld [vmem:[#allocation11 + $0xc4] ss:$8 sps:$4 sm:$0xff] (%p144_p0)  }
 0xa96   : > { %v3170_v15 = vpop.eup %3169 }
 0xa97   : > { %v1692_v11 = vmul.f32 %v3170_v15, %v4687_v7  ;;  %v3172_v12 = vpop.eup %3171  ;;  %v3307_v15 = vld [vmem:[#allocation11 + $0x20] ss:$8 sps:$4 sm:$0xff] (%p144_p0)  }
 0xa98   : > { %v1693_v13 = vmul.f32 %v3172_v12, %v4689_v1  ;;  %v3174_v62 = vpop.eup %3173  ;;  %v3310_v12 = vld [vmem:[#allocation11 + $0x30] ss:$8 sps:$4 sm:$0xff] (%p144_p0)  }
 0xa99   : > { %v1694_v34 = vmul.f32 %v3174_v62, %v4691_v52  ;;  %v3176_v35 = vpop.eup %3175  ;;  %v3316_v62 = vld [vmem:[#allocation11 + $0x50] ss:$8 sps:$4 sm:$0xff] (%p144_p0)  }
 0xa9a   : > { %v1695_v38 = vmul.f32 %v3176_v35, %v4695_v26  ;;  %v3178_v4 = vpop.eup %3177  ;;  %v3319_v35 = vld [vmem:[#allocation11 + $0x60] ss:$8 sps:$4 sm:$0xff] (%p144_p0)  }
 0xa9b   : > { %v1696_v39 = vpack.c.bf16 %v1694_v34, %v1692_v11  ;;  %v3180_v0 = vpop.eup %3179  ;;  %v1670_v46 = vadd.f32 1.0, %v3178_v4  ;;  %v3308_v11 = vld [vmem:[#allocation11 + $0x34] ss:$8 sps:$4 sm:$0xff] (%p144_p0)   ;;  %v3317_v34 = vld [vmem:[#allocation11 + $0x64] ss:$8 sps:$4 sm:$0xff] (%p144_p0)  }
 0xa9c   : > { %v1697_v42 = vpack.c.bf16 %v1695_v38, %v1693_v13  ;;  %v1671_v47 = vadd.f32 1.0, %v3180_v0  ;;  %v3182_v53 = vpop.eup %3181  ;;  %v3311_v13 = vld [vmem:[#allocation11 + $0x44] ss:$8 sps:$4 sm:$0xff] (%p144_p0)   ;;  %v3320_v38 = vld [vmem:[#allocation11 + $0x74] ss:$8 sps:$4 sm:$0xff] (%p144_p0)  }
 0xa9d   : > { %v3184_v57 = vpop.eup %3183  ;;  %3185 = vrcp.f32 %v1670_v46  ;;  %v1674_v10 = vadd.f32 1.0, %v3182_v53  ;;  %v3397_v0 = vld [vmem:[#allocation13] ss:$8 sps:$4 sm:$0xff] (%p144_p0)   ;;  %v3398_v46 = vld [vmem:[#allocation13 + $0x14] ss:$8 sps:$4 sm:$0xff] (%p144_p0)  }
 0xa9e   : > { %1730 = vmatprep.mubr.bf16.mxu0 %v1697_v42  ;;  %3187 = vrcp.f32 %v1671_v47  ;;  %v1675_v44 = vadd.f32 1.0, %v3184_v57  ;;  %v3323_v42 = vld [vmem:[#allocation11 + $0x84] ss:$8 sps:$4 sm:$0xff] (%p144_p0)   ;;  %v3400_v47 = vld [vmem:[#allocation13 + $0x10] ss:$8 sps:$4 sm:$0xff] (%p144_p0)  }
 0xa9f   : > { %1731 = vmatmul.mubr.bf16.vlgmr.msra.gmra.mrb[28].mxu0 %v1696_v39  ;;  %v3322_v39 = vld [vmem:[#allocation11 + $0x70] ss:$8 sps:$4 sm:$0xff] (%p144_p0)   ;;  %v3337_v53 = vld [vmem:[#allocation11 + $0xc0] ss:$8 sps:$4 sm:$0xff] (%p144_p0)   ;;  %v3338_v57 = vld [vmem:[#allocation11 + $0xd4] ss:$8 sps:$4 sm:$0xff] (%p144_p0)  }
 0xaa7   : > { %v3186_v9 = vpop.eup %3185 }
 0xaa8   : > { %v3188_v25 = vpop.eup %3187 }
 0xb72   : > { %v1732_v51 = vpop.f32.mrb[28].mxu0 }
 0xb73   : > { %v1733_v31 = vadd.f32 %v1732_v51, %v4299_v60  ;;  %v1734_v58 = vpop.f32.mrb[29].mxu0  ;;  %v3401_v51 = vld [vmem:[#allocation13 + $0x24] ss:$8 sps:$4 sm:$0xff] (%p144_p0)  }
 0xb74   : > { %v1735_v18 = vadd.f32 %v1734_v58, %v4302_v56  ;;  %v1736_v19 = vpop.f32.mrb[30].mxu0  ;;  %v3340_v58 = vld [vmem:[#allocation11 + $0xd0] ss:$8 sps:$4 sm:$0xff] (%p144_p0)  }
 0xb75   : > { %3189 = vtanh.f32 %v1733_v31  ;;  %v1737_v41 = vadd.f32 %v1736_v19, %v4299_v60  ;;  %v1738_v33 = vpop.f32.mrb[31].mxu0  ;;  %v3403_v31 = vld [vmem:[#allocation13 + $0x20] ss:$8 sps:$4 sm:$0xff] (%p144_p0)   ;;  %v3341_v19 = vld [vmem:[#allocation11 + $0xe4] ss:$8 sps:$4 sm:$0xff] (%p144_p0)  }
 0xb76   : > { %3191 = vtanh.f32 %v1735_v18  ;;  %v1739_v3 = vadd.f32 %v1738_v33, %v4302_v56  ;;  %v3404_v18 = vld [vmem:[#allocation13 + $0x34] ss:$8 sps:$4 sm:$0xff] (%p144_p0)  }
 0xb77   : > { %3193 = vtanh.f32 %v1737_v41  ;;  %v3406_v41 = vld [vmem:[#allocation13 + $0x30] ss:$8 sps:$4 sm:$0xff] (%p144_p0)   ;;  %v3344_v33 = vld [vmem:[#allocation11 + $0xf4] ss:$8 sps:$4 sm:$0xff] (%p144_p0)  }
 0xb78   : > { %3195 = vtanh.f32 %v1739_v3  ;;  %v3409_v3 = vld [vmem:[#allocation13 + $0x40] ss:$8 sps:$4 sm:$0xff] (%p144_p0)  }
 0xb79   : > { %3197 = vrcp.f32 %v1674_v10  ;;  %v3343_v10 = vld [vmem:[#allocation11 + $0xe0] ss:$8 sps:$4 sm:$0xff] (%p144_p0)  }
 0xb7a   : > { %3199 = vrcp.f32 %v1675_v44  ;;  %v3407_v44 = vld [vmem:[#allocation13 + $0x44] ss:$8 sps:$4 sm:$0xff] (%p144_p0)  }
 0xb7f   : > { %v3190_v40 = vpop.eup %3189 }
 0xb80   : > { %v3192_v8 = vpop.eup %3191  ;;  %v1745_v20 = vsub.f32 %v3190_v40, %v4687_v7  ;;  %v3349_v40 = vld [vmem:[#allocation10 + $0x4] ss:$8 sps:$4 sm:$0xff] (%p144_p0)  }
 0xb81   : > { %v3194_v21 = vpop.eup %3193  ;;  %v1746_v32 = vsub.f32 %v3192_v8, %v4689_v1  ;;  %v5088_v8 = vld [vmem:[#allocation20_spill] sm:$0xff] (%p144_p0) }
 0xb82   : > { %v3196_v54 = vpop.eup %3195  ;;  %v1749_v60 = vmul.f32 %v3186_v9, %v1745_v20  ;;  %v1747_v22 = vsub.f32 %v3194_v21, %v4691_v52  ;;  %v3346_v9 = vld [vmem:[#allocation11 + $0xf0] ss:$8 sps:$4 sm:$0xff] (%p144_p0)  }
 0xb83   : > { %v3198_v50 = vpop.eup %3197  ;;  %v1750_v23 = vmul.f32 %v3188_v25, %v1746_v32  ;;  %v1748_v56 = vsub.f32 %v3196_v54, %v4695_v26  ;;  %v3410_v25 = vld [vmem:[#allocation13 + $0x54] ss:$8 sps:$4 sm:$0xff] (%p144_p0)   ;;  %v3412_v32 = vld [vmem:[#allocation13 + $0x50] ss:$8 sps:$4 sm:$0xff] (%p144_p0)   ;;  %v3347_v54 = vld [vmem:[#allocation10] ss:$8 sps:$4 sm:$0xff] (%p144_p0)  }
 0xb84   : > { %v3200_v14 = vpop.eup %3199  ;;  %v4720_v7 = vadd.f32 %v1749_v60, %v4687_v7   ;;  %v1751_v61 = vmul.f32 %v3198_v50, %v1747_v22  ;;  %146 = sbr.rel (!%p144_p0) target bundleno = 129 (0x81), region = 103  ;;  %v5089_v20 = vld [vmem:[#allocation22_spill] sm:$0xff] (%p144_p0)  ;;  %v3413_v50 = vld [vmem:[#allocation13 + $0x64] ss:$8 sps:$4 sm:$0xff] (%p144_p0)  }
 0xb85   : > { %v4723_v6 = vadd.f32 %v1750_v23, %v4689_v1   ;;  %v1752_v36 = vmul.f32 %v3200_v14, %v1748_v56  ;;  %v5086_v1 = vld [vmem:[#allocation21_spill] sm:$0xff] (%p144_p0)  ;;  %v1757_v21 = vpack.c.bf16 (%p144_p0), %v5089_v20, %v5088_v8  ;;  %v3352_v22 = vld [vmem:[#allocation10 + $0x14] ss:$8 sps:$4 sm:$0xff] (%p144_p0)   ;;  %v3415_v23 = vld [vmem:[#allocation13 + $0x60] ss:$8 sps:$4 sm:$0xff] (%p144_p0)  }
 0xb86   : > { %v5078_v59 = vmov %v4720_v7  ;;  %v4726_v5 = vadd.f32 %v1751_v61, %v4691_v52   ;;  %v5087_v52 = vld [vmem:[#allocation23_spill] sm:$0xff] (%p144_p0)  ;;  %v3350_v56 = vld [vmem:[#allocation10 + $0x10] ss:$8 sps:$4 sm:$0xff] (%p144_p0)   ;;  %v3355_v61 = vld [vmem:[#allocation10 + $0x24] ss:$8 sps:$4 sm:$0xff] (%p144_p0)  }
 0xb87   : > { %v5079_v45 = vmov %v4723_v6  ;;  %v4729_v4 = vadd.f32 %v1752_v36, %v4695_v26   ;;  %v5085_v7 = vmov %v5078_v59  ;;  %v1758_v26 = vpack.c.bf16 (%p144_p0), %v5087_v52, %v5086_v1  ;;  %v3416_v14 = vld [vmem:[#allocation13 + $0x74] ss:$8 sps:$4 sm:$0xff] (%p144_p0)   ;;  %v3418_v36 = vld [vmem:[#allocation13 + $0x70] ss:$8 sps:$4 sm:$0xff] (%p144_p0)   ;;  %v3421_v1 = vld [vmem:[#allocation13 + $0x80] ss:$8 sps:$4 sm:$0xff] (%p144_p0)  }
 0xb88   : > { %v5080_v37 = vmov %v4726_v5  ;;  %v5084_v6 = vmov %v5079_v45  ;;  %v3299_v7 = vld [vmem:[#allocation11 + $0x4] ss:$8 sps:$4 sm:$0xff] (%p144_p0)   ;;  %v3356_v52 = vld [vmem:[#allocation10 + $0x30] ss:$8 sps:$4 sm:$0xff] (%p144_p0)  }
 0xb89   : > { %v5081_v28 = vmov %v4729_v4  ;;  %v5083_v5 = vmov %v5080_v37  ;;  %1985 = vmatprep.subr.bf16.mxu0 (%p144_p0), %v3299_v7  ;;  %2017 = vmatprep.mubr.bf16.mxu0 (%p144_p0), %v1758_v26  ;;  %v3314_v6 = vld [vmem:[#allocation11 + $0x54] ss:$8 sps:$4 sm:$0xff] (%p144_p0)   ;;  %v3353_v7 = vld [vmem:[#allocation10 + $0x20] ss:$8 sps:$4 sm:$0xff] (%p144_p0)  }
 0xb8a   : > { %v5082_v4 = vmov %v5081_v28  ;;  %1986 = vmatpush1.bf16.msra.mxu0 (%p144_p0), %v3301_v63  ;;  %v3313_v5 = vld [vmem:[#allocation11 + $0x40] ss:$8 sps:$4 sm:$0xff] (%p144_p0)   ;;  %v1760_v60 = vpack.c.bf16 (%p144_p0), %v5081_v28, %v5079_v45  ;;  %v3419_v45 = vld [vmem:[#allocation13 + $0x84] ss:$8 sps:$4 sm:$0xff] (%p144_p0)   ;;  %v3358_v28 = vld [vmem:[#allocation10 + $0x34] ss:$8 sps:$4 sm:$0xff] (%p144_p0)  }
 0xb8b   :  { %1987 = vmatprep.subr.bf16.mxu0 %v3302_v17  ;;  %v3395_v4 = vld [vmem:[#allocation13 + $0x4] ss:$8 sps:$4 sm:$0xff]   ;;  %v3422_v26 = vld [vmem:[#allocation13 + $0x94] ss:$8 sps:$4 sm:$0xff]   ;;  %v3424_v17 = vld [vmem:[#allocation13 + $0x90] ss:$8 sps:$4 sm:$0xff]  }
 0xb8c   :  { %2457 = vmatprep.subr.bf16.mxu1 %v3395_v4  ;;  %v3361_v63 = vld [vmem:[#allocation10 + $0x44] ss:$8 sps:$4 sm:$0xff]   ;;  %v3389_v4 = vld [vmem:[#allocation10 + $0xe0] ss:$8 sps:$4 sm:$0xff]  }
 0xb8d   :  { %2458 = vmatpush1.bf16.msra.mxu1 %v3397_v0  ;;  %v3394_v0 = vld [vmem:[#allocation10 + $0xf4] ss:$8 sps:$4 sm:$0xff]  }
 0xb8e   :  { %1988 = vmatpush1.bf16.msra.mxu0 %v3304_v16  ;;  %2459 = vmatprep.subr.bf16.mxu1 %v3398_v46  ;;  %v3359_v16 = vld [vmem:[#allocation10 + $0x40] ss:$8 sps:$4 sm:$0xff]   ;;  %v3392_v46 = vld [vmem:[#allocation10 + $0xf0] ss:$8 sps:$4 sm:$0xff]  }
 0xb8f   :  { %1989 = vmatprep.subr.bf16.mxu0 %v3305_v29  ;;  %v3425_v29 = vld [vmem:[#allocation13 + $0xa4] ss:$8 sps:$4 sm:$0xff]  }
 0xb91   :  { %2460 = vmatpush1.bf16.msra.mxu1 %v3400_v47  ;;  %v1759_v47 = vpack.c.bf16 %v5080_v37, %v5078_v59  ;;  %v3442_v59 = vld [vmem:[#allocation13 + $0xf0] ss:$8 sps:$4 sm:$0xff]  }
 0xb92   :  { %1990 = vmatpush1.bf16.msra.mxu0 %v3307_v15  ;;  %2461 = vmatprep.subr.bf16.mxu1 %v3401_v51  ;;  %v3364_v15 = vld [vmem:[#allocation10 + $0x54] ss:$8 sps:$4 sm:$0xff]   ;;  %v3430_v51 = vld [vmem:[#allocation13 + $0xb0] ss:$8 sps:$4 sm:$0xff]  }
 0xb93   :  { %1991 = vmatprep.subr.bf16.mxu0 %v3308_v11  ;;  %v3427_v11 = vld [vmem:[#allocation13 + $0xa0] ss:$8 sps:$4 sm:$0xff]   ;;  %v2524_v37 = vld [vmem:[%s4782_s2] sm:$0x3] }
 0xb95   :  { %2462 = vmatpush1.bf16.msra.mxu1 %v3403_v31  ;;  %v3433_v31 = vld [vmem:[#allocation13 + $0xc0] ss:$8 sps:$4 sm:$0xff]  }
 0xb96   :  { %1992 = vmatpush1.bf16.msra.mxu0 %v3310_v12  ;;  %2463 = vmatprep.subr.bf16.mxu1 %v3404_v18  ;;  %v3362_v12 = vld [vmem:[#allocation10 + $0x50] ss:$8 sps:$4 sm:$0xff]  }
 0xb97   :  { %1993 = vmatprep.subr.bf16.mxu0 %v3311_v13  ;;  %v3367_v13 = vld [vmem:[#allocation10 + $0x64] ss:$8 sps:$4 sm:$0xff]   ;;  %v3436_v18 = vld [vmem:[#allocation13 + $0xd0] ss:$8 sps:$4 sm:$0xff]  }
 0xb99   :  { %2464 = vmatpush1.bf16.msra.mxu1 %v3406_v41  ;;  %v3440_v41 = vld [vmem:[#allocation13 + $0xf4] ss:$8 sps:$4 sm:$0xff]  }
 0xb9a   :  { %1994 = vmatpush1.bf16.msra.mxu0 %v3313_v5  ;;  %2465 = vmatprep.subr.bf16.mxu1 %v3407_v44  ;;  %v3365_v5 = vld [vmem:[#allocation10 + $0x60] ss:$8 sps:$4 sm:$0xff]   ;;  %v2231_v44 = vld [vmem:[%s4789_s9] sm:$0x3] }
 0xb9b   :  { %1995 = vmatprep.subr.bf16.mxu0 %v3314_v6  ;;  %v3370_v6 = vld [vmem:[#allocation10 + $0x74] ss:$8 sps:$4 sm:$0xff]  }
 0xb9d   :  { %2466 = vmatpush1.bf16.msra.mxu1 %v3409_v3  ;;  %v5090_v3 = vld [vmem:[#allocation86_spill] sm:$0xff] }
 0xb9e   :  { %1996 = vmatpush1.bf16.msra.mxu0 %v3316_v62  ;;  %2467 = vmatprep.subr.bf16.mxu1 %v3410_v25  ;;  %v3368_v62 = vld [vmem:[#allocation10 + $0x70] ss:$8 sps:$4 sm:$0xff]  }
 0xb9f   :  { %1997 = vmatprep.subr.bf16.mxu0 %v3317_v34  ;;  %v3373_v34 = vld [vmem:[#allocation10 + $0x84] ss:$8 sps:$4 sm:$0xff]   ;;  %v5091_v25 = vld [vmem:[#allocation87_spill] sm:$0xff] }
 0xba1   :  { %2468 = vmatpush1.bf16.msra.mxu1 %v3412_v32 }
 0xba2   :  { %1998 = vmatpush1.bf16.msra.mxu0 %v3319_v35  ;;  %2469 = vmatprep.subr.bf16.mxu1 %v3413_v50  ;;  %v3371_v35 = vld [vmem:[#allocation10 + $0x80] ss:$8 sps:$4 sm:$0xff]  }
 0xba3   :  { %1999 = vmatprep.subr.bf16.mxu0 %v3320_v38  ;;  %v3376_v38 = vld [vmem:[#allocation10 + $0x94] ss:$8 sps:$4 sm:$0xff]  }
 0xba5   :  { %2470 = vmatpush1.bf16.msra.mxu1 %v3415_v23 }
 0xba6   :  { %2000 = vmatpush1.bf16.msra.mxu0 %v3322_v39  ;;  %2471 = vmatprep.subr.bf16.mxu1 %v3416_v14  ;;  %v3374_v39 = vld [vmem:[#allocation10 + $0x90] ss:$8 sps:$4 sm:$0xff]  }
 0xba7   :  { %2001 = vmatprep.subr.bf16.mxu0 %v3323_v42  ;;  %v3379_v42 = vld [vmem:[#allocation10 + $0xa4] ss:$8 sps:$4 sm:$0xff]  }
 0xba9   :  { %2472 = vmatpush1.bf16.msra.mxu1 %v3418_v36 }
 0xbaa   :  { %2002 = vmatpush1.bf16.msra.mxu0 %v3325_v43  ;;  %2473 = vmatprep.subr.bf16.mxu1 %v3419_v45  ;;  %v3377_v43 = vld [vmem:[#allocation10 + $0xa0] ss:$8 sps:$4 sm:$0xff]   ;;  %v2285_v45 = vld [vmem:[%s4791_s11] sm:$0x3]  ;;  %s3693_s11 = smov [#allocation14]  }
 0xbab   :  { %2003 = vmatprep.subr.bf16.mxu0 %v3326_v2  ;;  %v3382_v2 = vld [vmem:[#allocation10 + $0xb4] ss:$8 sps:$4 sm:$0xff]   ;;  %s2577_s26 = sshll.u32 %s3693_s11, 4  ;;  %s2578_s26 = int_to_ptr.vmem [resolvable:$true] %s2577_s26 }
 0xbac   :  { %s3605_s18 = scalar_lea.vmem %s2578_s26, 64  ;;  %p3610_p2 = scmp.lt.s32.totalorder %s2578_s26, %s2578_s26 }
 0xbad   :  { %2474 = vmatpush1.bf16.msra.mxu1 %v3421_v1  ;;  %v2294_v1 = vrot.slane %v2285_v45, %v5091_v25  ;;  %p3606_p1 = scmp.ne.s32.totalorder %s2578_s26, %s3605_s18  ;;  %p3611_p3 = scmp.lt.s32.totalorder %s3605_s18, %s3605_s18 }
 0xbae   :  { %2004 = vmatpush1.bf16.msra.mxu0 %v3328_v30  ;;  %2475 = vmatprep.subr.bf16.mxu1 %v3422_v26  ;;  %v3380_v30 = vld [vmem:[#allocation10 + $0xb0] ss:$8 sps:$4 sm:$0xff]  }
 0xbaf   :  { %2005 = vmatprep.subr.bf16.mxu0 %v3329_v49  ;;  %v3385_v49 = vld [vmem:[#allocation10 + $0xc4] ss:$8 sps:$4 sm:$0xff]   ;;  %p3612_p4 = por %p3611_p3, %p3610_p2 }
 0xbb1   :  { %2476 = vmatpush1.bf16.msra.mxu1 %v3424_v17  ;;  %p3613_p5 = pnand %p3612_p4, %p3606_p1 }
 0xbb2   :  { %2006 = vmatpush1.bf16.msra.mxu0 %v3331_v55  ;;  %2477 = vmatprep.subr.bf16.mxu1 %v3425_v29  ;;  %v3383_v55 = vld [vmem:[#allocation10 + $0xc0] ss:$8 sps:$4 sm:$0xff]  }
 0xbb3   :  { %2007 = vmatprep.subr.bf16.mxu0 %v3332_v48  ;;  %v3388_v48 = vld [vmem:[#allocation10 + $0xd4] ss:$8 sps:$4 sm:$0xff]  }
 0xbb5   :  { %2478 = vmatpush1.bf16.msra.mxu1 %v3427_v11 }
 0xbb6   :  { %2008 = vmatpush1.bf16.msra.mxu0 %v3334_v27  ;;  %v3386_v27 = vld [vmem:[#allocation10 + $0xd0] ss:$8 sps:$4 sm:$0xff]  }
 0xbb7   :  { %2009 = vmatprep.subr.bf16.mxu0 %v3335_v24  ;;  %v3391_v24 = vld [vmem:[#allocation10 + $0xe4] ss:$8 sps:$4 sm:$0xff]  }
 0xbba   :  { %2010 = vmatpush1.bf16.msra.mxu0 %v3337_v53  ;;  %v3428_v53 = vld [vmem:[#allocation13 + $0xb4] ss:$8 sps:$4 sm:$0xff]  }
 0xbbb   :  { %2011 = vmatprep.subr.bf16.mxu0 %v3338_v57  ;;  %2479 = vmatprep.subr.bf16.mxu1 %v3428_v53  ;;  %v3431_v57 = vld [vmem:[#allocation13 + $0xc4] ss:$8 sps:$4 sm:$0xff]  }
 0xbbc   :  { %2480 = vmatpush1.bf16.msra.mxu1 %v3430_v51 }
 0xbbd   :  { %2481 = vmatprep.subr.bf16.mxu1 %v3431_v57 }
 0xbbe   :  { %2012 = vmatpush1.bf16.msra.mxu0 %v3340_v58  ;;  %v3434_v58 = vld [vmem:[#allocation13 + $0xd4] ss:$8 sps:$4 sm:$0xff]  }
 0xbbf   :  { %2013 = vmatprep.subr.bf16.mxu0 %v3341_v19  ;;  %v3437_v19 = vld [vmem:[#allocation13 + $0xe4] ss:$8 sps:$4 sm:$0xff]  }
 0xbc0   :  { %2482 = vmatpush1.bf16.msra.mxu1 %v3433_v31 }
 0xbc1   :  { %2483 = vmatprep.subr.bf16.mxu1 %v3434_v58 }
 0xbc2   :  { %2014 = vmatpush1.bf16.msra.mxu0 %v3343_v10  ;;  %v3439_v10 = vld [vmem:[#allocation13 + $0xe0] ss:$8 sps:$4 sm:$0xff]  }
 0xbc3   :  { %2015 = vmatprep.subr.bf16.mxu0 %v3344_v33  ;;  %v3691_v33 = vmov 0  }
 0xbc4   :  { %2484 = vmatpush1.bf16.msra.mxu1 %v3436_v18  ;;  %3298 = vset.pattern.permute.xlu0 %v3691_v33 }
 0xbc5   :  { %2485 = vmatprep.subr.bf16.mxu1 %v3437_v19  ;;  %2527 = vperm.xlu0 %3298, %v2524_v37  }
 0xbc6   :  { %2016 = vmatpush1.bf16.msra.mxu0 %v3346_v9  ;;  %v2236_v9 = vrot.slane %v2231_v44, %v5090_v3 }
 0xbc7   :  { %2188 = vmatprep.subr.bf16.mxu0 %v3349_v40  ;;  %v2240_v40 = vrot.slane %v2231_v44, %v5091_v25  ;;  %v5092_v44 = vld [vmem:[#allocation85_spill] sm:$0xff] }
 0xbc8   :  { %2486 = vmatpush1.bf16.msra.mxu1 %v3439_v10 }
 0xbc9   :  { %2018 = vmatmul.mubr.bf16.vlgmr.msra.gmra.mrb[0].mxu0 %v1757_v21  ;;  %2487 = vmatprep.subr.bf16.mxu1 %v3440_v41 }
 0xbca   :  { %2189 = vmatpush1.bf16.msra.mxu0 %v3347_v54  ;;  %2220 = vmatprep.mubr.bf16.mxu0 %v1760_v60 }
 0xbcb   :  { %2190 = vmatprep.subr.bf16.mxu0 %v3352_v22 }
 0xbcc   :  { %2488 = vmatpush1.bf16.msra.mxu1 %v3442_v59 }
 0xbce   :  { %2191 = vmatpush1.bf16.msra.mxu0 %v3350_v56 }
 0xbcf   :  { %2192 = vmatprep.subr.bf16.mxu0 %v3355_v61 }
 0xbd2   :  { %2193 = vmatpush1.bf16.msra.mxu0 %v3353_v7 }
 0xbd3   :  { %2194 = vmatprep.subr.bf16.mxu0 %v3358_v28  ;;  %v2290_v28 = vrot.slane %v2285_v45, %v5090_v3 }
 0xbd6   :  { %2195 = vmatpush1.bf16.msra.mxu0 %v3356_v52 }
 0xbd7   :  { %2196 = vmatprep.subr.bf16.mxu0 %v3361_v63 }
 0xbda   :  { %2197 = vmatpush1.bf16.msra.mxu0 %v3359_v16 }
 0xbdb   :  { %2198 = vmatprep.subr.bf16.mxu0 %v3364_v15 }
 0xbde   :  { %2199 = vmatpush1.bf16.msra.mxu0 %v3362_v12 }
 0xbdf   :  { %2200 = vmatprep.subr.bf16.mxu0 %v3367_v13 }
 0xbe2   :  { %2201 = vmatpush1.bf16.msra.mxu0 %v3365_v5 }
 0xbe3   :  { %2202 = vmatprep.subr.bf16.mxu0 %v3370_v6 }
 0xbe6   :  { %2203 = vmatpush1.bf16.msra.mxu0 %v3368_v62 }
 0xbe7   :  { %2204 = vmatprep.subr.bf16.mxu0 %v3373_v34 }
 0xbea   :  { %2205 = vmatpush1.bf16.msra.mxu0 %v3371_v35 }
 0xbeb   :  { %2206 = vmatprep.subr.bf16.mxu0 %v3376_v38 }
 0xbee   :  { %2207 = vmatpush1.bf16.msra.mxu0 %v3374_v39 }
 0xbef   :  { %2208 = vmatprep.subr.bf16.mxu0 %v3379_v42 }
 0xbf2   :  { %2209 = vmatpush1.bf16.msra.mxu0 %v3377_v43 }
 0xbf3   :  { %2210 = vmatprep.subr.bf16.mxu0 %v3382_v2 }
 0xbf6   :  { %2211 = vmatpush1.bf16.msra.mxu0 %v3380_v30 }
 0xbf7   :  { %2212 = vmatprep.subr.bf16.mxu0 %v3385_v49 }
 0xbfa   :  { %2213 = vmatpush1.bf16.msra.mxu0 %v3383_v55 }
 0xbfb   :  { %2214 = vmatprep.subr.bf16.mxu0 %v3388_v48 }
 0xbfe   :  { %2215 = vmatpush1.bf16.msra.mxu0 %v3386_v27 }
 0xbff   :  { %2216 = vmatprep.subr.bf16.mxu0 %v3391_v24 }
 0xc02   :  { %2217 = vmatpush1.bf16.msra.mxu0 %v3389_v4  ;;  %v3692_v4 = vmov 1983009808  }
 0xc03   :  { %2218 = vmatprep.subr.bf16.mxu0 %v3394_v0  ;;  %v2542_v0 = vunpack.c.l.s4 %v3692_v4 }
 0xc05   :  { %v2543_v19 = vunpack.c.0.s8 %v2542_v0 }
 0xc06   :  { %2219 = vmatpush1.bf16.msra.mxu0 %v3392_v46 }
 0xc07   :  { %v2546_v3 = vsub.s32 %v2543_v19, %v5092_v44 }
 0xc09   :  { %2221 = vmatmul.mubr.bf16.vlgmr.msra.gmra.mrb[0].mxu0 %v1759_v47 }
 0xc44   :  { %v2528_v55 = vpop.permute.xlu0 %2527 }
 0xc45   :  { %v2529_v51 = vrot.slane %v2528_v55, 1 }
 0xcdc   :  { %v2222_v8 = vpop.f32.mrb[0].mxu0 }
 0xcdd   :  { %v2243_v20 = vadd.f32 %v2236_v9, %v2222_v8  ;;  %v2224_v21 = vpop.f32.mrb[1].mxu0 }
 0xcde   :  { %v2244_v32 = vadd.f32 %v2240_v40, %v2224_v21  ;;  %v2226_v54 = vpop.f32.mrb[2].mxu0 }
 0xcdf   :  { %3443 = vtanh.f32 %v2243_v20  ;;  %v2245_v60 = vadd.f32 %v2236_v9, %v2226_v54  ;;  %v2228_v22 = vpop.f32.mrb[3].mxu0 }
 0xce0   :  { %3445 = vtanh.f32 %v2244_v32  ;;  %v2246_v50 = vadd.f32 %v2240_v40, %v2228_v22 }
 0xce1   :  { %3447 = vtanh.f32 %v2245_v60 }
 0xce2   :  { %3449 = vtanh.f32 %v2246_v50 }
 0xce9   :  { %v3444_v23 = vpop.eup %3443 }
 0xcea   :  { %v3446_v56 = vpop.eup %3445 }
 0xceb   :  { %v3448_v14 = vpop.eup %3447 }
 0xcec   :  { %v3450_v61 = vpop.eup %3449  ;;  %v2251_v36 = vpack.c.bf16 %v3448_v14, %v3444_v23 }
 0xced   :  { %v2252_v7 = vpack.c.bf16 %v3450_v61, %v3446_v56 }
 0xcef   :  { %2489 = vmatprep.mubr.bf16.mxu1 %v2252_v7 }
 0xcf0   :  { %2490 = vmatmul.mubr.bf16.vlgmr.msra.gmra.mrb[0].mxu1 %v2251_v36 }
 0xdc3   :  { %v2491_v52 = vpop.f32.mrb[0].mxu1 }
 0xdc4   :  { %v2492_v26 = vadd.f32 %v2491_v52, %v2290_v28  ;;  %v2493_v63 = vpop.f32.mrb[1].mxu1 }
 0xdc5   :  { %v2494_v17 = vadd.f32 %v2493_v63, %v2294_v1  ;;  %v2495_v16 = vpop.f32.mrb[2].mxu1 }
 0xdc6   :  { %v2500_v29 = vrot.slane %v2492_v26, 4  ;;  %v2496_v15 = vadd.f32 %v2495_v16, %v2290_v28  ;;  %v2497_v11 = vpop.f32.mrb[3].mxu1 }
 0xdc7   :  { %v2506_v12 = vrot.slane %v2494_v17, 4  ;;  %v2498_v13 = vadd.f32 %v2497_v11, %v2294_v1 }
 0xdc8   :  { %v2501_v5 = vadd.f32 %v2500_v29, %v2492_v26  ;;  %v2512_v6 = vrot.slane %v2496_v15, 4 }
 0xdc9   :  { %v2507_v62 = vadd.f32 %v2506_v12, %v2494_v17  ;;  %v2518_v34 = vrot.slane %v2498_v13, 4 }
 0xdca   :  { %v2502_v35 = vrot.slane %v2501_v5, 2  ;;  %v2513_v38 = vadd.f32 %v2512_v6, %v2496_v15 }
 0xdcb   :  { %v2508_v39 = vrot.slane %v2507_v62, 2  ;;  %v2519_v42 = vadd.f32 %v2518_v34, %v2498_v13 }
 0xdcc   :  { %v2503_v43 = vadd.f32 %v2502_v35, %v2501_v5  ;;  %v2514_v2 = vrot.slane %v2513_v38, 2 }
 0xdcd   :  { %v2509_v30 = vadd.f32 %v2508_v39, %v2507_v62  ;;  %v2520_v49 = vrot.slane %v2519_v42, 2 }
 0xdce   :  { %v2515_v48 = vadd.f32 %v2514_v2, %v2513_v38  ;;  %v2504_v27 = vrot.slane %v2503_v43, 1 }
 0xdcf   :  { %v2521_v24 = vadd.f32 %v2520_v49, %v2519_v42  ;;  %v2510_v46 = vrot.slane %v2509_v30, 1 }
 0xdd0   :  { %v2516_v47 = vrot.slane %v2515_v48, 1  ;;  %v2505_v53 = vadd.f32 %v2504_v27, %v2503_v43 }
 0xdd1   :  { %v2522_v57 = vrot.slane %v2521_v24, 1  ;;  %v2511_v31 = vadd.f32 %v2510_v46, %v2509_v30 }
 0xdd2   :  { %v2517_v58 = vadd.f32 %v2516_v47, %v2515_v48  ;;  %v2532_v18 = vmul.f32 %v2528_v55, %v2505_v53 }
 0xdd3   :  { %v2523_v10 = vadd.f32 %v2522_v57, %v2521_v24  ;;  %v2533_v41 = vmul.f32 %v2528_v55, %v2511_v31 }
 0xdd4   :  { %v2534_v59 = vmul.f32 %v2529_v51, %v2517_v58 }
 0xdd5   :  { %v2535_v37 = vmul.f32 %v2529_v51, %v2523_v10  ;;  %v2540_v33 = vcombine.low %v2532_v18, %v2533_v41 }
 0xdd7   :  { %v2548_v9 = vcombine.low %v2534_v59, %v2535_v37  ;;  %v2547_v40 = vrot.slane %v2540_v33, %v2546_v3 }
 0xdd9   :  { %v2555_v25 = vrot.slane %v2548_v9, %v2546_v3 }
 0xddb   :  { %v2560_v8 = vrot.slane %v2555_v25, 7 }
 0xddd   :  { %v2562_v20 = vsel %vm2561_vm1, %v2560_v8, %v2547_v40 }
 0xdde   :  { %v2564_v21 = vsel %vm2563_vm2, %v2560_v8, %v2562_v20 }
 0xddf   :  { %v2566_v32 = vsel %vm2565_vm3, %v2560_v8, %v2564_v21 }
 0xde0   :  { %v2568_v54 = vsel %vm2567_vm4, %v2560_v8, %v2566_v32 }
 0xde1   :  { %2570 = vst [vmem:[#allocation14] sm:$0xf] %v2568_v54 }
 0xde2   :  { %3616 = shalt.err (!%p3613_p5)
}
 0xde3   :  { %s3617_s3 = scalar_lea.hbm %s4792_s12, 64 }
 0xde4   :  { %p3618_p6 = scmp.ne.s32.totalorder %s4792_s12, %s3617_s3  ;;  %p3621_p7 = scmp.lt.u32.totalorder %s3617_s3, %s4792_s12 }
 0xde6   :  { %p3623_p8 = pnand %p3621_p7, %p3618_p6 }
 0xde8   :  { %3626 = shalt.err (!%p3623_p8)
}
 0xde9   :  { %2580 = dma.vmem_to_hbm [thread:$0]  %s2578_s26, 64, %s4792_s12, [#allocation4]  }
 0xdea   :  { %3655 = dma.done.wait [#allocation4], 64  }
 0xdeb   :  { %3656 = vsyncadd [#allocation4], 4294967232 }
 0xdec   :  { %2584 = vsyncpa [#allocation3], 1 }
 0xded   :  { %2585 = vsyncpa [#allocation6], 1 }
 0xdee   :  { %2586 = vsyncpa [#allocation9], 1 }
 0xdef   :  { %2587 = vsyncpa [#allocation12], 1 }
 0xdf0   :  { %2588 = vsyncpa [#allocation4], 1 }

</bundles_post_ra>
